<compile_context>
chip_gen: v5e
topology: v5e:2x2
jax: 0.10.0
libtpu: 0.0.40
codegen_flags: <defaults>
</compile_context>

<pallas_src>
import functools

import jax
import jax.numpy as jnp
from jax import lax
from jax.experimental import pallas as pl
from jax.experimental.pallas import tpu as pltpu

_NEG = float(-jnp.finfo(jnp.float32).max)  # matches max_neg_value semantics


def _round_up(x, m):
    return ((x + m - 1) // m) * m


def _lane_expand(x, width):
    """x: (rows, 128) lane-replicated -> (rows, width) with same per-row value."""
    w0 = x.shape[-1]
    if width == w0:
        return x
    if width < w0:
        return x[:, :width]
    if width % w0 == 0:
        return jnp.tile(x, (1, width // w0))
    return jnp.broadcast_to(x[:, :1], (x.shape[0], width))


def _attend_kernel(mask_ref, q_ref, k_ref, v_ref, o_ref,
                   q_sc, m_sc, l_sc, acc_sc, *,
                   scale, g, d, matmul_dtype, exp_dtype, has_mask):
    kv = pl.program_id(3)

    @pl.when(kv == 0)
    def _init():
        m_sc[...] = jnp.full(m_sc.shape, -jnp.inf, m_sc.dtype)
        l_sc[...] = jnp.zeros(l_sc.shape, l_sc.dtype)
        acc_sc[...] = jnp.zeros(acc_sc.shape, acc_sc.dtype)
        # Hoist the softmax scale + matmul-dtype cast of q out of the kv loop.
        q_sc[...] = (q_ref[0] * scale).astype(q_sc.dtype)

    if has_mask:
        valid = mask_ref[0, 0] != 0.0          # (1, tk) key padding mask

    pv_parts, alpha_parts = [], []
    for h in range(g):                         # g is a small static int (1..4)
        k_h = k_ref[0, h]                      # (tk, d)
        v_h = v_ref[0, h]                      # (tk, d)
        if matmul_dtype is not None:
            k_h = k_h.astype(matmul_dtype)
            v_h = v_h.astype(matmul_dtype)

        # scores (tq, tk) in f32 on the MXU; contract last dims of q and k so
        # no explicit transpose of the k tile is emitted.
        s = lax.dot_general(q_sc[h], k_h,
                            dimension_numbers=(((1,), (1,)), ((), ())),
                            preferred_element_type=jnp.float32)
        if has_mask:
            s = jnp.where(valid, s, _NEG)      # broadcast (1, tk) over rows

        # Online softmax update; m/l are lane-replicated (tq, 128) scratches.
        m_prev = m_sc[h]
        l_prev = l_sc[h]
        m_new = jnp.maximum(m_prev, jnp.max(s, axis=-1, keepdims=True))
        alpha = jnp.exp(m_prev - m_new)                       # (tq, 128)
        s = s - _lane_expand(m_new, s.shape[-1])
        if exp_dtype is not None:              # bf16 EUP opt-in (v6e/v7x only)
            s = s.astype(exp_dtype)
        p = jnp.exp(s)                                        # (tq, tk)
        l_sc[h] = alpha * l_prev + jnp.sum(
            p.astype(jnp.float32), axis=-1, keepdims=True)
        m_sc[h] = m_new

        # PV matmul also in matmul_dtype (was silently f32 before).
        p_mm = p.astype(matmul_dtype if matmul_dtype is not None else v_h.dtype)
        pv_parts.append(lax.dot_general(
            p_mm, v_h, dimension_numbers=(((1,), (0,)), ((), ())),
            preferred_element_type=jnp.float32))              # (tq, d)
        alpha_parts.append(_lane_expand(alpha, d))

    pv = pv_parts[0] if g == 1 else jnp.concatenate(pv_parts, axis=-1)
    rescale = alpha_parts[0] if g == 1 else jnp.concatenate(alpha_parts, axis=-1)
    acc_sc[...] = rescale * acc_sc[...] + pv   # lane-dense (tq, g*d) update

    @pl.when(kv == pl.num_programs(3) - 1)
    def _finalize():
        parts = []
        for h in range(g):
            l_h = l_sc[h]
            r = pl.reciprocal(l_h, approx=True)
            r = r * (2.0 - l_h * r)            # one Newton step -> ~exact 1/l
            parts.append(_lane_expand(r, d))
        inv = parts[0] if g == 1 else jnp.concatenate(parts, axis=-1)
        o_ref[0, 0] = (acc_sc[...] * inv).astype(o_ref.dtype)


def attend_forward(q, k, v, mask=None, attn_bias=None, scale=None,
                   tq=256, tk=1024, matmul_dtype=jnp.bfloat16, exp_dtype=None):
    """Pallas implementation of Attend.forward (non-local path).

    q: [B, H, I, D], k/v: [B, H, J, D], mask: [B, J] bool or None.
    attn_bias is accepted but ignored - exactly what the PyTorch forward does
    (the tuple `can_use_flash` is always truthy, so flash_attn drops the bias).
    matmul_dtype: dtype fed to BOTH MXU matmuls (QK^T and PV); f32 accumulation
    and f32 softmax math regardless.  bf16 is MXU-native on v5e/v6e/v7x.
    exp_dtype: optional dtype for exp() of the scores; set jnp.bfloat16 on
    v6e/v7x to relieve the single EUP, leave None (f32) on v5e.
    """
    del attn_bias  # ignored by the reference forward (see docstring)
    B, H, I, D = q.shape
    J = k.shape[2]
    if scale is None:
        scale = D ** -0.5

    # Head grouping: g heads per grid step -> lane-dense (tq, g*D) acc/output.
    g = max(1, 128 // D)
    while H % g:
        g -= 1
    Hg = H // g

    # Tiling & padding (query rows to 8/128 multiples, keys to 128 multiples).
    if I >= 128:
        I_pad = _round_up(I, 128)
        tq = min(_round_up(tq, 128), I_pad)
        while I_pad % tq:
            tq -= 128
    else:
        I_pad = _round_up(I, 8)
        tq = I_pad
    J_pad = _round_up(J, 128)
    tk = min(_round_up(tk, 128), J_pad)
    while J_pad % tk:
        tk -= 128

    if I_pad != I:
        q = jnp.pad(q, ((0, 0), (0, 0), (0, I_pad - I), (0, 0)))
    if J_pad != J:
        k = jnp.pad(k, ((0, 0), (0, 0), (0, J_pad - J), (0, 0)))
        v = jnp.pad(v, ((0, 0), (0, 0), (0, J_pad - J), (0, 0)))
        if mask is None:                     # padded keys must be masked out
            mask = jnp.ones((B, J), dtype=bool)

    has_mask = mask is not None
    if has_mask:
        mask_f = jnp.pad(mask.astype(jnp.float32), ((0, 0), (0, J_pad - J)))
    else:
        mask_f = jnp.ones((B, J_pad), dtype=jnp.float32)
    # (B, 1, 1, J): head/q-tile-invariant tile, barely re-DMA'd.
    mask_f = mask_f.reshape(B, 1, 1, J_pad)

    kernel = functools.partial(
        _attend_kernel, scale=float(scale), g=g, d=D,
        matmul_dtype=matmul_dtype, exp_dtype=exp_dtype, has_mask=has_mask)

    grid = (B, Hg, I_pad // tq, J_pad // tk)
    q_sc_dtype = matmul_dtype if matmul_dtype is not None else q.dtype

    grid_spec = pltpu.PrefetchScalarGridSpec(
        num_scalar_prefetch=0,
        grid=grid,
        in_specs=[
            pl.BlockSpec((1, 1, 1, tk), lambda b, hg, qi, kv: (b, 0, 0, kv)),   # mask
            pl.BlockSpec((1, g, tq, D), lambda b, hg, qi, kv: (b, hg, qi, 0)),  # q
            pl.BlockSpec((1, g, tk, D), lambda b, hg, qi, kv: (b, hg, kv, 0)),  # k
            pl.BlockSpec((1, g, tk, D), lambda b, hg, qi, kv: (b, hg, kv, 0)),  # v
        ],
        # Output block index is invariant along the kv (reduction) axis:
        # accumulator-resident output, written only on the last kv step.
        # Lane-dense slab: last dim g*D (== 128 for AF3's D=64 / D=32 heads).
        out_specs=pl.BlockSpec((1, 1, tq, g * D),
                               lambda b, hg, qi, kv: (b, hg, qi, 0)),
        scratch_shapes=[
            pltpu.VMEM((g, tq, D), q_sc_dtype),      # scaled / cast q (hoisted)
            pltpu.VMEM((g, tq, 128), jnp.float32),   # running max m (lane-repl.)
            pltpu.VMEM((g, tq, 128), jnp.float32),   # running denom l
            pltpu.VMEM((tq, g * D), jnp.float32),    # f32 output accumulator
        ],
    )

    itemsize = jnp.dtype(q.dtype).itemsize
    cost = pl.CostEstimate(
        flops=4 * B * H * I_pad * J_pad * D,
        transcendentals=B * H * I_pad * J_pad,
        bytes_accessed=(q.size + k.size + v.size + B * H * I_pad * D) * itemsize
                       + mask_f.size * 4,
    )

    out = pl.pallas_call(
        kernel,
        out_shape=jax.ShapeDtypeStruct((B, Hg, I_pad, g * D), q.dtype),
        grid_spec=grid_spec,
        compiler_params=pltpu.CompilerParams(
            dimension_semantics=("parallel", "parallel", "parallel", "arbitrary"),
            vmem_limit_bytes=48 * 1024 * 1024),   # < v7x's 64 MiB physical VMEM
        cost_estimate=cost,
    )(mask_f, q, k, v)

    # Un-fold head groups: (B, Hg, I_pad, g*D) -> (B, H, I, D).
    if g > 1:
        out = out.reshape(B, Hg, I_pad, g, D)
        out = jnp.swapaxes(out, 2, 3).reshape(B, H, I_pad, D)
    if I_pad != I:
        out = out[:, :, :I, :]
    return out
    # TODO(synk): optionally scalar-prefetch a per-(b, kv-tile) "all valid"
    # flag to skip the mask select on fully-valid kv tiles (common for AF3
    # padding masks).


def _reference(q, k, v, mask=None, scale=None):
    D = q.shape[-1]
    if scale is None:
        scale = D ** -0.5
    s = jnp.einsum("bhid,bhjd->bhij", q, k) * scale
    if mask is not None:
        s = jnp.where(mask[:, None, None, :], s, _NEG)
    p = jax.nn.softmax(s, axis=-1)
    return jnp.einsum("bhij,bhjd->bhid", p, v)


if __name__ == "__main__":
    key = jax.random.PRNGKey(0)
    kq, kk, kv_, km = jax.random.split(key, 4)

    # Test 1: default bf16-MXU path, key mask, lane-dense head grouping (D=64).
    B, H, SEQ, D = 2, 2, 256, 64
    q = jax.random.normal(kq, (B, H, SEQ, D), dtype=jnp.float32)
    k = jax.random.normal(kk, (B, H, SEQ, D), dtype=jnp.float32)
    v = jax.random.normal(kv_, (B, H, SEQ, D), dtype=jnp.float32)
    mask = jax.random.bernoulli(km, 0.7, (B, SEQ))
    mask = mask.at[:, 0].set(True)  # avoid fully-masked rows

    out = jax.block_until_ready(attend_forward(q, k, v, mask=mask))
    ref = _reference(q, k, v, mask)
    assert out.shape == (B, H, SEQ, D)
    assert jnp.allclose(out, ref, rtol=2e-2, atol=2e-2), "bf16 path mismatch"

    # Test 2: f32 matmuls, ragged lengths (padding path), multiple kv tiles.
    I2, J2 = 200, 300
    q2 = jax.random.normal(kq, (B, H, I2, D), dtype=jnp.float32)
    k2 = jax.random.normal(kk, (B, H, J2, D), dtype=jnp.float32)
    v2 = jax.random.normal(kv_, (B, H, J2, D), dtype=jnp.float32)
    out2 = jax.block_until_ready(
        attend_forward(q2, k2, v2, tq=128, tk=128, matmul_dtype=None))
    ref2 = _reference(q2, k2, v2, None)
    assert out2.shape == (B, H, I2, D)
    assert jnp.allclose(out2, ref2, rtol=1e-3, atol=1e-3), "f32 path mismatch"

    # Test 3: no mask, no padding (mask-free fast path), bf16 default.
    q3, k3, v3 = q[:, :, :128], k[:, :, :128], v[:, :, :128]
    out3 = jax.block_until_ready(attend_forward(q3, k3, v3))
    ref3 = _reference(q3, k3, v3, None)
    assert jnp.allclose(out3, ref3, rtol=2e-2, atol=2e-2), "no-mask path mismatch"

    print("KERNEL_OK")
</pallas_src>

<mosaic_0001>
module attributes {stable_mosaic.version = 11 : i64} {
  func.func @_attend_kernel(%arg0: i32, %arg1: i32, %arg2: i32, %arg3: i32, %arg4: memref<1x1x1x256xf32, #tpu.memory_space<vmem>>, %arg5: memref<1x2x256x64xf32, #tpu.memory_space<vmem>>, %arg6: memref<1x2x256x64xf32, #tpu.memory_space<vmem>>, %arg7: memref<1x2x256x64xf32, #tpu.memory_space<vmem>>, %arg8: memref<1x1x256x128xf32, #tpu.memory_space<vmem>>, %arg9: memref<2x256x64xbf16, #tpu.memory_space<vmem>>, %arg10: memref<2x256x128xf32, #tpu.memory_space<vmem>>, %arg11: memref<2x256x128xf32, #tpu.memory_space<vmem>>, %arg12: memref<256x128xf32, #tpu.memory_space<vmem>>) attributes {dimension_semantics = [#tpu.dimension_semantics<parallel>, #tpu.dimension_semantics<parallel>, #tpu.dimension_semantics<parallel>, #tpu.dimension_semantics<arbitrary>], iteration_bounds = array<i64: 2, 1, 1, 1>, scalar_prefetch = 0 : i64, scratch_operands = 4 : i64, tpu.core_type = #tpu.core_type<tc>, window_params = [{transform_indices = @transform_0, window_bounds = array<i64: 1, 1, 1, 256>}, {transform_indices = @transform_1, window_bounds = array<i64: 1, 2, 256, 64>}, {transform_indices = @transform_2, window_bounds = array<i64: 1, 2, 256, 64>}, {transform_indices = @transform_3, window_bounds = array<i64: 1, 2, 256, 64>}, {transform_indices = @transform_4, window_bounds = array<i64: 1, 1, 256, 128>}]} {
    %c0_i32 = arith.constant 0 : i32
    %0 = arith.cmpi eq, %arg3, %c0_i32 : i32
    %1 = arith.extui %0 : i1 to i32
    %c0_i32_0 = arith.constant 0 : i32
    %2 = arith.cmpi ne, %1, %c0_i32_0 : i32
    scf.if %2 {
      %cst_65 = arith.constant 0xFF800000 : f32
      %96 = vector.broadcast %cst_65 : f32 to vector<2x256x128xf32>
      %c0_66 = arith.constant 0 : index
      %c0_67 = arith.constant 0 : index
      %c0_68 = arith.constant 0 : index
      %97 = vector.load %arg10[%c0_66, %c0_67, %c0_68] : memref<2x256x128xf32, #tpu.memory_space<vmem>>, vector<2x256x128xf32>
      tpu.vector_store %arg10[%c0_66, %c0_67, %c0_68], %96 {strides = array<i32>} : memref<2x256x128xf32, #tpu.memory_space<vmem>>, vector<2x256x128xf32>,
      %cst_69 = arith.constant 0.000000e+00 : f32
      %98 = vector.broadcast %cst_69 : f32 to vector<2x256x128xf32>
      %c0_70 = arith.constant 0 : index
      %c0_71 = arith.constant 0 : index
      %c0_72 = arith.constant 0 : index
      %99 = vector.load %arg11[%c0_70, %c0_71, %c0_72] : memref<2x256x128xf32, #tpu.memory_space<vmem>>, vector<2x256x128xf32>
      tpu.vector_store %arg11[%c0_70, %c0_71, %c0_72], %98 {strides = array<i32>} : memref<2x256x128xf32, #tpu.memory_space<vmem>>, vector<2x256x128xf32>,
      %cst_73 = arith.constant 0.000000e+00 : f32
      %100 = vector.broadcast %cst_73 : f32 to vector<256x128xf32>
      %c0_74 = arith.constant 0 : index
      %c0_75 = arith.constant 0 : index
      %101 = vector.load %arg12[%c0_74, %c0_75] : memref<256x128xf32, #tpu.memory_space<vmem>>, vector<256x128xf32>
      tpu.vector_store %arg12[%c0_74, %c0_75], %100 {strides = array<i32>} : memref<256x128xf32, #tpu.memory_space<vmem>>, vector<256x128xf32>,
      %c0_76 = arith.constant 0 : index
      %c0_77 = arith.constant 0 : index
      %c0_78 = arith.constant 0 : index
      %c0_79 = arith.constant 0 : index
      %102 = vector.load %arg5[%c0_76, %c0_77, %c0_78, %c0_79] : memref<1x2x256x64xf32, #tpu.memory_space<vmem>>, vector<1x2x256x64xf32>
      %103 = vector.shape_cast %102 : vector<1x2x256x64xf32> to vector<2x256x64xf32>
      %cst_80 = arith.constant 1.250000e-01 : f32
      %104 = vector.broadcast %cst_80 : f32 to vector<2x256x64xf32>
      %105 = arith.mulf %103, %104 : vector<2x256x64xf32>
      %106 = arith.truncf %105 : vector<2x256x64xf32> to vector<2x256x64xbf16>
      %c0_81 = arith.constant 0 : index
      %c0_82 = arith.constant 0 : index
      %c0_83 = arith.constant 0 : index
      %107 = vector.load %arg9[%c0_81, %c0_82, %c0_83] : memref<2x256x64xbf16, #tpu.memory_space<vmem>>, vector<2x256x64xbf16>
      tpu.vector_store %arg9[%c0_81, %c0_82, %c0_83], %106 {strides = array<i32>} : memref<2x256x64xbf16, #tpu.memory_space<vmem>>, vector<2x256x64xbf16>,
    } else {
    }
    %c0 = arith.constant 0 : index
    %c0_1 = arith.constant 0 : index
    %c0_2 = arith.constant 0 : index
    %c0_3 = arith.constant 0 : index
    %3 = vector.load %arg4[%c0, %c0_1, %c0_2, %c0_3] : memref<1x1x1x256xf32, #tpu.memory_space<vmem>>, vector<1x1x1x256xf32>
    %4 = vector.shape_cast %3 : vector<1x1x1x256xf32> to vector<1x256xf32>
    %cst = arith.constant 0.000000e+00 : f32
    %5 = vector.broadcast %cst : f32 to vector<1x256xf32>
    %6 = arith.cmpf one, %4, %5 : vector<1x256xf32>
    %c0_4 = arith.constant 0 : index
    %c0_5 = arith.constant 0 : index
    %c0_6 = arith.constant 0 : index
    %c0_7 = arith.constant 0 : index
    %7 = vector.load %arg6[%c0_4, %c0_5, %c0_6, %c0_7] : memref<1x2x256x64xf32, #tpu.memory_space<vmem>>, vector<1x1x256x64xf32>
    %8 = vector.shape_cast %7 : vector<1x1x256x64xf32> to vector<256x64xf32>
    %c0_8 = arith.constant 0 : index
    %c0_9 = arith.constant 0 : index
    %c0_10 = arith.constant 0 : index
    %c0_11 = arith.constant 0 : index
    %9 = vector.load %arg7[%c0_8, %c0_9, %c0_10, %c0_11] : memref<1x2x256x64xf32, #tpu.memory_space<vmem>>, vector<1x1x256x64xf32>
    %10 = vector.shape_cast %9 : vector<1x1x256x64xf32> to vector<256x64xf32>
    %11 = arith.truncf %8 : vector<256x64xf32> to vector<256x64xbf16>
    %12 = arith.truncf %10 : vector<256x64xf32> to vector<256x64xbf16>
    %c0_12 = arith.constant 0 : index
    %c0_13 = arith.constant 0 : index
    %c0_14 = arith.constant 0 : index
    %13 = vector.load %arg9[%c0_12, %c0_13, %c0_14] : memref<2x256x64xbf16, #tpu.memory_space<vmem>>, vector<1x256x64xbf16>
    %14 = vector.shape_cast %13 : vector<1x256x64xbf16> to vector<256x64xbf16>
    %cst_15 = arith.constant dense<0.000000e+00> : vector<256x256xf32>
    %15 = tpu.matmul %14, %11, %cst_15 {dimension_numbers = #tpu.dot_dimension_numbers<[1], [1], [0], [0], [0, 0, 1, 0], [], []>} : vector<256x64xbf16>, vector<256x64xbf16>, vector<256x256xf32> -> vector<256x256xf32>
    %cst_16 = arith.constant -3.40282347E+38 : f32
    %16 = vector.shape_cast %6 : vector<1x256xi1> to vector<1x256xi1>
    %17 = vector.broadcast %16 : vector<1x256xi1> to vector<256x256xi1>
    %18 = vector.broadcast %cst_16 : f32 to vector<256x256xf32>
    %19 = arith.select %17, %15, %18 : vector<256x256xi1>, vector<256x256xf32>
    %c0_17 = arith.constant 0 : index
    %c0_18 = arith.constant 0 : index
    %c0_19 = arith.constant 0 : index
    %20 = vector.load %arg10[%c0_17, %c0_18, %c0_19] : memref<2x256x128xf32, #tpu.memory_space<vmem>>, vector<1x256x128xf32>
    %21 = vector.shape_cast %20 : vector<1x256x128xf32> to vector<256x128xf32>
    %c0_20 = arith.constant 0 : index
    %c0_21 = arith.constant 0 : index
    %c0_22 = arith.constant 0 : index
    %22 = vector.load %arg11[%c0_20, %c0_21, %c0_22] : memref<2x256x128xf32, #tpu.memory_space<vmem>>, vector<1x256x128xf32>
    %23 = vector.shape_cast %22 : vector<1x256x128xf32> to vector<256x128xf32>
    %cst_23 = arith.constant dense<0xFF800000> : vector<256xf32>
    %24 = vector.multi_reduction <maximumf>, %19, %cst_23 [1] : vector<256x256xf32> to vector<256xf32>
    %25 = vector.shape_cast %24 : vector<256xf32> to vector<256x1xf32>
    %26 = vector.broadcast %25 : vector<256x1xf32> to vector<256x128xf32>
    %27 = arith.maximumf %21, %26 : vector<256x128xf32>
    %28 = arith.subf %21, %27 : vector<256x128xf32>
    %29 = math.exp %28 : vector<256x128xf32>
    %30 = tpu.concatenate %27, %27 in 1 : vector<256x128xf32>, vector<256x128xf32> -> vector<256x256xf32>
    %31 = arith.subf %19, %30 : vector<256x256xf32>
    %32 = math.exp %31 : vector<256x256xf32>
    %33 = arith.mulf %29, %23 : vector<256x128xf32>
    %cst_24 = arith.constant dense<0.000000e+00> : vector<256xf32>
    %34 = vector.multi_reduction <add>, %32, %cst_24 [1] : vector<256x256xf32> to vector<256xf32>
    %35 = vector.shape_cast %34 : vector<256xf32> to vector<256x1xf32>
    %36 = vector.broadcast %35 : vector<256x1xf32> to vector<256x128xf32>
    %37 = arith.addf %33, %36 : vector<256x128xf32>
    %c0_25 = arith.constant 0 : index
    %c0_26 = arith.constant 0 : index
    %c0_27 = arith.constant 0 : index
    %38 = vector.load %arg11[%c0_25, %c0_26, %c0_27] : memref<2x256x128xf32, #tpu.memory_space<vmem>>, vector<1x256x128xf32>
    %39 = vector.shape_cast %38 : vector<1x256x128xf32> to vector<256x128xf32>
    %40 = vector.shape_cast %37 : vector<256x128xf32> to vector<1x256x128xf32>
    tpu.vector_store %arg11[%c0_25, %c0_26, %c0_27], %40 {strides = array<i32>} : memref<2x256x128xf32, #tpu.memory_space<vmem>>, vector<1x256x128xf32>,
    %c0_28 = arith.constant 0 : index
    %c0_29 = arith.constant 0 : index
    %c0_30 = arith.constant 0 : index
    %41 = vector.load %arg10[%c0_28, %c0_29, %c0_30] : memref<2x256x128xf32, #tpu.memory_space<vmem>>, vector<1x256x128xf32>
    %42 = vector.shape_cast %41 : vector<1x256x128xf32> to vector<256x128xf32>
    %43 = vector.shape_cast %27 : vector<256x128xf32> to vector<1x256x128xf32>
    tpu.vector_store %arg10[%c0_28, %c0_29, %c0_30], %43 {strides = array<i32>} : memref<2x256x128xf32, #tpu.memory_space<vmem>>, vector<1x256x128xf32>,
    %44 = arith.truncf %32 : vector<256x256xf32> to vector<256x256xbf16>
    %cst_31 = arith.constant dense<0.000000e+00> : vector<256x64xf32>
    %45 = tpu.matmul %44, %12, %cst_31 {dimension_numbers = #tpu.dot_dimension_numbers<[1], [0], [0], [1], [0, 0, 1, 1], [], []>} : vector<256x256xbf16>, vector<256x64xbf16>, vector<256x64xf32> -> vector<256x64xf32>
    %46 = vector.extract_strided_slice %29 {offsets = [0, 0], sizes = [256, 64], strides = [1, 1]} : vector<256x128xf32> to vector<256x64xf32>
    %c0_32 = arith.constant 0 : index
    %c1 = arith.constant 1 : index
    %c0_33 = arith.constant 0 : index
    %c0_34 = arith.constant 0 : index
    %47 = vector.load %arg6[%c0_32, %c1, %c0_33, %c0_34] : memref<1x2x256x64xf32, #tpu.memory_space<vmem>>, vector<1x1x256x64xf32>
    %48 = vector.shape_cast %47 : vector<1x1x256x64xf32> to vector<256x64xf32>
    %c0_35 = arith.constant 0 : index
    %c1_36 = arith.constant 1 : index
    %c0_37 = arith.constant 0 : index
    %c0_38 = arith.constant 0 : index
    %49 = vector.load %arg7[%c0_35, %c1_36, %c0_37, %c0_38] : memref<1x2x256x64xf32, #tpu.memory_space<vmem>>, vector<1x1x256x64xf32>
    %50 = vector.shape_cast %49 : vector<1x1x256x64xf32> to vector<256x64xf32>
    %51 = arith.truncf %48 : vector<256x64xf32> to vector<256x64xbf16>
    %52 = arith.truncf %50 : vector<256x64xf32> to vector<256x64xbf16>
    %c1_39 = arith.constant 1 : index
    %c0_40 = arith.constant 0 : index
    %c0_41 = arith.constant 0 : index
    %53 = vector.load %arg9[%c1_39, %c0_40, %c0_41] : memref<2x256x64xbf16, #tpu.memory_space<vmem>>, vector<1x256x64xbf16>
    %54 = vector.shape_cast %53 : vector<1x256x64xbf16> to vector<256x64xbf16>
    %cst_42 = arith.constant dense<0.000000e+00> : vector<256x256xf32>
    %55 = tpu.matmul %54, %51, %cst_42 {dimension_numbers = #tpu.dot_dimension_numbers<[1], [1], [0], [0], [0, 0, 1, 0], [], []>} : vector<256x64xbf16>, vector<256x64xbf16>, vector<256x256xf32> -> vector<256x256xf32>
    %cst_43 = arith.constant -3.40282347E+38 : f32
    %56 = vector.shape_cast %6 : vector<1x256xi1> to vector<1x256xi1>
    %57 = vector.broadcast %56 : vector<1x256xi1> to vector<256x256xi1>
    %58 = vector.broadcast %cst_43 : f32 to vector<256x256xf32>
    %59 = arith.select %57, %55, %58 : vector<256x256xi1>, vector<256x256xf32>
    %c1_44 = arith.constant 1 : index
    %c0_45 = arith.constant 0 : index
    %c0_46 = arith.constant 0 : index
    %60 = vector.load %arg10[%c1_44, %c0_45, %c0_46] : memref<2x256x128xf32, #tpu.memory_space<vmem>>, vector<1x256x128xf32>
    %61 = vector.shape_cast %60 : vector<1x256x128xf32> to vector<256x128xf32>
    %c1_47 = arith.constant 1 : index
    %c0_48 = arith.constant 0 : index
    %c0_49 = arith.constant 0 : index
    %62 = vector.load %arg11[%c1_47, %c0_48, %c0_49] : memref<2x256x128xf32, #tpu.memory_space<vmem>>, vector<1x256x128xf32>
    %63 = vector.shape_cast %62 : vector<1x256x128xf32> to vector<256x128xf32>
    %cst_50 = arith.constant dense<0xFF800000> : vector<256xf32>
    %64 = vector.multi_reduction <maximumf>, %59, %cst_50 [1] : vector<256x256xf32> to vector<256xf32>
    %65 = vector.shape_cast %64 : vector<256xf32> to vector<256x1xf32>
    %66 = vector.broadcast %65 : vector<256x1xf32> to vector<256x128xf32>
    %67 = arith.maximumf %61, %66 : vector<256x128xf32>
    %68 = arith.subf %61, %67 : vector<256x128xf32>
    %69 = math.exp %68 : vector<256x128xf32>
    %70 = tpu.concatenate %67, %67 in 1 : vector<256x128xf32>, vector<256x128xf32> -> vector<256x256xf32>
    %71 = arith.subf %59, %70 : vector<256x256xf32>
    %72 = math.exp %71 : vector<256x256xf32>
    %73 = arith.mulf %69, %63 : vector<256x128xf32>
    %cst_51 = arith.constant dense<0.000000e+00> : vector<256xf32>
    %74 = vector.multi_reduction <add>, %72, %cst_51 [1] : vector<256x256xf32> to vector<256xf32>
    %75 = vector.shape_cast %74 : vector<256xf32> to vector<256x1xf32>
    %76 = vector.broadcast %75 : vector<256x1xf32> to vector<256x128xf32>
    %77 = arith.addf %73, %76 : vector<256x128xf32>
    %c1_52 = arith.constant 1 : index
    %c0_53 = arith.constant 0 : index
    %c0_54 = arith.constant 0 : index
    %78 = vector.load %arg11[%c1_52, %c0_53, %c0_54] : memref<2x256x128xf32, #tpu.memory_space<vmem>>, vector<1x256x128xf32>
    %79 = vector.shape_cast %78 : vector<1x256x128xf32> to vector<256x128xf32>
    %80 = vector.shape_cast %77 : vector<256x128xf32> to vector<1x256x128xf32>
    tpu.vector_store %arg11[%c1_52, %c0_53, %c0_54], %80 {strides = array<i32>} : memref<2x256x128xf32, #tpu.memory_space<vmem>>, vector<1x256x128xf32>,
    %c1_55 = arith.constant 1 : index
    %c0_56 = arith.constant 0 : index
    %c0_57 = arith.constant 0 : index
    %81 = vector.load %arg10[%c1_55, %c0_56, %c0_57] : memref<2x256x128xf32, #tpu.memory_space<vmem>>, vector<1x256x128xf32>
    %82 = vector.shape_cast %81 : vector<1x256x128xf32> to vector<256x128xf32>
    %83 = vector.shape_cast %67 : vector<256x128xf32> to vector<1x256x128xf32>
    tpu.vector_store %arg10[%c1_55, %c0_56, %c0_57], %83 {strides = array<i32>} : memref<2x256x128xf32, #tpu.memory_space<vmem>>, vector<1x256x128xf32>,
    %84 = arith.truncf %72 : vector<256x256xf32> to vector<256x256xbf16>
    %cst_58 = arith.constant dense<0.000000e+00> : vector<256x64xf32>
    %85 = tpu.matmul %84, %52, %cst_58 {dimension_numbers = #tpu.dot_dimension_numbers<[1], [0], [0], [1], [0, 0, 1, 1], [], []>} : vector<256x256xbf16>, vector<256x64xbf16>, vector<256x64xf32> -> vector<256x64xf32>
    %86 = vector.extract_strided_slice %69 {offsets = [0, 0], sizes = [256, 64], strides = [1, 1]} : vector<256x128xf32> to vector<256x64xf32>
    %87 = tpu.concatenate %45, %85 in 1 : vector<256x64xf32>, vector<256x64xf32> -> vector<256x128xf32>
    %88 = tpu.concatenate %46, %86 in 1 : vector<256x64xf32>, vector<256x64xf32> -> vector<256x128xf32>
    %c0_59 = arith.constant 0 : index
    %c0_60 = arith.constant 0 : index
    %89 = vector.load %arg12[%c0_59, %c0_60] : memref<256x128xf32, #tpu.memory_space<vmem>>, vector<256x128xf32>
    %90 = arith.mulf %88, %89 : vector<256x128xf32>
    %91 = arith.addf %90, %87 : vector<256x128xf32>
    %c0_61 = arith.constant 0 : index
    %c0_62 = arith.constant 0 : index
    %92 = vector.load %arg12[%c0_61, %c0_62] : memref<256x128xf32, #tpu.memory_space<vmem>>, vector<256x128xf32>
    tpu.vector_store %arg12[%c0_61, %c0_62], %91 {strides = array<i32>} : memref<256x128xf32, #tpu.memory_space<vmem>>, vector<256x128xf32>,
    %c0_i32_63 = arith.constant 0 : i32
    %93 = arith.cmpi eq, %arg3, %c0_i32_63 : i32
    %94 = arith.extui %93 : i1 to i32
    %c0_i32_64 = arith.constant 0 : i32
    %95 = arith.cmpi ne, %94, %c0_i32_64 : i32
    scf.if %95 {
      %c0_65 = arith.constant 0 : index
      %c0_66 = arith.constant 0 : index
      %c0_67 = arith.constant 0 : index
      %96 = vector.load %arg11[%c0_65, %c0_66, %c0_67] : memref<2x256x128xf32, #tpu.memory_space<vmem>>, vector<1x256x128xf32>
      %97 = vector.shape_cast %96 : vector<1x256x128xf32> to vector<256x128xf32>
      %98 = tpu.reciprocal %97 {approx = true} : vector<256x128xf32> -> vector<256x128xf32>
      %99 = arith.mulf %97, %98 : vector<256x128xf32>
      %cst_68 = arith.constant 2.000000e+00 : f32
      %100 = vector.broadcast %cst_68 : f32 to vector<256x128xf32>
      %101 = arith.subf %100, %99 : vector<256x128xf32>
      %102 = arith.mulf %98, %101 : vector<256x128xf32>
      %103 = vector.extract_strided_slice %102 {offsets = [0, 0], sizes = [256, 64], strides = [1, 1]} : vector<256x128xf32> to vector<256x64xf32>
      %c1_69 = arith.constant 1 : index
      %c0_70 = arith.constant 0 : index
      %c0_71 = arith.constant 0 : index
      %104 = vector.load %arg11[%c1_69, %c0_70, %c0_71] : memref<2x256x128xf32, #tpu.memory_space<vmem>>, vector<1x256x128xf32>
      %105 = vector.shape_cast %104 : vector<1x256x128xf32> to vector<256x128xf32>
      %106 = tpu.reciprocal %105 {approx = true} : vector<256x128xf32> -> vector<256x128xf32>
      %107 = arith.mulf %105, %106 : vector<256x128xf32>
      %cst_72 = arith.constant 2.000000e+00 : f32
      %108 = vector.broadcast %cst_72 : f32 to vector<256x128xf32>
      %109 = arith.subf %108, %107 : vector<256x128xf32>
      %110 = arith.mulf %106, %109 : vector<256x128xf32>
      %111 = vector.extract_strided_slice %110 {offsets = [0, 0], sizes = [256, 64], strides = [1, 1]} : vector<256x128xf32> to vector<256x64xf32>
      %112 = tpu.concatenate %103, %111 in 1 : vector<256x64xf32>, vector<256x64xf32> -> vector<256x128xf32>
      %c0_73 = arith.constant 0 : index
      %c0_74 = arith.constant 0 : index
      %113 = vector.load %arg12[%c0_73, %c0_74] : memref<256x128xf32, #tpu.memory_space<vmem>>, vector<256x128xf32>
      %114 = arith.mulf %113, %112 : vector<256x128xf32>
      %c0_75 = arith.constant 0 : index
      %c0_76 = arith.constant 0 : index
      %c0_77 = arith.constant 0 : index
      %c0_78 = arith.constant 0 : index
      %115 = vector.load %arg8[%c0_75, %c0_76, %c0_77, %c0_78] : memref<1x1x256x128xf32, #tpu.memory_space<vmem>>, vector<1x1x256x128xf32>
      %116 = vector.shape_cast %115 : vector<1x1x256x128xf32> to vector<256x128xf32>
      %117 = vector.shape_cast %114 : vector<256x128xf32> to vector<1x1x256x128xf32>
      tpu.vector_store %arg8[%c0_75, %c0_76, %c0_77, %c0_78], %117 {strides = array<i32>} : memref<1x1x256x128xf32, #tpu.memory_space<vmem>>, vector<1x1x256x128xf32>,
    } else {
    }
    return
  }
  func.func @transform_0(%arg0: i32, %arg1: i32, %arg2: i32, %arg3: i32) -> (i32, i32, i32, i32) {
    %c0_i32 = arith.constant 0 : i32
    %c0_i32_0 = arith.constant 0 : i32
    %c0_i32_1 = arith.constant 0 : i32
    return %arg0, %c0_i32, %c0_i32_0, %arg3 : i32, i32, i32, i32
  }
  func.func @transform_1(%arg0: i32, %arg1: i32, %arg2: i32, %arg3: i32) -> (i32, i32, i32, i32) {
    %c0_i32 = arith.constant 0 : i32
    %c0_i32_0 = arith.constant 0 : i32
    return %arg0, %arg1, %arg2, %c0_i32 : i32, i32, i32, i32
  }
  func.func @transform_2(%arg0: i32, %arg1: i32, %arg2: i32, %arg3: i32) -> (i32, i32, i32, i32) {
    %c0_i32 = arith.constant 0 : i32
    %c0_i32_0 = arith.constant 0 : i32
    return %arg0, %arg1, %arg3, %c0_i32 : i32, i32, i32, i32
  }
  func.func @transform_3(%arg0: i32, %arg1: i32, %arg2: i32, %arg3: i32) -> (i32, i32, i32, i32) {
    %c0_i32 = arith.constant 0 : i32
    %c0_i32_0 = arith.constant 0 : i32
    return %arg0, %arg1, %arg3, %c0_i32 : i32, i32, i32, i32
  }
  func.func @transform_4(%arg0: i32, %arg1: i32, %arg2: i32, %arg3: i32) -> (i32, i32, i32, i32) {
    %c0_i32 = arith.constant 0 : i32
    %c0_i32_0 = arith.constant 0 : i32
    return %arg0, %arg1, %arg2, %c0_i32 : i32, i32, i32, i32
  }
}

</mosaic_0001>

<bundles_post_ra>
// kernel: tpu_custom_call.1
= control target key start
LH: loop header
LB: loop body
LE: loop exit
PB: predicated region body
PF: predicated region fallthrough
CT: control target
= control target key end

     0   :  { %9 = vsyncpa [#allocation7], 0  ;;  %s8646_s0 = inlined_call_operand.vmem [shape: f32[2,1,1,256], index: 0, kind: input, shape index: {}]   ;;  %s8647_s1 = inlined_call_operand.vmem [shape: f32[2,2,256,64], index: 1, kind: input, shape index: {}]   ;;  %s8648_s2 = inlined_call_operand.vmem [shape: f32[2,2,256,64], index: 2, kind: input, shape index: {}]   ;;  %s8649_s3 = inlined_call_operand.vmem [shape: f32[2,2,256,64], index: 3, kind: input, shape index: {}]   ;;  %s8650_s4 = inlined_call_operand.hbm [shape: f32[2,1,256,128], index: 4, kind: output, shape index: {}]  }
   0x1   :  { %11 = vsyncpa [#allocation7 + $0x1], 0  ;;  %s5968_s15 = smov 0   ;;  %s5970_s16 = smov 0  }
   0x2   :  { %s5972_s17 = smov 0   ;;  %s5974_s18 = smov 0  }
   0x3   :  { %s5976_s19 = smov 0   ;;  %s5978_s20 = smov 0  }
   0x4 LB: > { %s4962_s21 = sadd.s32 4294967295, %s5937_s20   ;;  %s4963_s22 = sadd.s32 4294967294, %s5937_s20   ;;  %s5937_s20 = sphi %s5978_s20, %s17_s20   ;;  %s5933_s19 = sphi %s5976_s19, %s9044_s19   ;;  %s5929_s18 = sphi %s5974_s18, %s9043_s18   ;;  %s5925_s17 = sphi %s5972_s17, %s9042_s17   ;;  %s5921_s16 = sphi %s5970_s16, %s9041_s16   ;;  %s5917_s15 = sphi %s5968_s15, %s9040_s15  }
   0x5   : > { %s43_s23 = sadd.s32 1, %s5933_s19  ;;  %s172_s24 = sadd.s32 1, %s5925_s17 }
   0x6   : > { %p45_p0 = scmp.ge.s32.totalorder %s43_s23, 2  ;;  %p182_p1 = scmp.ne.s32.totalorder %s5925_s17, %s5921_s16 }
   0x7   : > { %p183_p2 = scmp.eq.s32.totalorder %s4962_s21, 1  ;;  %p188_p3 = scmp.ne.s32.totalorder %s5921_s16, %s5917_s15 }
   0x8   : > { %s9046_s23 = smov (%p45_p0, %s43_s23), 0  ;;  %p189_p5 = scmp.eq.s32.totalorder %s4963_s22, 1 }
   0x9   : > { %p6008_p4 = por %p183_p2, %p182_p1  ;;  %s165_s26 = ssub.s32 %s5933_s19, %s9046_s23 }
   0xa   : > { %p4966_p6 = scmp.ge.s32.totalorder %s5937_s20, 1  ;;  %p170_p7 = scmp.eq.s32.totalorder %s165_s26, 0 }
   0xb   : > { %p6015_p8 = por %p189_p5, %p188_p3  ;;  %p276_p9 = scmp.lt.s32.totalorder %s5937_s20, 3 }
   0xc   : > { %s6021_s28 = scalar_select %p170_p7, %s5925_s17, %s172_s24  }
   0xd   : > { %p277_p10 = pnand %p4966_p6, %p276_p9 }
   0xf   : > { %280 = sbr.rel (%p277_p10) target bundleno = 1952 (0x7a0), region = 36 }
  0x14   : > { %p348_p11 = scmp.lt.s32.totalorder %s5929_s18, 1  ;;  %vm1036_vm0 = vcmask 523264   ;;  %vm761_vm1 = vcmask 519168   ;;  %s5940_s26 = smov 64  }
  0x15   : > { %s5271_s6 = sshll.u32 %s5929_s18, 8  ;;  %s5879_s22 = scalar_lea.hbm %s8650_s4, 512 }
  0x16   : > { %s6025_s29 = scalar_select %p348_p11, %s5929_s18, 1 }
  0x17   : > { %s4802_s8 = scalar_lea.hbm %s8650_s4, %s5271_s6 }
  0x18   : > { %s6028_s30 = sshll.u32 %s6025_s29, 9  ;;  %s4968_s11 = sshll.u32 %s6025_s29, 1 }
  0x19   : > { %s6034_s7 = scalar_lea.vmem %s8648_s2, %s6028_s30  ;;  %s6060_s10 = scalar_lea.vmem %s8647_s1, %s6028_s30 }
  0x1a   : > { %v842_v0 = vld [vmem:[%s6034_s7 + $0x70] sm:$0xff]  ;;  %v843_v1 = vld [vmem:[%s6034_s7 + $0x78] sm:$0xff]  ;;  %v840_v6 = vld [vmem:[%s6034_s7 + $0x60] sm:$0xff]  ;;  %s354_s14 = scalar_lea.vmem %s8646_s0, %s4968_s11  ;;  %s6288_s24 = scalar_lea.vmem %s8649_s3, %s6028_s30 }
  0x1b   : > { %v858_v2 = vld [vmem:[%s6034_s7 + $0xf0] sm:$0xff]  ;;  %v899_v3 = vpack.c.bf16 %v843_v1, %v842_v0  ;;  %v859_v4 = vld [vmem:[%s6034_s7 + $0xf8] sm:$0xff]  ;;  %v841_v7 = vld [vmem:[%s6034_s7 + $0x68] sm:$0xff]  ;;  %s344_s29 = sand.u32 1, %s5921_s16  }
  0x1c   : > { %v907_v5 = vpack.c.bf16 %v859_v4, %v858_v2  ;;  %v856_v9 = vld [vmem:[%s6034_s7 + $0xe0] sm:$0xff]  ;;  %v857_v10 = vld [vmem:[%s6034_s7 + $0xe8] sm:$0xff]  ;;  %v898_v12 = vpack.c.bf16 %v841_v7, %v840_v6  ;;  %v838_v16 = vld [vmem:[%s6034_s7 + $0x50] sm:$0xff]  ;;  %s4967_s30 = sshll.u32 %s344_s29, 8  ;;  %s4787_s11 = scalar_lea.sflag [#allocation7], %s344_s29 }
  0x1d   : > { %v1107_v8 = vsel %vm1036_vm0, %v899_v3, 0  ;;  %v906_v13 = vpack.c.bf16 %v857_v10, %v856_v9  ;;  %v839_v17 = vld [vmem:[%s6034_s7 + $0x58] sm:$0xff]  ;;  %v854_v18 = vld [vmem:[%s6034_s7 + $0xd0] sm:$0xff]  ;;  %v836_v24 = vld [vmem:[%s6034_s7 + $0x40] sm:$0xff]  ;;  %s8036_s5 = scalar_lea.vmem [#allocation6], %s4967_s30 }
  0x1e   : > { %1133 = vmatpush.bf16.xpose.msra.mxu0 %v1107_v8  ;;  %v1131_v11 = vsel %vm1036_vm0, %v907_v5, 0  ;;  %v1104_v14 = vsel %vm1036_vm0, %v898_v12, 0  ;;  %v855_v19 = vld [vmem:[%s6034_s7 + $0xd8] sm:$0xff]  ;;  %v897_v20 = vpack.c.bf16 %v839_v17, %v838_v16  ;;  %v837_v25 = vld [vmem:[%s6034_s7 + $0x48] sm:$0xff]  ;;  %v852_v26 = vld [vmem:[%s6034_s7 + $0xc0] sm:$0xff]  ;;  %s4803_s9 = sshll.u32 %s8036_s5, 4  ;;  %s4804_s9 = int_to_ptr.vmem [resolvable:$true] %s4803_s9 }
  0x1f   : > { %1222 = vmatpush.bf16.xpose.msra.mxu1 %v1131_v11  ;;  %v1128_v15 = vsel %vm1036_vm0, %v906_v13, 0  ;;  %v905_v21 = vpack.c.bf16 %v855_v19, %v854_v18  ;;  %v853_v27 = vld [vmem:[%s6034_s7 + $0xc8] sm:$0xff]  ;;  %v896_v28 = vpack.c.bf16 %v837_v25, %v836_v24  ;;  %v569_v30 = vld [vmem:[%s6060_s10] sm:$0xff]  ;;  %v834_v38 = vld [vmem:[%s6034_s7 + $0x30] sm:$0xff] }
  0x20   : > { %v1101_v22 = vsel %vm1036_vm0, %v897_v20, 0  ;;  %v904_v29 = vpack.c.bf16 %v853_v27, %v852_v26  ;;  %v570_v31 = vld [vmem:[%s6060_s10 + $0x8] sm:$0xff]  ;;  %v633_v32 = vmul.f32 0.125, %v569_v30  ;;  %v835_v39 = vld [vmem:[%s6034_s7 + $0x38] sm:$0xff]  ;;  %v850_v40 = vld [vmem:[%s6034_s7 + $0xb0] sm:$0xff] }
  0x21   : > { %v1125_v23 = vsel %vm1036_vm0, %v905_v21, 0  ;;  %v634_v33 = vmul.f32 0.125, %v570_v31  ;;  %v1098_v34 = vsel %vm1036_vm0, %v896_v28, 0  ;;  %v851_v41 = vld [vmem:[%s6034_s7 + $0xb8] sm:$0xff]  ;;  %v895_v42 = vpack.c.bf16 %v835_v39, %v834_v38  ;;  %v832_v46 = vld [vmem:[%s6034_s7 + $0x20] sm:$0xff]  ;;  %v833_v47 = vld [vmem:[%s6034_s7 + $0x28] sm:$0xff] }
  0x22   : > { %v697_v35 = vpack.c.bf16 %v633_v32, %v633_v32  ;;  %v1122_v37 = vsel %vm1036_vm0, %v904_v29, 0  ;;  %v903_v43 = vpack.c.bf16 %v851_v41, %v850_v40  ;;  %v848_v48 = vld [vmem:[%s6034_s7 + $0xa0] sm:$0xff]  ;;  %v849_v49 = vld [vmem:[%s6034_s7 + $0xa8] sm:$0xff]  ;;  %v571_v50 = vld [vmem:[%s6060_s10 + $0x10] sm:$0xff]  ;;  %v894_v52 = vpack.c.bf16 %v833_v47, %v832_v46 }
  0x23   : > { %v698_v36 = vpack.c.bf16 %v634_v33, %v634_v33  ;;  %v1095_v44 = vsel %vm1036_vm0, %v895_v42, 0  ;;  %v572_v51 = vld [vmem:[%s6060_s10 + $0x18] sm:$0xff]  ;;  %v635_v53 = vmul.f32 0.125, %v571_v50  ;;  %v902_v55 = vpack.c.bf16 %v849_v49, %v848_v48  ;;  %v830_v60 = vld [vmem:[%s6034_s7 + $0x10] sm:$0xff]  ;;  %v828_v4 = vld [vmem:[%s6034_s7] sm:$0xff] }
  0x24   : > { %762 = vst.msk [vmem:[#allocation2] sm:$0xf] %vm761_vm1, %v697_v35  ;;  %v1119_v45 = vsel %vm1036_vm0, %v903_v43, 0  ;;  %v636_v54 = vmul.f32 0.125, %v572_v51  ;;  %v1092_v58 = vsel %vm1036_vm0, %v894_v52, 0  ;;  %v831_v61 = vld [vmem:[%s6034_s7 + $0x18] sm:$0xff] }
  0x25   : > { %763 = vst.msk [vmem:[#allocation2 + $0x4] sm:$0xf] %vm761_vm1, %v698_v36  ;;  %v699_v56 = vpack.c.bf16 %v635_v53, %v635_v53  ;;  %v1116_v59 = vsel %vm1036_vm0, %v902_v55, 0  ;;  %v846_v62 = vld [vmem:[%s6034_s7 + $0x90] sm:$0xff]  ;;  %v847_v63 = vld [vmem:[%s6034_s7 + $0x98] sm:$0xff]  ;;  %v893_v0 = vpack.c.bf16 %v831_v61, %v830_v60  ;;  %v829_v5 = vld [vmem:[%s6034_s7 + $0x8] sm:$0xff] }
  0x26   : > { %1134 = vmatpush.bf16.xpose.msra.mxu0 %v1104_v14  ;;  %v700_v57 = vpack.c.bf16 %v636_v54, %v636_v54  ;;  %v901_v1 = vpack.c.bf16 %v847_v63, %v846_v62  ;;  %v844_v6 = vld [vmem:[%s6034_s7 + $0x80] sm:$0xff]  ;;  %v845_v7 = vld [vmem:[%s6034_s7 + $0x88] sm:$0xff]  ;;  %v892_v10 = vpack.c.bf16 %v829_v5, %v828_v4  ;;  %v575_v19 = vld [vmem:[%s6060_s10 + $0x30] sm:$0xff] }
  0x27   : > { %1223 = vmatpush.bf16.xpose.msra.mxu1 %v1128_v15  ;;  %764 = vst.msk [vmem:[#allocation2 + $0x8] sm:$0xf] %vm761_vm1, %v699_v56  ;;  %v1089_v2 = vsel %vm1036_vm0, %v893_v0, 0  ;;  %v573_v8 = vld [vmem:[%s6060_s10 + $0x20] sm:$0xff]  ;;  %v574_v9 = vld [vmem:[%s6060_s10 + $0x28] sm:$0xff]  ;;  %v900_v13 = vpack.c.bf16 %v845_v7, %v844_v6  ;;  %v576_v20 = vld [vmem:[%s6060_s10 + $0x38] sm:$0xff] }
  0x28   : > { %765 = vst.msk [vmem:[#allocation2 + $0xc] sm:$0xf] %vm761_vm1, %v700_v57  ;;  %v1113_v3 = vsel %vm1036_vm0, %v901_v1, 0  ;;  %v637_v11 = vmul.f32 0.125, %v573_v8  ;;  %v638_v12 = vmul.f32 0.125, %v574_v9  ;;  %v1086_v16 = vsel %vm1036_vm0, %v892_v10, 0 }
  0x29   : > { %v1110_v17 = vsel %vm1036_vm0, %v900_v13, 0  ;;  %v639_v21 = vmul.f32 0.125, %v575_v19  ;;  %v577_v26 = vld [vmem:[%s6060_s10 + $0x40] sm:$0xff]  ;;  %v578_v27 = vld [vmem:[%s6060_s10 + $0x48] sm:$0xff]  ;;  %v579_v33 = vld [vmem:[%s6060_s10 + $0x50] sm:$0xff]  ;;  %v5939_v7 = vmov 0  }
  0x2a   : > { %v701_v14 = vpack.c.bf16 %v637_v11, %v637_v11  ;;  %v702_v15 = vpack.c.bf16 %v638_v12, %v638_v12  ;;  %v641_v28 = vmul.f32 0.125, %v577_v26  ;;  %v642_v29 = vmul.f32 0.125, %v578_v27  ;;  %v581_v40 = vld [vmem:[%s6060_s10 + $0x60] sm:$0xff]  ;;  %v582_v41 = vld [vmem:[%s6060_s10 + $0x68] sm:$0xff]  ;;  %v583_v47 = vld [vmem:[%s6060_s10 + $0x70] sm:$0xff] }
  0x2b   : > { %v643_v35 = vmul.f32 0.125, %v579_v33  ;;  %v645_v42 = vmul.f32 0.125, %v581_v40  ;;  %v646_v43 = vmul.f32 0.125, %v582_v41  ;;  %v584_v48 = vld [vmem:[%s6060_s10 + $0x78] sm:$0xff]  ;;  %v647_v49 = vmul.f32 0.125, %v583_v47  ;;  %v585_v54 = vld [vmem:[%s6060_s10 + $0x80] sm:$0xff] }
  0x2c   : > { %766 = vst.msk [vmem:[#allocation2 + $0x10] sm:$0xf] %vm761_vm1, %v701_v14  ;;  %v5239_v18 = vld [vmem:[#allocation2] sm:$0xff]  ;;  %v705_v30 = vpack.c.bf16 %v641_v28, %v641_v28  ;;  %v706_v31 = vpack.c.bf16 %v642_v29, %v642_v29  ;;  %v648_v50 = vmul.f32 0.125, %v584_v48  ;;  %v586_v55 = vld [vmem:[%s6060_s10 + $0x88] sm:$0xff]  ;;  %v649_v56 = vmul.f32 0.125, %v585_v54 }
  0x2d   : > { %767 = vst.msk [vmem:[#allocation2 + $0x14] sm:$0xf] %vm761_vm1, %v702_v15  ;;  %v711_v51 = vpack.c.bf16 %v647_v49, %v647_v49  ;;  %v650_v57 = vmul.f32 0.125, %v586_v55  ;;  %v587_v61 = vld [vmem:[%s6060_s10 + $0x90] sm:$0xff]  ;;  %v588_v62 = vld [vmem:[%s6060_s10 + $0x98] sm:$0xff]  ;;  %v589_v5 = vld [vmem:[%s6060_s10 + $0xa0] sm:$0xff] }
  0x2e   : > { %1135 = vmatpush.bf16.xpose.msra.mxu0 %v1101_v22  ;;  %v640_v22 = vmul.f32 0.125, %v576_v20  ;;  %770 = vst.msk [vmem:[#allocation2 + $0x20] sm:$0xf] %vm761_vm1, %v705_v30  ;;  %v712_v52 = vpack.c.bf16 %v648_v50, %v648_v50  ;;  %v651_v63 = vmul.f32 0.125, %v587_v61  ;;  %v652_v0 = vmul.f32 0.125, %v588_v62  ;;  %v590_v6 = vld [vmem:[%s6060_s10 + $0xa8] sm:$0xff] }
  0x2f   : > { %1224 = vmatpush.bf16.xpose.msra.mxu1 %v1125_v23  ;;  %v703_v23 = vpack.c.bf16 %v639_v21, %v639_v21  ;;  %v5240_v25 = vld [vmem:[#allocation2 + $0x8] sm:$0xff]  ;;  %771 = vst.msk [vmem:[#allocation2 + $0x24] sm:$0xf] %vm761_vm1, %v706_v31  ;;  %v826_v4 = vld [vmem:[%s354_s14] sm:$0x3]  ;;  %v653_v9 = vmul.f32 0.125, %v589_v5 }
  0x30   : > { %v704_v24 = vpack.c.bf16 %v640_v22, %v640_v22  ;;  %776 = vst.msk [vmem:[#allocation2 + $0x38] sm:$0xf] %vm761_vm1, %v711_v51  ;;  %v715_v1 = vpack.c.bf16 %v651_v63, %v651_v63  ;;  %vm827_vm2 = vcmp.ne.f32.partialorder %v826_v4, 0.0  ;;  %v654_v10 = vmul.f32 0.125, %v590_v6  ;;  %v593_v40 = vld [vmem:[%s6060_s10 + $0xc0] sm:$0xff]  ;;  %v594_v41 = vld [vmem:[%s6060_s10 + $0xc8] sm:$0xff] }
  0x31   : > { %768 = vst.msk [vmem:[#allocation2 + $0x18] sm:$0xf] %vm761_vm1, %v703_v23  ;;  %v1311_v8 = vsel %vm827_vm2, 1, %v5939_v7  ;;  %v717_v11 = vpack.c.bf16 %v653_v9, %v653_v9  ;;  %v591_v23 = vld [vmem:[%s6060_s10 + $0xb0] sm:$0xff] }
  0x32   : > { %769 = vst.msk [vmem:[#allocation2 + $0x1c] sm:$0xf] %vm761_vm1, %v704_v24  ;;  %v718_v12 = vpack.c.bf16 %v654_v10, %v654_v10  ;;  %v1312_v13 = vperm.slane %v1311_v8, 0  ;;  %v1313_v14 = vperm.slane %v1311_v8, 1  ;;  %v592_v24 = vld [vmem:[%s6060_s10 + $0xb8] sm:$0xff]  ;;  %v597_v10 = vld [vmem:[%s6060_s10 + $0xe0] sm:$0xff] }
  0x33   : > { %777 = vst.msk [vmem:[#allocation2 + $0x3c] sm:$0xf] %vm761_vm1, %v712_v52  ;;  %v656_v26 = vmul.f32 0.125, %v592_v24 }
  0x34   : > { %v5241_v32 = vld [vmem:[#allocation2 + $0x10] sm:$0xff]  ;;  %780 = vst.msk [vmem:[#allocation2 + $0x48] sm:$0xf] %vm761_vm1, %v715_v1  ;;  %vm6154_vm3 = vcmp.eq.s32.totalorder %v1312_v13, 1  ;;  %vm6158_vm4 = vcmp.eq.s32.totalorder %v1313_v14, 1 }
  0x35   : > { %782 = vst.msk [vmem:[#allocation2 + $0x50] sm:$0xf] %vm761_vm1, %v717_v11  ;;  %v720_v31 = vpack.c.bf16 %v656_v26, %v656_v26  ;;  %v598_v11 = vld [vmem:[%s6060_s10 + $0xe8] sm:$0xff] }
  0x36   : > { %1136 = vmatpush.bf16.xpose.msra.mxu0 %v1098_v34  ;;  %v580_v34 = vld [vmem:[%s6060_s10 + $0x58] sm:$0xff]  ;;  %v5243_v46 = vld [vmem:[#allocation2 + $0x20] sm:$0xff]  ;;  %783 = vst.msk [vmem:[#allocation2 + $0x54] sm:$0xf] %vm761_vm1, %v718_v12  ;;  %v661_v12 = vmul.f32 0.125, %v597_v10  ;;  %v662_v13 = vmul.f32 0.125, %v598_v11 }
  0x37   : > { %1225 = vmatpush.bf16.xpose.msra.mxu1 %v1122_v37  ;;  %v644_v36 = vmul.f32 0.125, %v580_v34  ;;  %v707_v37 = vpack.c.bf16 %v643_v35, %v643_v35  ;;  %785 = vst.msk [vmem:[#allocation2 + $0x5c] sm:$0xf] %vm761_vm1, %v720_v31  ;;  %v886_v10 = vld [vmem:[%s6288_s24 + $0xd0] sm:$0xff] }
  0x39   : > { %v708_v38 = vpack.c.bf16 %v644_v36, %v644_v36  ;;  %772 = vst.msk [vmem:[#allocation2 + $0x28] sm:$0xf] %vm761_vm1, %v707_v37  ;;  %v5242_v39 = vld [vmem:[#allocation2 + $0x18] sm:$0xff] }
  0x3b   : > { %773 = vst.msk [vmem:[#allocation2 + $0x2c] sm:$0xf] %vm761_vm1, %v708_v38 }
  0x3d   : > { %v5249_v51 = vld [vmem:[#allocation2 + $0x50] sm:$0xff] }
  0x3e   : > { %1137 = vmatpush.bf16.xpose.msra.mxu0 %v1095_v44  ;;  %v709_v44 = vpack.c.bf16 %v645_v42, %v645_v42  ;;  %v657_v42 = vmul.f32 0.125, %v593_v40 }
  0x3f   : > { %1226 = vmatpush.bf16.xpose.msra.mxu1 %v1119_v45  ;;  %v710_v45 = vpack.c.bf16 %v646_v43, %v646_v43  ;;  %v658_v43 = vmul.f32 0.125, %v594_v41 }
  0x40   : > { %774 = vst.msk [vmem:[#allocation2 + $0x30] sm:$0xf] %vm761_vm1, %v709_v44  ;;  %v721_v47 = vpack.c.bf16 %v657_v42, %v657_v42 }
  0x41   : > { %775 = vst.msk [vmem:[#allocation2 + $0x34] sm:$0xf] %vm761_vm1, %v710_v45  ;;  %v722_v48 = vpack.c.bf16 %v658_v43, %v658_v43 }
  0x42   : > { %v5244_v53 = vld [vmem:[#allocation2 + $0x28] sm:$0xff]  ;;  %786 = vst.msk [vmem:[#allocation2 + $0x60] sm:$0xf] %vm761_vm1, %v721_v47  ;;  %v874_v47 = vld [vmem:[%s6288_s24 + $0x70] sm:$0xff] }
  0x43   : > { %787 = vst.msk [vmem:[#allocation2 + $0x64] sm:$0xf] %vm761_vm1, %v722_v48  ;;  %v875_v48 = vld [vmem:[%s6288_s24 + $0x78] sm:$0xff] }
  0x46   : > { %1138 = vmatpush.bf16.xpose.msra.mxu0 %v1092_v58  ;;  %v713_v58 = vpack.c.bf16 %v649_v56, %v649_v56 }
  0x47   : > { %1227 = vmatpush.bf16.xpose.msra.mxu1 %v1116_v59  ;;  %v714_v59 = vpack.c.bf16 %v650_v57, %v650_v57  ;;  %v595_v57 = vld [vmem:[%s6060_s10 + $0xd0] sm:$0xff] }
  0x48   : > { %778 = vst.msk [vmem:[#allocation2 + $0x40] sm:$0xf] %vm761_vm1, %v713_v58  ;;  %v5245_v60 = vld [vmem:[#allocation2 + $0x30] sm:$0xff]  ;;  %v596_v58 = vld [vmem:[%s6060_s10 + $0xd8] sm:$0xff] }
  0x49   : > { %779 = vst.msk [vmem:[#allocation2 + $0x44] sm:$0xf] %vm761_vm1, %v714_v59  ;;  %v659_v59 = vmul.f32 0.125, %v595_v57 }
  0x4e   : > { %1139 = vmatpush.bf16.xpose.msra.mxu0 %v1089_v2  ;;  %v716_v2 = vpack.c.bf16 %v652_v0, %v652_v0  ;;  %v723_v0 = vpack.c.bf16 %v659_v59, %v659_v59  ;;  %v873_v59 = vld [vmem:[%s6288_s24 + $0x68] sm:$0xff] }
  0x4f   : > { %1228 = vmatpush.bf16.xpose.msra.mxu1 %v1113_v3  ;;  %v5246_v3 = vld [vmem:[#allocation2 + $0x38] sm:$0xff] }
  0x50   : > { %781 = vst.msk [vmem:[#allocation2 + $0x4c] sm:$0xf] %vm761_vm1, %v716_v2 }
  0x51   : > { %788 = vst.msk [vmem:[#allocation2 + $0x68] sm:$0xf] %vm761_vm1, %v723_v0 }
  0x56   : > { %1140 = vmatpush.bf16.xpose.msra.mxu0 %v1086_v16 }
  0x57   : > { %1229 = vmatpush.bf16.xpose.msra.mxu1 %v1110_v17  ;;  %v5247_v17 = vld [vmem:[#allocation2 + $0x40] sm:$0xff]  ;;  %v5248_v34 = vld [vmem:[#allocation2 + $0x48] sm:$0xff] }
  0x5d   : > { %5039 = vmatmul.msk.bf16.vlgmr.msra.gmra.mxu0 %vm1036_vm0, %v5239_v18 }
  0x5e   : > { %5055 = vmatmul.msk.bf16.vlgmr.msra.gmra.mxu1 %vm1036_vm0, %v5239_v18 }
  0x6d   : > { %5040 = vmatmul.msk.bf16.gmra.mxu0 %vm1036_vm0, %v5240_v25 }
  0x6e   : > { %5056 = vmatmul.msk.bf16.gmra.mxu1 %vm1036_vm0, %v5240_v25  ;;  %v655_v25 = vmul.f32 0.125, %v591_v23 }
  0x70   : > { %v719_v30 = vpack.c.bf16 %v655_v25, %v655_v25  ;;  %v5251_v25 = vld [vmem:[#allocation2 + $0x60] sm:$0xff] }
  0x72   : > { %784 = vst.msk [vmem:[#allocation2 + $0x58] sm:$0xf] %vm761_vm1, %v719_v30 }
  0x79   : > { %v5250_v4 = vld [vmem:[#allocation2 + $0x58] sm:$0xff] }
  0x7d   : > { %5041 = vmatmul.msk.bf16.gmra.mxu0 %vm1036_vm0, %v5241_v32 }
  0x7e   : > { %5057 = vmatmul.msk.bf16.gmra.mxu1 %vm1036_vm0, %v5241_v32 }
  0x8d   : > { %5042 = vmatmul.msk.bf16.gmra.mxu0 %vm1036_vm0, %v5242_v39 }
  0x8e   : > { %5058 = vmatmul.msk.bf16.gmra.mxu1 %vm1036_vm0, %v5242_v39 }
  0x9d   : > { %5043 = vmatmul.msk.bf16.gmra.mxu0 %vm1036_vm0, %v5243_v46 }
  0x9e   : > { %5059 = vmatmul.msk.bf16.gmra.mxu1 %vm1036_vm0, %v5243_v46 }
  0xad   : > { %5044 = vmatmul.msk.bf16.gmra.mxu0 %vm1036_vm0, %v5244_v53 }
  0xae   : > { %5060 = vmatmul.msk.bf16.gmra.mxu1 %vm1036_vm0, %v5244_v53 }
  0xbd   : > { %5045 = vmatmul.msk.bf16.gmra.mxu0 %vm1036_vm0, %v5245_v60 }
  0xbe   : > { %5061 = vmatmul.msk.bf16.gmra.mxu1 %vm1036_vm0, %v5245_v60  ;;  %v660_v60 = vmul.f32 0.125, %v596_v58  ;;  %v872_v58 = vld [vmem:[%s6288_s24 + $0x60] sm:$0xff] }
  0xbf   : > { %v914_v0 = vpack.c.bf16 %v873_v59, %v872_v58  ;;  %v881_v59 = vld [vmem:[%s6288_s24 + $0xa8] sm:$0xff] }
  0xc0   : > { %v724_v1 = vpack.c.bf16 %v660_v60, %v660_v60  ;;  %v888_v60 = vld [vmem:[%s6288_s24 + $0xe0] sm:$0xff] }
  0xc2   : > { %789 = vst.msk [vmem:[#allocation2 + $0x6c] sm:$0xf] %vm761_vm1, %v724_v1  ;;  %v889_v1 = vld [vmem:[%s6288_s24 + $0xe8] sm:$0xff] }
  0xcd   : > { %5046 = vmatmul.msk.bf16.gmra.mxu0 %vm1036_vm0, %v5246_v3 }
  0xce   : > { %5062 = vmatmul.msk.bf16.gmra.mxu1 %vm1036_vm0, %v5246_v3 }
  0xda   : > { %v1142_v18 = vpop.f32.mrf.mxu0 }
  0xdb   : > { %v6164_v19 = vsel %vm6154_vm3, %v1142_v18, -3.4028235e+38  ;;  %v1231_v20 = vpop.f32.mrf.mxu1 }
  0xdc   : > { %v6168_v21 = vsel %vm6158_vm4, %v1231_v20, -3.4028235e+38  ;;  %v725_v20 = vpack.c.bf16 %v661_v12, %v661_v12  ;;  %v887_v12 = vld [vmem:[%s6288_s24 + $0xd8] sm:$0xff] }
  0xdd   : > { %5047 = vmatmul.msk.bf16.gmra.mxu0 %vm1036_vm0, %v5247_v17  ;;  %v1444_v22 = vmax.f32 %v6164_v19, %v6168_v21 }
  0xde   : > { %5063 = vmatmul.msk.bf16.gmra.mxu1 %vm1036_vm0, %v5247_v17  ;;  %790 = vst.msk [vmem:[#allocation2 + $0x70] sm:$0xf] %vm761_vm1, %v725_v20 }
  0xdf   : > { %1445 = vmax.xlane.f32.xlu0 %v1444_v22  ;;  %v726_v22 = vpack.c.bf16 %v662_v13, %v662_v13  ;;  %v921_v13 = vpack.c.bf16 %v887_v12, %v886_v10 }
  0xe1   : > { %791 = vst.msk [vmem:[#allocation2 + $0x74] sm:$0xf] %vm761_vm1, %v726_v22 }
  0xe2   : > { %v1144_v27 = vpop.f32.mrf.mxu0 }
  0xe3   : > { %v6178_v28 = vsel %vm6154_vm3, %v1144_v27, -3.4028235e+38  ;;  %v1233_v29 = vpop.f32.mrf.mxu1 }
  0xe4   : > { %v6182_v32 = vsel %vm6158_vm4, %v1233_v29, -3.4028235e+38 }
  0xe5   : > { %v1447_v33 = vmax.f32 %v6178_v28, %v6182_v32 }
  0xe7   : > { %1448 = vmax.xlane.f32.xlu0 %v1447_v33  ;;  %v599_v33 = vld [vmem:[%s6060_s10 + $0xf0] sm:$0xff] }
  0xea   : > { %v1147_v35 = vpop.f32.mrf.mxu0 }
  0xeb   : > { %v6190_v36 = vsel %vm6154_vm3, %v1147_v35, -3.4028235e+38  ;;  %v1236_v37 = vpop.f32.mrf.mxu1  ;;  %v663_v35 = vmul.f32 0.125, %v599_v33  ;;  %v885_v33 = vld [vmem:[%s6288_s24 + $0xc8] sm:$0xff] }
  0xec   : > { %v6194_v38 = vsel %vm6158_vm4, %v1236_v37, -3.4028235e+38 }
  0xed   : > { %5048 = vmatmul.msk.bf16.gmra.mxu0 %vm1036_vm0, %v5248_v34  ;;  %v1450_v39 = vmax.f32 %v6190_v36, %v6194_v38  ;;  %v727_v42 = vpack.c.bf16 %v663_v35, %v663_v35  ;;  %v866_v35 = vld [vmem:[%s6288_s24 + $0x30] sm:$0xff] }
  0xee   : > { %5064 = vmatmul.msk.bf16.gmra.mxu1 %vm1036_vm0, %v5248_v34  ;;  %v600_v34 = vld [vmem:[%s6060_s10 + $0xf8] sm:$0xff] }
  0xef   : > { %1451 = vmax.xlane.f32.xlu1 %v1450_v39  ;;  %v664_v37 = vmul.f32 0.125, %v600_v34  ;;  %792 = vst.msk [vmem:[#allocation2 + $0x78] sm:$0xf] %vm761_vm1, %v727_v42 }
  0xf1   : > { %v728_v43 = vpack.c.bf16 %v664_v37, %v664_v37  ;;  %v867_v37 = vld [vmem:[%s6288_s24 + $0x38] sm:$0xff] }
  0xf2   : > { %v1149_v44 = vpop.f32.mrf.mxu0  ;;  %v911_v42 = vpack.c.bf16 %v867_v37, %v866_v35  ;;  %v5085_v37 = vld [vmem:[%s6034_s7 + $0x170] sm:$0xff] }
  0xf3   : > { %v6204_v45 = vsel %vm6154_vm3, %v1149_v44, -3.4028235e+38  ;;  %v1238_v46 = vpop.f32.mrf.mxu1  ;;  %793 = vst.msk [vmem:[#allocation2 + $0x7c] sm:$0xf] %vm761_vm1, %v728_v43  ;;  %v883_v43 = vld [vmem:[%s6288_s24 + $0xb8] sm:$0xff] }
  0xf4   : > { %v6208_v49 = vsel %vm6158_vm4, %v1238_v46, -3.4028235e+38 }
  0xf5   : > { %v1453_v50 = vmax.f32 %v6204_v45, %v6208_v49 }
  0xf7   : > { %1454 = vmax.xlane.f32.xlu1 %v1453_v50  ;;  %v890_v50 = vld [vmem:[%s6288_s24 + $0xf0] sm:$0xff] }
  0xfa   : > { %v1152_v52 = vpop.f32.mrf.mxu0 }
  0xfb   : > { %v6216_v53 = vsel %vm6154_vm3, %v1152_v52, -3.4028235e+38  ;;  %v1241_v54 = vpop.f32.mrf.mxu1  ;;  %v891_v52 = vld [vmem:[%s6288_s24 + $0xf8] sm:$0xff] }
  0xfc   : > { %v6220_v55 = vsel %vm6158_vm4, %v1241_v54, -3.4028235e+38  ;;  %v923_v54 = vpack.c.bf16 %v891_v52, %v890_v50  ;;  %v864_v52 = vld [vmem:[%s6288_s24 + $0x20] sm:$0xff] }
  0xfd   : > { %5049 = vmatmul.msk.bf16.gmra.mxu0 %vm1036_vm0, %v5249_v51  ;;  %v1456_v56 = vmax.f32 %v6216_v53, %v6220_v55 }
  0xfe   : > { %5065 = vmatmul.msk.bf16.gmra.mxu1 %vm1036_vm0, %v5249_v51  ;;  %v915_v51 = vpack.c.bf16 %v875_v48, %v874_v47  ;;  %2205 = vmatpush.bf16.msra.mxu3 %v923_v54  ;;  %v865_v54 = vld [vmem:[%s6288_s24 + $0x28] sm:$0xff] }
  0xff   : > { %1457 = vmax.xlane.f32.xlu2 %v1456_v56  ;;  %v5252_v56 = vld [vmem:[#allocation2 + $0x68] sm:$0xff]  ;;  %v910_v58 = vpack.c.bf16 %v865_v54, %v864_v52 }
 0x100   : > { %2116 = vmatpush.bf16.msra.mxu2 %v915_v51 }
 0x102   : > { %v1154_v61 = vpop.f32.mrf.mxu0 }
 0x103   : > { %v6230_v62 = vsel %vm6154_vm3, %v1154_v61, -3.4028235e+38  ;;  %v1243_v63 = vpop.f32.mrf.mxu1 }
 0x104   : > { %v6234_v2 = vsel %vm6158_vm4, %v1243_v63, -3.4028235e+38  ;;  %2117 = vmatpush.bf16.msra.mxu2 %v914_v0  ;;  %v863_v0 = vld [vmem:[%s6288_s24 + $0x18] sm:$0xff] }
 0x105   : > { %v1459_v3 = vmax.f32 %v6230_v62, %v6234_v2 }
 0x107   : > { %1460 = vmax.xlane.f32.xlu2 %v1459_v3 }
 0x10a   : > { %v1157_v5 = vpop.f32.mrf.mxu0 }
 0x10b   : > { %v6242_v6 = vsel %vm6154_vm3, %v1157_v5, -3.4028235e+38  ;;  %v1246_v7 = vpop.f32.mrf.mxu1 }
 0x10c   : > { %v6246_v8 = vsel %vm6158_vm4, %v1246_v7, -3.4028235e+38  ;;  %v870_v7 = vld [vmem:[%s6288_s24 + $0x50] sm:$0xff] }
 0x10d   : > { %5050 = vmatmul.msk.bf16.gmra.mxu0 %vm1036_vm0, %v5250_v4  ;;  %v1462_v9 = vmax.f32 %v6242_v6, %v6246_v8 }
 0x10e   : > { %5066 = vmatmul.msk.bf16.gmra.mxu1 %vm1036_vm0, %v5250_v4  ;;  %v922_v4 = vpack.c.bf16 %v889_v1, %v888_v60  ;;  %v878_v1 = vld [vmem:[%s6288_s24 + $0x90] sm:$0xff] }
 0x10f   : > { %1463 = vmax.xlane.f32.xlu0 %v1462_v9  ;;  %v871_v9 = vld [vmem:[%s6288_s24 + $0x58] sm:$0xff] }
 0x110   : > { %2206 = vmatpush.bf16.msra.mxu3 %v922_v4  ;;  %v913_v11 = vpack.c.bf16 %v871_v9, %v870_v7 }
 0x112   : > { %v1159_v14 = vpop.f32.mrf.mxu0  ;;  %2118 = vmatpush.bf16.msra.mxu2 %v913_v11 }
 0x113   : > { %v6256_v17 = vsel %vm6154_vm3, %v1159_v14, -3.4028235e+38  ;;  %v1248_v18 = vpop.f32.mrf.mxu1 }
 0x114   : > { %v6260_v23 = vsel %vm6158_vm4, %v1248_v18, -3.4028235e+38  ;;  %2207 = vmatpush.bf16.msra.mxu3 %v921_v13  ;;  %v860_v13 = vld [vmem:[%s6288_s24] sm:$0xff] }
 0x115   : > { %v1465_v24 = vmax.f32 %v6256_v17, %v6260_v23 }
 0x117   : > { %1466 = vmax.xlane.f32.xlu1 %v1465_v24  ;;  %v868_v24 = vld [vmem:[%s6288_s24 + $0x40] sm:$0xff] }
 0x11a   : > { %v1162_v26 = vpop.f32.mrf.mxu0 }
 0x11b   : > { %v6268_v27 = vsel %vm6154_vm3, %v1162_v26, -3.4028235e+38  ;;  %v1251_v29 = vpop.f32.mrf.mxu1  ;;  %v884_v26 = vld [vmem:[%s6288_s24 + $0xc0] sm:$0xff] }
 0x11c   : > { %v6272_v30 = vsel %vm6158_vm4, %v1251_v29, -3.4028235e+38  ;;  %v920_v34 = vpack.c.bf16 %v885_v33, %v884_v26  ;;  %v877_v26 = vld [vmem:[%s6288_s24 + $0x88] sm:$0xff] }
 0x11d   : > { %5051 = vmatmul.msk.bf16.gmra.mxu0 %vm1036_vm0, %v5251_v25  ;;  %v1468_v31 = vmax.f32 %v6268_v27, %v6272_v30 }
 0x11e   : > { %5067 = vmatmul.msk.bf16.gmra.mxu1 %vm1036_vm0, %v5251_v25  ;;  %v869_v25 = vld [vmem:[%s6288_s24 + $0x48] sm:$0xff]  ;;  %2208 = vmatpush.bf16.msra.mxu3 %v920_v34 }
 0x11f   : > { %1469 = vmax.xlane.f32.xlu2 %v1468_v31  ;;  %v912_v31 = vpack.c.bf16 %v869_v25, %v868_v24 }
 0x121   : > { %2119 = vmatpush.bf16.msra.mxu2 %v912_v31  ;;  %v5254_v31 = vld [vmem:[#allocation2 + $0x78] sm:$0xff] }
 0x122   : > { %v1164_v39 = vpop.f32.mrf.mxu0 }
 0x123   : > { %v6282_v40 = vsel %vm6154_vm3, %v1164_v39, -3.4028235e+38  ;;  %v1253_v41 = vpop.f32.mrf.mxu1  ;;  %v882_v39 = vld [vmem:[%s6288_s24 + $0xb0] sm:$0xff] }
 0x124   : > { %v6292_v44 = vsel %vm6158_vm4, %v1253_v41, -3.4028235e+38  ;;  %v5253_v41 = vld [vmem:[#allocation2 + $0x70] sm:$0xff]  ;;  %v919_v47 = vpack.c.bf16 %v883_v43, %v882_v39  ;;  %v5086_v39 = vld [vmem:[%s6034_s7 + $0x178] sm:$0xff] }
 0x125   : > { %v1471_v46 = vmax.f32 %v6282_v40, %v6292_v44  ;;  %2120 = vmatpush.bf16.msra.mxu2 %v911_v42  ;;  %v2367_v43 = vpack.c.bf16 %v5086_v39, %v5085_v37 }
 0x126   : > { %2209 = vmatpush.bf16.msra.mxu3 %v919_v47 }
 0x127   : > { %1472 = vmax.xlane.f32.xlu0 %v1471_v46  ;;  %v2575_v52 = vsel %vm1036_vm0, %v2367_v43, 0 }
 0x129   : > { %2121 = vmatpush.bf16.msra.mxu2 %v910_v58 }
 0x12a   : > { %v1167_v57 = vpop.f32.mrf.mxu0 }
 0x12b   : > { %v6307_v61 = vsel %vm6154_vm3, %v1167_v57, -3.4028235e+38  ;;  %v1256_v63 = vpop.f32.mrf.mxu1 }
 0x12c   : > { %v6312_v3 = vsel %vm6158_vm4, %v1256_v63, -3.4028235e+38  ;;  %v862_v63 = vld [vmem:[%s6288_s24 + $0x10] sm:$0xff] }
 0x12d   : > { %5052 = vmatmul.msk.bf16.gmra.mxu0 %vm1036_vm0, %v5252_v56  ;;  %v1474_v5 = vmax.f32 %v6307_v61, %v6312_v3  ;;  %v909_v4 = vpack.c.bf16 %v863_v0, %v862_v63 }
 0x12e   : > { %5068 = vmatmul.msk.bf16.gmra.mxu1 %vm1036_vm0, %v5252_v56  ;;  %v880_v56 = vld [vmem:[%s6288_s24 + $0xa0] sm:$0xff] }
 0x12f   : > { %1475 = vmax.xlane.f32.xlu1 %v1474_v5  ;;  %v918_v60 = vpack.c.bf16 %v881_v59, %v880_v56  ;;  %v879_v5 = vld [vmem:[%s6288_s24 + $0x98] sm:$0xff]  ;;  %2122 = vmatpush.bf16.msra.mxu2 %v909_v4 }
 0x130   : > { %v917_v9 = vpack.c.bf16 %v879_v5, %v878_v1 }
 0x131   : > { %2210 = vmatpush.bf16.msra.mxu3 %v918_v60 }
 0x132   : > { %v1169_v14 = vpop.f32.mrf.mxu0 }
 0x133   : > { %v6324_v18 = vsel %vm6154_vm3, %v1169_v14, -3.4028235e+38  ;;  %v1258_v20 = vpop.f32.mrf.mxu1  ;;  %v861_v14 = vld [vmem:[%s6288_s24 + $0x8] sm:$0xff] }
 0x134   : > { %v6328_v22 = vsel %vm6158_vm4, %v1258_v20, -3.4028235e+38  ;;  %v876_v20 = vld [vmem:[%s6288_s24 + $0x80] sm:$0xff]  ;;  %v908_v25 = vpack.c.bf16 %v861_v14, %v860_v13 }
 0x135   : > { %v1477_v29 = vmax.f32 %v6324_v18, %v6328_v22  ;;  %2211 = vmatpush.bf16.msra.mxu3 %v917_v9 }
 0x136   : > { %2123 = vmatpush.bf16.msra.mxu2 %v908_v25 }
 0x137   : > { %1478 = vmax.xlane.f32.xlu2 %v1477_v29  ;;  %v916_v29 = vpack.c.bf16 %v877_v26, %v876_v20 }
 0x139   : > { %2212 = vmatpush.bf16.msra.mxu3 %v916_v29 }
 0x13a   : > { %v1172_v46 = vpop.f32.mrf.mxu0  ;;  %2601 = vmatpush.bf16.xpose.msrb.mxu2 %v2575_v52 }
 0x13b   : > { %v6342_v48 = vsel %vm6154_vm3, %v1172_v46, -3.4028235e+38  ;;  %v1261_v50 = vpop.f32.mrf.mxu1  ;;  %v5102_v46 = vld [vmem:[%s6034_s7 + $0x1f8] sm:$0xff] }
 0x13c   : > { %v6346_v51 = vsel %vm6158_vm4, %v1261_v50, -3.4028235e+38 }
 0x13d   : > { %5053 = vmatmul.msk.bf16.gmra.mxu0 %vm1036_vm0, %v5253_v41  ;;  %v1480_v57 = vmax.f32 %v6342_v48, %v6346_v51 }
 0x13e   : > { %5069 = vmatmul.msk.bf16.gmra.mxu1 %vm1036_vm0, %v5253_v41  ;;  %v5101_v41 = vld [vmem:[%s6034_s7 + $0x1f0] sm:$0xff] }
 0x13f   : > { %1481 = vmax.xlane.f32.xlu0 %v1480_v57  ;;  %v2375_v50 = vpack.c.bf16 %v5102_v46, %v5101_v41 }
 0x141   : > { %v2599_v54 = vsel %vm1036_vm0, %v2375_v50, 0 }
 0x142   : > { %v1174_v7 = vpop.f32.mrf.mxu0  ;;  %2690 = vmatpush.bf16.xpose.msrb.mxu3 %v2599_v54 }
 0x143   : > { %v6362_v10 = vsel %vm6154_vm3, %v1174_v7, -3.4028235e+38  ;;  %v1263_v11 = vpop.f32.mrf.mxu1 }
 0x144   : > { %v6366_v12 = vsel %vm6158_vm4, %v1263_v11, -3.4028235e+38 }
 0x145   : > { %v1483_v24 = vmax.f32 %v6362_v10, %v6366_v12 }
 0x147   : > { %1484 = vmax.xlane.f32.xlu1 %v1483_v24 }
 0x14a   : > { %v1177_v33 = vpop.f32.mrf.mxu0 }
 0x14b   : > { %v6376_v34 = vsel %vm6154_vm3, %v1177_v33, -3.4028235e+38  ;;  %v1266_v35 = vpop.f32.mrf.mxu1 }
 0x14c   : > { %v6383_v42 = vsel %vm6158_vm4, %v1266_v35, -3.4028235e+38 }
 0x14d   : > { %5054 = vmatmul.msk.bf16.gmra.mxu0 %vm1036_vm0, %v5254_v31  ;;  %v1486_v47 = vmax.f32 %v6376_v34, %v6383_v42 }
 0x14e   : > { %5070 = vmatmul.msk.bf16.gmra.mxu1 %vm1036_vm0, %v5254_v31 }
 0x14f   : > { %1487 = vmax.xlane.f32.xlu2 %v1486_v47 }
 0x152   : > { %v6392_v56 = vpop.xlane.xlu0 %1445  ;;  %v1179_v57 = vpop.f32.mrf.mxu0 }
 0x153   : > { %v1668_v58 = vsub.f32 %v6164_v19, %v6392_v56  ;;  %v1669_v59 = vsub.f32 %v6168_v21, %v6392_v56  ;;  %v6400_v60 = vsel %vm6154_vm3, %v1179_v57, -3.4028235e+38  ;;  %v1268_v63 = vpop.f32.mrf.mxu1 }
 0x154   : > { %v6404_v0 = vsel %vm6158_vm4, %v1268_v63, -3.4028235e+38 }
 0x155   : > { %v1732_v1 = vmul.f32 1.442695, %v1668_v58  ;;  %v1734_v4 = vmul.f32 1.442695, %v1669_v59  ;;  %v1489_v5 = vmax.f32 %v6400_v60, %v6404_v0 }
 0x157   : > { %1490 = vmax.xlane.f32.xlu0 %v1489_v5  ;;  %5347 = vpow2.f32 %v1732_v1  ;;  %v5084_v5 = vld [vmem:[%s6034_s7 + $0x168] sm:$0xff] }
 0x158   : > { %5349 = vpow2.f32 %v1734_v4  ;;  %v5083_v4 = vld [vmem:[%s6034_s7 + $0x160] sm:$0xff] }
 0x15a   : > { %v6408_v19 = vpop.xlane.xlu0 %1448  ;;  %v1182_v21 = vpop.f32.mrf.mxu0 }
 0x15b   : > { %8700 = vst [vmem:[#allocation9_spill] sm:$0xff] %v6408_v19  ;;  %v1670_v7 = vsub.f32 %v6178_v28, %v6408_v19  ;;  %v1671_v9 = vsub.f32 %v6182_v32, %v6408_v19  ;;  %v6416_v11 = vsel %vm6154_vm3, %v1182_v21, -3.4028235e+38  ;;  %v1271_v13 = vpop.f32.mrf.mxu1  ;;  %v5099_v21 = vld [vmem:[%s6034_s7 + $0x1e0] sm:$0xff] }
 0x15c   : > { %v6420_v14 = vsel %vm6158_vm4, %v1271_v13, -3.4028235e+38  ;;  %v2366_v13 = vpack.c.bf16 %v5084_v5, %v5083_v4 }
 0x15d   : > { %v1736_v20 = vmul.f32 1.442695, %v1670_v7  ;;  %v1738_v24 = vmul.f32 1.442695, %v1671_v9  ;;  %v1492_v25 = vmax.f32 %v6416_v11, %v6420_v14  ;;  %v5348_v26 = vpop.eup %5347 }
 0x15e   : > { %v5350_v29 = vpop.eup %5349 }
 0x15f   : > { %1493 = vmax.xlane.f32.xlu1 %v1492_v25  ;;  %5351 = vpow2.f32 %v1736_v20  ;;  %v1892_v28 = vadd.f32 %v5350_v29, %v5348_v26  ;;  %v5100_v20 = vld [vmem:[%s6034_s7 + $0x1e8] sm:$0xff] }
 0x160   : > { %5353 = vpow2.f32 %v1738_v24 }
 0x161   : > { %1893 = vadd.xlane.f32.xlu2 %v1892_v28 }
 0x162   : > { %v6424_v32 = vpop.xlane.xlu1 %1451  ;;  %v1184_v31 = vpop.f32.mrf.mxu0 }
 0x163   : > { %8701 = vst [vmem:[#allocation10_spill] sm:$0xff] %v6424_v32  ;;  %v1672_v33 = vsub.f32 %v6190_v36, %v6424_v32  ;;  %v1673_v35 = vsub.f32 %v6194_v38, %v6424_v32  ;;  %v6432_v37 = vsel %vm6154_vm3, %v1184_v31, -3.4028235e+38  ;;  %v1273_v39 = vpop.f32.mrf.mxu1 }
 0x164   : > { %v6436_v41 = vsel %vm6158_vm4, %v1273_v39, -3.4028235e+38 }
 0x165   : > { %v1740_v43 = vmul.f32 1.442695, %v1672_v33  ;;  %v1742_v46 = vmul.f32 1.442695, %v1673_v35  ;;  %v5352_v47 = vpop.eup %5351  ;;  %v1495_v50 = vmax.f32 %v6432_v37, %v6436_v41 }
 0x166   : > { %v5354_v36 = vpop.eup %5353  ;;  %v2084_v52 = vpack.c.bf16 %v5352_v47, %v5348_v26  ;;  %v2572_v26 = vsel %vm1036_vm0, %v2366_v13, 0 }
 0x167   : > { %5355 = vpow2.f32 %v1740_v43  ;;  %v2085_v38 = vpack.c.bf16 %v5354_v36, %v5350_v29  ;;  %v1895_v54 = vadd.f32 %v5354_v36, %v5352_v47  ;;  %2602 = vmatpush.bf16.xpose.msrb.mxu2 %v2572_v26 }
 0x168   : > { %5357 = vpow2.f32 %v1742_v46  ;;  %2124 = vmatmul.bf16.vlgmr.msra.gmra.mxu2 %v2084_v52 }
 0x169   : > { %1496 = vmax.xlane.f32.xlu2 %v1495_v50  ;;  %2213 = vmatmul.bf16.vlgmr.msra.gmra.mxu3 %v2085_v38 }
 0x16a   : > { %v6440_v57 = vpop.xlane.xlu1 %1454  ;;  %v1187_v58 = vpop.f32.mrf.mxu0  ;;  %1896 = vadd.xlane.f32.xlu0 %v1895_v54 }
 0x16b   : > { %8702 = vst [vmem:[#allocation11_spill] sm:$0xff] %v6440_v57  ;;  %v1674_v59 = vsub.f32 %v6204_v45, %v6440_v57  ;;  %v1675_v63 = vsub.f32 %v6208_v49, %v6440_v57  ;;  %v1276_v1 = vpop.f32.mrf.mxu1  ;;  %v6451_v7 = vsel %vm6154_vm3, %v1187_v58, -3.4028235e+38  ;;  %v2374_v49 = vpack.c.bf16 %v5100_v20, %v5099_v21 }
 0x16c   : > { %v6455_v9 = vsel %vm6158_vm4, %v1276_v1, -3.4028235e+38 }
 0x16d   : > { %v1744_v24 = vmul.f32 1.442695, %v1674_v59  ;;  %v1746_v25 = vmul.f32 1.442695, %v1675_v63  ;;  %v5356_v45 = vpop.eup %5355  ;;  %v1498_v28 = vmax.f32 %v6451_v7, %v6455_v9  ;;  %v2596_v33 = vsel %vm1036_vm0, %v2374_v49, 0 }
 0x16e   : > { %v5358_v29 = vpop.eup %5357  ;;  %2691 = vmatpush.bf16.xpose.msrb.mxu3 %v2596_v33 }
 0x16f   : > { %5359 = vpow2.f32 %v1744_v24  ;;  %v1898_v31 = vadd.f32 %v5358_v29, %v5356_v45 }
 0x170   : > { %5361 = vpow2.f32 %v1746_v25 }
 0x171   : > { %1899 = vadd.xlane.f32.xlu1 %v1898_v31 }
 0x172   : > { %v6462_v35 = vpop.xlane.xlu2 %1457  ;;  %v1189_v39 = vpop.f32.mrf.mxu0  ;;  %1499 = vmax.xlane.f32.xlu0 %v1498_v28 }
 0x173   : > { %8703 = vst [vmem:[#allocation12_spill] sm:$0xff] %v6462_v35  ;;  %v1676_v43 = vsub.f32 %v6216_v53, %v6462_v35  ;;  %v1677_v46 = vsub.f32 %v6220_v55, %v6462_v35  ;;  %v6470_v47 = vsel %vm6154_vm3, %v1189_v39, -3.4028235e+38  ;;  %v1278_v50 = vpop.f32.mrf.mxu1 }
 0x174   : > { %v6474_v36 = vsel %vm6158_vm4, %v1278_v50, -3.4028235e+38 }
 0x175   : > { %v1748_v52 = vmul.f32 1.442695, %v1676_v43  ;;  %v1750_v38 = vmul.f32 1.442695, %v1677_v46  ;;  %v5360_v54 = vpop.eup %5359  ;;  %v1501_v58 = vmax.f32 %v6470_v47, %v6474_v36 }
 0x176   : > { %v5362_v59 = vpop.eup %5361  ;;  %v2086_v53 = vpack.c.bf16 %v5360_v54, %v5356_v45 }
 0x177   : > { %5363 = vpow2.f32 %v1748_v52  ;;  %v1901_v63 = vadd.f32 %v5362_v59, %v5360_v54  ;;  %v2087_v55 = vpack.c.bf16 %v5362_v59, %v5358_v29 }
 0x178   : > { %5365 = vpow2.f32 %v1750_v38  ;;  %2129 = vmatmul.bf16.gmra.mxu2 %v2086_v53 }
 0x179   : > { %1502 = vmax.xlane.f32.xlu1 %v1501_v58  ;;  %1902 = vadd.xlane.f32.xlu2 %v1901_v63 }
 0x17a   : > { %v6478_v1 = vpop.xlane.xlu2 %1460  ;;  %v1192_v4 = vpop.f32.mrf.mxu0  ;;  %2218 = vmatmul.bf16.gmra.mxu3 %v2087_v55 }
 0x17b   : > { %8704 = vst [vmem:[#allocation13_spill] sm:$0xff] %v6478_v1  ;;  %v1678_v5 = vsub.f32 %v6230_v62, %v6478_v1  ;;  %v1679_v21 = vsub.f32 %v6234_v2, %v6478_v1  ;;  %v6486_v13 = vsel %vm6154_vm3, %v1192_v4, -3.4028235e+38  ;;  %v1281_v20 = vpop.f32.mrf.mxu1  ;;  %v628_v1 = vld [vmem:[%s6060_s10 + $0x1d8] sm:$0xff] }
 0x17c   : > { %v6490_v24 = vsel %vm6158_vm4, %v1281_v20, -3.4028235e+38  ;;  %v5081_v20 = vld [vmem:[%s6034_s7 + $0x150] sm:$0xff] }
 0x17d   : > { %v1752_v25 = vmul.f32 1.442695, %v1678_v5  ;;  %v1754_v45 = vmul.f32 1.442695, %v1679_v21  ;;  %v5364_v26 = vpop.eup %5363  ;;  %v1504_v49 = vmax.f32 %v6486_v13, %v6490_v24 }
 0x17e   : > { %v5366_v29 = vpop.eup %5365 }
 0x17f   : > { %5367 = vpow2.f32 %v1752_v25  ;;  %v1904_v62 = vadd.f32 %v5366_v29, %v5364_v26  ;;  %v5082_v25 = vld [vmem:[%s6034_s7 + $0x158] sm:$0xff] }
 0x180   : > { %5369 = vpow2.f32 %v1754_v45  ;;  %v5097_v45 = vld [vmem:[%s6034_s7 + $0x1d0] sm:$0xff] }
 0x181   : > { %1505 = vmax.xlane.f32.xlu2 %v1504_v49  ;;  %1905 = vadd.xlane.f32.xlu0 %v1904_v62  ;;  %v2365_v49 = vpack.c.bf16 %v5082_v25, %v5081_v20 }
 0x182   : > { %v6494_v2 = vpop.xlane.xlu0 %1463  ;;  %v1194_v28 = vpop.f32.mrf.mxu0 }
 0x183   : > { %8705 = vst [vmem:[#allocation14_spill] sm:$0xff] %v6494_v2  ;;  %v1680_v31 = vsub.f32 %v6242_v6, %v6494_v2  ;;  %v1681_v33 = vsub.f32 %v6246_v8, %v6494_v2  ;;  %v6502_v39 = vsel %vm6154_vm3, %v1194_v28, -3.4028235e+38  ;;  %v1283_v43 = vpop.f32.mrf.mxu1 }
 0x184   : > { %v6506_v46 = vsel %vm6158_vm4, %v1283_v43, -3.4028235e+38 }
 0x185   : > { %v1756_v50 = vmul.f32 1.442695, %v1680_v31  ;;  %v1758_v52 = vmul.f32 1.442695, %v1681_v33  ;;  %v5368_v38 = vpop.eup %5367  ;;  %v1507_v54 = vmax.f32 %v6502_v39, %v6506_v46  ;;  %v2569_v31 = vsel %vm1036_vm0, %v2365_v49, 0 }
 0x186   : > { %v5370_v58 = vpop.eup %5369  ;;  %v2088_v6 = vpack.c.bf16 %v5368_v38, %v5364_v26  ;;  %2603 = vmatpush.bf16.xpose.msrb.mxu2 %v2569_v31 }
 0x187   : > { %5371 = vpow2.f32 %v1756_v50  ;;  %v1907_v8 = vadd.f32 %v5370_v58, %v5368_v38  ;;  %v2089_v59 = vpack.c.bf16 %v5370_v58, %v5366_v29  ;;  %v5098_v29 = vld [vmem:[%s6034_s7 + $0x1d8] sm:$0xff] }
 0x188   : > { %5373 = vpow2.f32 %v1758_v52  ;;  %2134 = vmatmul.bf16.gmra.mxu2 %v2088_v6  ;;  %v2373_v33 = vpack.c.bf16 %v5098_v29, %v5097_v45 }
 0x189   : > { %1908 = vadd.xlane.f32.xlu1 %v1907_v8  ;;  %1508 = vmax.xlane.f32.xlu0 %v1507_v54 }
 0x18a   : > { %v6510_v53 = vpop.xlane.xlu1 %1466  ;;  %v1197_v63 = vpop.f32.mrf.mxu0  ;;  %2223 = vmatmul.bf16.gmra.mxu3 %v2089_v59  ;;  %v2593_v52 = vsel %vm1036_vm0, %v2373_v33, 0 }
 0x18b   : > { %8706 = vst [vmem:[#allocation15_spill] sm:$0xff] %v6510_v53  ;;  %v1682_v55 = vsub.f32 %v6256_v17, %v6510_v53  ;;  %v1683_v4 = vsub.f32 %v6260_v23, %v6510_v53  ;;  %v6518_v5 = vsel %vm6154_vm3, %v1197_v63, -3.4028235e+38  ;;  %v1286_v21 = vpop.f32.mrf.mxu1  ;;  %2692 = vmatpush.bf16.xpose.msrb.mxu3 %v2593_v52 }
 0x18c   : > { %v6525_v26 = vsel %vm6158_vm4, %v1286_v21, -3.4028235e+38 }
 0x18d   : > { %v1760_v62 = vmul.f32 1.442695, %v1682_v55  ;;  %v1762_v28 = vmul.f32 1.442695, %v1683_v4  ;;  %v5372_v17 = vpop.eup %5371  ;;  %v1510_v23 = vmax.f32 %v6518_v5, %v6525_v26 }
 0x18e   : > { %v5374_v43 = vpop.eup %5373 }
 0x18f   : > { %5375 = vpow2.f32 %v1760_v62  ;;  %v1910_v50 = vadd.f32 %v5374_v43, %v5372_v17 }
 0x190   : > { %5377 = vpow2.f32 %v1762_v28 }
 0x191   : > { %1511 = vmax.xlane.f32.xlu1 %v1510_v23  ;;  %1911 = vadd.xlane.f32.xlu2 %v1910_v50 }
 0x192   : > { %v6532_v38 = vpop.xlane.xlu2 %1469  ;;  %v1199_v54 = vpop.f32.mrf.mxu0 }
 0x193   : > { %8707 = vst [vmem:[#allocation16_spill] sm:$0xff] %v6532_v38  ;;  %v1684_v58 = vsub.f32 %v6268_v27, %v6532_v38  ;;  %v1685_v6 = vsub.f32 %v6272_v30, %v6532_v38  ;;  %v6540_v8 = vsel %vm6154_vm3, %v1199_v54, -3.4028235e+38  ;;  %v1288_v59 = vpop.f32.mrf.mxu1  ;;  %v5106_v38 = vld [vmem:[%s6288_s24 + $0x118] sm:$0xff] }
 0x194   : > { %v6544_v63 = vsel %vm6158_vm4, %v1288_v59, -3.4028235e+38 }
 0x195   : > { %v1764_v55 = vmul.f32 1.442695, %v1684_v58  ;;  %v1766_v4 = vmul.f32 1.442695, %v1685_v6  ;;  %v5376_v21 = vpop.eup %5375  ;;  %v1513_v20 = vmax.f32 %v6540_v8, %v6544_v63 }
 0x196   : > { %v5378_v25 = vpop.eup %5377  ;;  %v2090_v27 = vpack.c.bf16 %v5376_v21, %v5372_v17 }
 0x197   : > { %5379 = vpow2.f32 %v1764_v55  ;;  %v1913_v45 = vadd.f32 %v5378_v25, %v5376_v21  ;;  %v2091_v30 = vpack.c.bf16 %v5378_v25, %v5374_v43 }
 0x198   : > { %5381 = vpow2.f32 %v1766_v4  ;;  %2139 = vmatmul.bf16.gmra.mxu2 %v2090_v27 }
 0x199   : > { %1914 = vadd.xlane.f32.xlu0 %v1913_v45  ;;  %1514 = vmax.xlane.f32.xlu2 %v1513_v20 }
 0x19a   : > { %v6548_v49 = vpop.xlane.xlu0 %1472  ;;  %v1202_v29 = vpop.f32.mrf.mxu0  ;;  %2228 = vmatmul.bf16.gmra.mxu3 %v2091_v30 }
 0x19b   : > { %8708 = vst [vmem:[#allocation17_spill] sm:$0xff] %v6548_v49  ;;  %v1686_v62 = vsub.f32 %v6282_v40, %v6548_v49  ;;  %v1687_v28 = vsub.f32 %v6292_v44, %v6548_v49  ;;  %v6556_v17 = vsel %vm6154_vm3, %v1202_v29, -3.4028235e+38  ;;  %v1291_v23 = vpop.f32.mrf.mxu1  ;;  %v5114_v49 = vld [vmem:[%s6288_s24 + $0x158] sm:$0xff] }
 0x19c   : > { %v6560_v31 = vsel %vm6158_vm4, %v1291_v23, -3.4028235e+38 }
 0x19d   : > { %v1768_v33 = vmul.f32 1.442695, %v1686_v62  ;;  %v1770_v43 = vmul.f32 1.442695, %v1687_v28  ;;  %v5380_v50 = vpop.eup %5379  ;;  %v1516_v52 = vmax.f32 %v6556_v17, %v6560_v31 }
 0x19e   : > { %v5382_v54 = vpop.eup %5381 }
 0x19f   : > { %5383 = vpow2.f32 %v1768_v33  ;;  %v1916_v40 = vadd.f32 %v5382_v54, %v5380_v50 }
 0x1a0   : > { %5385 = vpow2.f32 %v1770_v43 }
 0x1a1   : > { %1917 = vadd.xlane.f32.xlu1 %v1916_v40  ;;  %1517 = vmax.xlane.f32.xlu0 %v1516_v52  ;;  %v5079_v52 = vld [vmem:[%s6034_s7 + $0x140] sm:$0xff] }
 0x1a2   : > { %v6564_v44 = vpop.xlane.xlu1 %1475  ;;  %v1204_v58 = vpop.f32.mrf.mxu0  ;;  %v5095_v40 = vld [vmem:[%s6034_s7 + $0x1c0] sm:$0xff] }
 0x1a3   : > { %8709 = vst [vmem:[#allocation18_spill] sm:$0xff] %v6564_v44  ;;  %v1688_v6 = vsub.f32 %v6307_v61, %v6564_v44  ;;  %v1689_v59 = vsub.f32 %v6312_v3, %v6564_v44  ;;  %v6572_v55 = vsel %vm6154_vm3, %v1204_v58, -3.4028235e+38  ;;  %v1293_v4 = vpop.f32.mrf.mxu1  ;;  %v5130_v44 = vld [vmem:[%s6288_s24 + $0x1d8] sm:$0xff] }
 0x1a4   : > { %v6576_v21 = vsel %vm6158_vm4, %v1293_v4, -3.4028235e+38 }
 0x1a5   : > { %v1772_v20 = vmul.f32 1.442695, %v1688_v6  ;;  %v1774_v25 = vmul.f32 1.442695, %v1689_v59  ;;  %v5384_v27 = vpop.eup %5383  ;;  %v1519_v45 = vmax.f32 %v6572_v55, %v6576_v21  ;;  %v5096_v59 = vld [vmem:[%s6034_s7 + $0x1c8] sm:$0xff] }
 0x1a6   : > { %v5386_v30 = vpop.eup %5385  ;;  %v2092_v61 = vpack.c.bf16 %v5384_v27, %v5380_v50 }
 0x1a7   : > { %5387 = vpow2.f32 %v1772_v20  ;;  %v2093_v3 = vpack.c.bf16 %v5386_v30, %v5382_v54  ;;  %v1919_v29 = vadd.f32 %v5386_v30, %v5384_v27  ;;  %v5080_v54 = vld [vmem:[%s6034_s7 + $0x148] sm:$0xff]  ;;  %v2372_v27 = vpack.c.bf16 %v5096_v59, %v5095_v40 }
 0x1a8   : > { %5389 = vpow2.f32 %v1774_v25  ;;  %2144 = vmatmul.bf16.gmra.mxu2 %v2092_v61  ;;  %v2364_v6 = vpack.c.bf16 %v5080_v54, %v5079_v52 }
 0x1a9   : > { %1520 = vmax.xlane.f32.xlu1 %v1519_v45  ;;  %1920 = vadd.xlane.f32.xlu2 %v1919_v29  ;;  %v2590_v61 = vsel %vm1036_vm0, %v2372_v27, 0 }
 0x1aa   : > { %v6580_v62 = vpop.xlane.xlu2 %1478  ;;  %v1207_v28 = vpop.f32.mrf.mxu0  ;;  %2233 = vmatmul.bf16.gmra.mxu3 %v2093_v3  ;;  %v2566_v25 = vsel %vm1036_vm0, %v2364_v6, 0 }
 0x1ab   : > { %8710 = vst [vmem:[#allocation19_spill] sm:$0xff] %v6580_v62  ;;  %v1690_v23 = vsub.f32 %v6324_v18, %v6580_v62  ;;  %v1691_v33 = vsub.f32 %v6328_v22, %v6580_v62  ;;  %v6588_v43 = vsel %vm6154_vm3, %v1207_v28, -3.4028235e+38  ;;  %v1296_v50 = vpop.f32.mrf.mxu1  ;;  %2604 = vmatpush.bf16.xpose.msrb.mxu2 %v2566_v25  ;;  %2693 = vmatpush.bf16.xpose.msrb.mxu3 %v2590_v61  ;;  %v5131_v62 = vld [vmem:[%s6288_s24 + $0x1e0] sm:$0xff] }
 0x1ac   : > { %v6595_v58 = vsel %vm6158_vm4, %v1296_v50, -3.4028235e+38 }
 0x1ad   : > { %v1776_v4 = vmul.f32 1.442695, %v1690_v23  ;;  %v1778_v20 = vmul.f32 1.442695, %v1691_v33  ;;  %v5388_v18 = vpop.eup %5387  ;;  %v1522_v22 = vmax.f32 %v6588_v43, %v6595_v58 }
 0x1ae   : > { %v5390_v45 = vpop.eup %5389 }
 0x1af   : > { %5391 = vpow2.f32 %v1776_v4  ;;  %v1922_v30 = vadd.f32 %v5390_v45, %v5388_v18 }
 0x1b0   : > { %5393 = vpow2.f32 %v1778_v20 }
 0x1b1   : > { %1923 = vadd.xlane.f32.xlu0 %v1922_v30  ;;  %1523 = vmax.xlane.f32.xlu2 %v1522_v22 }
 0x1b2   : > { %v6602_v3 = vpop.xlane.xlu0 %1481  ;;  %v1209_v29 = vpop.f32.mrf.mxu0 }
 0x1b3   : > { %8711 = vst [vmem:[#allocation20_spill] sm:$0xff] %v6602_v3  ;;  %v1692_v28 = vsub.f32 %v6342_v48, %v6602_v3  ;;  %v1693_v23 = vsub.f32 %v6346_v51, %v6602_v3  ;;  %v6610_v33 = vsel %vm6154_vm3, %v1209_v29, -3.4028235e+38  ;;  %v1298_v50 = vpop.f32.mrf.mxu1 }
 0x1b4   : > { %v6614_v52 = vsel %vm6158_vm4, %v1298_v50, -3.4028235e+38 }
 0x1b5   : > { %v1780_v54 = vmul.f32 1.442695, %v1692_v28  ;;  %v1782_v40 = vmul.f32 1.442695, %v1693_v23  ;;  %v5392_v6 = vpop.eup %5391  ;;  %v1525_v59 = vmax.f32 %v6610_v33, %v6614_v52 }
 0x1b6   : > { %v5394_v4 = vpop.eup %5393  ;;  %v2094_v48 = vpack.c.bf16 %v5392_v6, %v5388_v18 }
 0x1b7   : > { %5395 = vpow2.f32 %v1780_v54  ;;  %v1925_v20 = vadd.f32 %v5394_v4, %v5392_v6  ;;  %v2095_v51 = vpack.c.bf16 %v5394_v4, %v5390_v45 }
 0x1b8   : > { %5397 = vpow2.f32 %v1782_v40  ;;  %2149 = vmatmul.bf16.gmra.mxu2 %v2094_v48 }
 0x1b9   : > { %1926 = vadd.xlane.f32.xlu1 %v1925_v20  ;;  %1526 = vmax.xlane.f32.xlu0 %v1525_v59 }
 0x1ba   : > { %v6618_v22 = vpop.xlane.xlu1 %1484  ;;  %v1212_v25 = vpop.f32.mrf.mxu0  ;;  %2238 = vmatmul.bf16.gmra.mxu3 %v2095_v51 }
 0x1bb   : > { %8712 = vst [vmem:[#allocation21_spill] sm:$0xff] %v6618_v22  ;;  %v1694_v27 = vsub.f32 %v6362_v10, %v6618_v22  ;;  %v1695_v30 = vsub.f32 %v6366_v12, %v6618_v22  ;;  %v6626_v18 = vsel %vm6154_vm3, %v1212_v25, -3.4028235e+38  ;;  %v1301_v61 = vpop.f32.mrf.mxu1  ;;  %v5118_v22 = vld [vmem:[%s6288_s24 + $0x178] sm:$0xff] }
 0x1bc   : > { %v6630_v45 = vsel %vm6158_vm4, %v1301_v61, -3.4028235e+38 }
 0x1bd   : > { %v1784_v29 = vmul.f32 1.442695, %v1694_v27  ;;  %v1786_v28 = vmul.f32 1.442695, %v1695_v30  ;;  %v5396_v23 = vpop.eup %5395  ;;  %v1528_v50 = vmax.f32 %v6626_v18, %v6630_v45 }
 0x1be   : > { %v5398_v54 = vpop.eup %5397 }
 0x1bf   : > { %5399 = vpow2.f32 %v1784_v29  ;;  %v1928_v10 = vadd.f32 %v5398_v54, %v5396_v23 }
 0x1c0   : > { %5401 = vpow2.f32 %v1786_v28 }
 0x1c1   : > { %1529 = vmax.xlane.f32.xlu1 %v1528_v50  ;;  %1929 = vadd.xlane.f32.xlu2 %v1928_v10 }
 0x1c2   : > { %v6634_v12 = vpop.xlane.xlu2 %1487  ;;  %v1214_v40 = vpop.f32.mrf.mxu0 }
 0x1c3   : > { %8713 = vst [vmem:[#allocation22_spill] sm:$0xff] %v6634_v12  ;;  %v1696_v6 = vsub.f32 %v6376_v34, %v6634_v12  ;;  %v1697_v59 = vsub.f32 %v6383_v42, %v6634_v12  ;;  %v6642_v4 = vsel %vm6154_vm3, %v1214_v40, -3.4028235e+38  ;;  %v1303_v48 = vpop.f32.mrf.mxu1 }
 0x1c4   : > { %v6646_v20 = vsel %vm6158_vm4, %v1303_v48, -3.4028235e+38 }
 0x1c5   : > { %v1788_v51 = vmul.f32 1.442695, %v1696_v6  ;;  %v1790_v25 = vmul.f32 1.442695, %v1697_v59  ;;  %v5400_v27 = vpop.eup %5399  ;;  %v1531_v30 = vmax.f32 %v6642_v4, %v6646_v20 }
 0x1c6   : > { %v5402_v61 = vpop.eup %5401  ;;  %v2096_v34 = vpack.c.bf16 %v5400_v27, %v5396_v23 }
 0x1c7   : > { %5403 = vpow2.f32 %v1788_v51  ;;  %v1931_v29 = vadd.f32 %v5402_v61, %v5400_v27  ;;  %v2097_v42 = vpack.c.bf16 %v5402_v61, %v5398_v54  ;;  %v5093_v61 = vld [vmem:[%s6034_s7 + $0x1b0] sm:$0xff] }
 0x1c8   : > { %5405 = vpow2.f32 %v1790_v25  ;;  %2154 = vmatmul.bf16.gmra.mxu2 %v2096_v34 }
 0x1c9   : > { %1932 = vadd.xlane.f32.xlu0 %v1931_v29  ;;  %1532 = vmax.xlane.f32.xlu2 %v1531_v30  ;;  %v5078_v30 = vld [vmem:[%s6034_s7 + $0x138] sm:$0xff] }
 0x1ca   : > { %v6650_v28 = vpop.xlane.xlu0 %1490  ;;  %v1217_v50 = vpop.f32.mrf.mxu0  ;;  %2243 = vmatmul.bf16.gmra.mxu3 %v2097_v42 }
 0x1cb   : > { %8714 = vst [vmem:[#allocation23_spill] sm:$0xff] %v6650_v28  ;;  %v1698_v10 = vsub.f32 %v6400_v60, %v6650_v28  ;;  %v1699_v23 = vsub.f32 %v6404_v0, %v6650_v28  ;;  %v6658_v54 = vsel %vm6154_vm3, %v1217_v50, -3.4028235e+38  ;;  %v1306_v40 = vpop.f32.mrf.mxu1  ;;  %v5077_v0 = vld [vmem:[%s6034_s7 + $0x130] sm:$0xff]  ;;  %v5094_v50 = vld [vmem:[%s6034_s7 + $0x1b8] sm:$0xff] }
 0x1cc   : > { %v6662_v6 = vsel %vm6158_vm4, %v1306_v40, -3.4028235e+38  ;;  %v2363_v42 = vpack.c.bf16 %v5078_v30, %v5077_v0 }
 0x1cd   : > { %v1792_v59 = vmul.f32 1.442695, %v1698_v10  ;;  %v1794_v48 = vmul.f32 1.442695, %v1699_v23  ;;  %v5404_v51 = vpop.eup %5403  ;;  %v1534_v25 = vmax.f32 %v6658_v54, %v6662_v6 }
 0x1ce   : > { %v5406_v60 = vpop.eup %5405 }
 0x1cf   : > { %5407 = vpow2.f32 %v1792_v59  ;;  %v1934_v27 = vadd.f32 %v5406_v60, %v5404_v51 }
 0x1d0   : > { %5409 = vpow2.f32 %v1794_v48 }
 0x1d1   : > { %1935 = vadd.xlane.f32.xlu1 %v1934_v27  ;;  %1535 = vmax.xlane.f32.xlu0 %v1534_v25  ;;  %v2563_v25 = vsel %vm1036_vm0, %v2363_v42, 0  ;;  %v2371_v27 = vpack.c.bf16 %v5094_v50, %v5093_v61 }
 0x1d2   : > { %v6669_v34 = vpop.xlane.xlu1 %1493  ;;  %v1219_v29 = vpop.f32.mrf.mxu0  ;;  %2605 = vmatpush.bf16.xpose.msrb.mxu2 %v2563_v25 }
 0x1d3   : > { %8715 = vst [vmem:[#allocation24_spill] sm:$0xff] %v6669_v34  ;;  %v1700_v10 = vsub.f32 %v6416_v11, %v6669_v34  ;;  %v1701_v23 = vsub.f32 %v6420_v14, %v6669_v34  ;;  %v6678_v40 = vsel %vm6154_vm3, %v1219_v29, -3.4028235e+38  ;;  %v1308_v59 = vpop.f32.mrf.mxu1  ;;  %v2587_v29 = vsel %vm1036_vm0, %v2371_v27, 0 }
 0x1d4   : > { %v6682_v48 = vsel %vm6158_vm4, %v1308_v59, -3.4028235e+38  ;;  %v6685_v28 = vpop.xlane.xlu2 %1893  ;;  %2694 = vmatpush.bf16.xpose.msrb.mxu3 %v2587_v29 }
 0x1d5   : > { %v1796_v0 = vmul.f32 1.442695, %v1700_v10  ;;  %v1798_v30 = vmul.f32 1.442695, %v1701_v23  ;;  %8716 = vst [vmem:[#allocation25_spill] sm:$0xff] %v6685_v28  ;;  %v5408_v11 = vpop.eup %5407  ;;  %v1537_v14 = vmax.f32 %v6678_v40, %v6682_v48 }
 0x1d6   : > { %v5410_v12 = vpop.eup %5409  ;;  %v2098_v3 = vpack.c.bf16 %v5408_v11, %v5404_v51 }
 0x1d7   : > { %5411 = vpow2.f32 %v1796_v0  ;;  %v2099_v59 = vpack.c.bf16 %v5410_v12, %v5406_v60  ;;  %v1937_v34 = vadd.f32 %v5410_v12, %v5408_v11 }
 0x1d8   : > { %5413 = vpow2.f32 %v1798_v30  ;;  %2159 = vmatmul.bf16.gmra.mxu2 %v2098_v3 }
 0x1d9   : > { %1538 = vmax.xlane.f32.xlu1 %v1537_v14  ;;  %1938 = vadd.xlane.f32.xlu2 %v1937_v34 }
 0x1da   : > { %2248 = vmatmul.bf16.gmra.mxu3 %v2099_v59 }
 0x1dc   : > { %v6690_v61 = vpop.xlane.xlu2 %1496 }
 0x1dd   : > { %8717 = vst [vmem:[#allocation26_spill] sm:$0xff] %v6690_v61  ;;  %v5412_v42 = vpop.eup %5411  ;;  %v1702_v50 = vsub.f32 %v6432_v37, %v6690_v61  ;;  %v1703_v10 = vsub.f32 %v6436_v41, %v6690_v61  ;;  %v6696_v23 = vpop.xlane.xlu0 %1896 }
 0x1de   : > { %8718 = vst [vmem:[#allocation27_spill] sm:$0xff] %v6696_v23  ;;  %v5414_v51 = vpop.eup %5413 }
 0x1df   : > { %v1800_v25 = vmul.f32 1.442695, %v1702_v50  ;;  %v1802_v60 = vmul.f32 1.442695, %v1703_v10  ;;  %v1940_v12 = vadd.f32 %v5414_v51, %v5412_v42 }
 0x1e1   : > { %1941 = vadd.xlane.f32.xlu0 %v1940_v12  ;;  %5415 = vpow2.f32 %v1800_v25 }
 0x1e2   : > { %5417 = vpow2.f32 %v1802_v60 }
 0x1e4   : > { %v6698_v3 = vpop.xlane.xlu1 %1899 }
 0x1e5   : > { %8719 = vst [vmem:[#allocation28_spill] sm:$0xff] %v6698_v3  ;;  %v6700_v34 = vpop.xlane.xlu0 %1499 }
 0x1e6   : > { %8720 = vst [vmem:[#allocation29_spill] sm:$0xff] %v6700_v34  ;;  %v1704_v27 = vsub.f32 %v6451_v7, %v6700_v34  ;;  %v1705_v37 = vsub.f32 %v6455_v9, %v6700_v34 }
 0x1e7   : > { %v5416_v41 = vpop.eup %5415 }
 0x1e8   : > { %v1804_v0 = vmul.f32 1.442695, %v1704_v27  ;;  %v1806_v30 = vmul.f32 1.442695, %v1705_v37  ;;  %v5418_v11 = vpop.eup %5417  ;;  %v2100_v14 = vpack.c.bf16 %v5416_v41, %v5412_v42  ;;  %v5075_v27 = vld [vmem:[%s6034_s7 + $0x120] sm:$0xff]  ;;  %v5076_v37 = vld [vmem:[%s6034_s7 + $0x128] sm:$0xff] }
 0x1e9   : > { %v1943_v29 = vadd.f32 %v5418_v11, %v5416_v41  ;;  %v2101_v59 = vpack.c.bf16 %v5418_v11, %v5414_v51  ;;  %v5091_v41 = vld [vmem:[%s6034_s7 + $0x1a0] sm:$0xff]  ;;  %v5092_v11 = vld [vmem:[%s6034_s7 + $0x1a8] sm:$0xff] }
 0x1ea   : > { %5419 = vpow2.f32 %v1804_v0  ;;  %2164 = vmatmul.bf16.gmra.mxu2 %v2100_v14 }
 0x1eb   : > { %v2125_v50 = vpop.f32.mrf.mxu2  ;;  %5421 = vpow2.f32 %v1806_v30  ;;  %1944 = vadd.xlane.f32.xlu1 %v1943_v29  ;;  %2253 = vmatmul.bf16.gmra.mxu3 %v2101_v59  ;;  %v2362_v30 = vpack.c.bf16 %v5076_v37, %v5075_v27  ;;  %v2370_v29 = vpack.c.bf16 %v5092_v11, %v5091_v41 }
 0x1ec   : > { %v6706_v7 = vpop.xlane.xlu1 %1502  ;;  %v6708_v9 = vpop.xlane.xlu2 %1902 }
 0x1ed   : > { %8721 = vst [vmem:[#allocation30_spill] sm:$0xff] %v6706_v7  ;;  %v1706_v10 = vsub.f32 %v6470_v47, %v6706_v7  ;;  %v1707_v42 = vsub.f32 %v6474_v36, %v6706_v7  ;;  %v2214_v51 = vpop.f32.mrf.mxu3  ;;  %v2560_v34 = vsel %vm1036_vm0, %v2362_v30, 0 }
 0x1ee   : > { %8722 = vst [vmem:[#allocation31_spill] sm:$0xff] %v6708_v9  ;;  %v6714_v25 = vadd.f32 %v2214_v51, %v2125_v50  ;;  %2606 = vmatpush.bf16.xpose.msrb.mxu2 %v2560_v34 }
 0x1ef   : > { %v1808_v60 = vmul.f32 1.442695, %v1706_v10  ;;  %v1810_v12 = vmul.f32 1.442695, %v1707_v42  ;;  %v2584_v10 = vsel %vm1036_vm0, %v2370_v29, 0 }
 0x1f0   : > { %8723 = vst [vmem:[#allocation32_spill] sm:$0xff] %v6714_v25  ;;  %v5420_v0 = vpop.eup %5419  ;;  %2695 = vmatpush.bf16.xpose.msrb.mxu3 %v2584_v10 }
 0x1f1   : > { %v5422_v14 = vpop.eup %5421  ;;  %5423 = vpow2.f32 %v1808_v60 }
 0x1f2   : > { %5425 = vpow2.f32 %v1810_v12  ;;  %v1946_v59 = vadd.f32 %v5422_v14, %v5420_v0 }
 0x1f3   : > { %v2127_v47 = vpop.f32.mrf.mxu2 }
 0x1f4   : > { %v6721_v36 = vpop.xlane.xlu2 %1505  ;;  %v6723_v50 = vpop.xlane.xlu0 %1905  ;;  %1947 = vadd.xlane.f32.xlu2 %v1946_v59 }
 0x1f5   : > { %8724 = vst [vmem:[#allocation33_spill] sm:$0xff] %v6721_v36  ;;  %v1708_v42 = vsub.f32 %v6486_v13, %v6721_v36  ;;  %v1709_v51 = vsub.f32 %v6490_v24, %v6721_v36  ;;  %v2216_v60 = vpop.f32.mrf.mxu3 }
 0x1f6   : > { %8725 = vst [vmem:[#allocation34_spill] sm:$0xff] %v6723_v50  ;;  %v6730_v12 = vadd.f32 %v2216_v60, %v2127_v47  ;;  %v627_v50 = vld [vmem:[%s6060_s10 + $0x1d0] sm:$0xff] }
 0x1f7   : > { %v1812_v27 = vmul.f32 1.442695, %v1708_v42  ;;  %v1814_v37 = vmul.f32 1.442695, %v1709_v51  ;;  %v5424_v41 = vpop.eup %5423 }
 0x1f8   : > { %8726 = vst [vmem:[#allocation35_spill] sm:$0xff] %v6730_v12  ;;  %v5426_v30 = vpop.eup %5425  ;;  %v2102_v11 = vpack.c.bf16 %v5424_v41, %v5420_v0 }
 0x1f9   : > { %5427 = vpow2.f32 %v1812_v27  ;;  %v1949_v34 = vadd.f32 %v5426_v30, %v5424_v41  ;;  %v2103_v61 = vpack.c.bf16 %v5426_v30, %v5422_v14 }
 0x1fa   : > { %5429 = vpow2.f32 %v1814_v37  ;;  %2169 = vmatmul.bf16.gmra.mxu2 %v2102_v11 }
 0x1fb   : > { %v2130_v29 = vpop.f32.mrf.mxu2  ;;  %1950 = vadd.xlane.f32.xlu0 %v1949_v34  ;;  %2258 = vmatmul.bf16.gmra.mxu3 %v2103_v61 }
 0x1fc   : > { %v6732_v13 = vpop.xlane.xlu1 %1908  ;;  %v6734_v24 = vpop.xlane.xlu0 %1508 }
 0x1fd   : > { %8727 = vst [vmem:[#allocation36_spill] sm:$0xff] %v6732_v13  ;;  %v2219_v59 = vpop.f32.mrf.mxu3  ;;  %v1710_v47 = vsub.f32 %v6502_v39, %v6734_v24  ;;  %v1711_v10 = vsub.f32 %v6506_v46, %v6734_v24 }
 0x1fe   : > { %8728 = vst [vmem:[#allocation37_spill] sm:$0xff] %v6734_v24  ;;  %v6740_v0 = vadd.f32 %v2219_v59, %v2130_v29 }
 0x1ff   : > { %v1816_v42 = vmul.f32 1.442695, %v1710_v47  ;;  %v1818_v14 = vmul.f32 1.442695, %v1711_v10  ;;  %v5428_v51 = vpop.eup %5427 }
 0x200   : > { %8729 = vst [vmem:[#allocation38_spill] sm:$0xff] %v6740_v0  ;;  %v5430_v60 = vpop.eup %5429 }
 0x201   : > { %5431 = vpow2.f32 %v1816_v42  ;;  %v1952_v27 = vadd.f32 %v5430_v60, %v5428_v51 }
 0x202   : > { %5433 = vpow2.f32 %v1818_v14 }
 0x203   : > { %v2132_v61 = vpop.f32.mrf.mxu2  ;;  %1953 = vadd.xlane.f32.xlu1 %v1952_v27 }
 0x204   : > { %v6742_v37 = vpop.xlane.xlu1 %1511  ;;  %v6744_v41 = vpop.xlane.xlu2 %1911 }
 0x205   : > { %8730 = vst [vmem:[#allocation39_spill] sm:$0xff] %v6742_v37  ;;  %v1712_v39 = vsub.f32 %v6518_v5, %v6742_v37  ;;  %v1713_v46 = vsub.f32 %v6525_v26, %v6742_v37  ;;  %v2221_v30 = vpop.f32.mrf.mxu3 }
 0x206   : > { %8731 = vst [vmem:[#allocation40_spill] sm:$0xff] %v6744_v41  ;;  %v6750_v11 = vadd.f32 %v2221_v30, %v2132_v61 }
 0x207   : > { %v1820_v34 = vmul.f32 1.442695, %v1712_v39  ;;  %v1822_v29 = vmul.f32 1.442695, %v1713_v46  ;;  %v5432_v59 = vpop.eup %5431 }
 0x208   : > { %8732 = vst [vmem:[#allocation41_spill] sm:$0xff] %v6750_v11  ;;  %v5434_v47 = vpop.eup %5433  ;;  %v2104_v10 = vpack.c.bf16 %v5432_v59, %v5428_v51 }
 0x209   : > { %5435 = vpow2.f32 %v1820_v34  ;;  %v2105_v42 = vpack.c.bf16 %v5434_v47, %v5430_v60  ;;  %v1955_v14 = vadd.f32 %v5434_v47, %v5432_v59  ;;  %v5074_v59 = vld [vmem:[%s6034_s7 + $0x118] sm:$0xff]  ;;  %v5089_v47 = vld [vmem:[%s6034_s7 + $0x190] sm:$0xff] }
 0x20a   : > { %5437 = vpow2.f32 %v1822_v29  ;;  %2174 = vmatmul.bf16.gmra.mxu2 %v2104_v10  ;;  %v5073_v29 = vld [vmem:[%s6034_s7 + $0x110] sm:$0xff] }
 0x20b   : > { %v2135_v5 = vpop.f32.mrf.mxu2  ;;  %2263 = vmatmul.bf16.gmra.mxu3 %v2105_v42  ;;  %1956 = vadd.xlane.f32.xlu2 %v1955_v14  ;;  %v2361_v42 = vpack.c.bf16 %v5074_v59, %v5073_v29  ;;  %v5090_v14 = vld [vmem:[%s6034_s7 + $0x198] sm:$0xff] }
 0x20c   : > { %v6752_v26 = vpop.xlane.xlu2 %1514  ;;  %v6754_v27 = vpop.xlane.xlu0 %1914  ;;  %v2369_v36 = vpack.c.bf16 %v5090_v14, %v5089_v47 }
 0x20d   : > { %8733 = vst [vmem:[#allocation42_spill] sm:$0xff] %v6752_v26  ;;  %v2224_v61 = vpop.f32.mrf.mxu3  ;;  %v1714_v51 = vsub.f32 %v6540_v8, %v6752_v26  ;;  %v1715_v60 = vsub.f32 %v6544_v63, %v6752_v26  ;;  %v2557_v8 = vsel %vm1036_vm0, %v2361_v42, 0 }
 0x20e   : > { %8734 = vst [vmem:[#allocation43_spill] sm:$0xff] %v6754_v27  ;;  %v6760_v39 = vadd.f32 %v2224_v61, %v2135_v5  ;;  %2607 = vmatpush.bf16.xpose.msrb.mxu2 %v2557_v8  ;;  %v2581_v61 = vsel %vm1036_vm0, %v2369_v36, 0 }
 0x20f   : > { %v1824_v46 = vmul.f32 1.442695, %v1714_v51  ;;  %v1826_v30 = vmul.f32 1.442695, %v1715_v60  ;;  %v5436_v34 = vpop.eup %5435  ;;  %2696 = vmatpush.bf16.xpose.msrb.mxu3 %v2581_v61 }
 0x210   : > { %8735 = vst [vmem:[#allocation44_spill] sm:$0xff] %v6760_v39  ;;  %v5438_v10 = vpop.eup %5437 }
 0x211   : > { %5439 = vpow2.f32 %v1824_v46  ;;  %v1958_v24 = vadd.f32 %v5438_v10, %v5436_v34 }
 0x212   : > { %5441 = vpow2.f32 %v1826_v30 }
 0x213   : > { %v2137_v37 = vpop.f32.mrf.mxu2  ;;  %1959 = vadd.xlane.f32.xlu0 %v1958_v24 }
 0x214   : > { %v6767_v63 = vpop.xlane.xlu1 %1917  ;;  %v6769_v5 = vpop.xlane.xlu0 %1517 }
 0x215   : > { %8736 = vst [vmem:[#allocation45_spill] sm:$0xff] %v6767_v63  ;;  %v2226_v51 = vpop.f32.mrf.mxu3  ;;  %v1716_v60 = vsub.f32 %v6556_v17, %v6769_v5  ;;  %v1717_v46 = vsub.f32 %v6560_v31, %v6769_v5  ;;  %v5126_v63 = vld [vmem:[%s6288_s24 + $0x1b8] sm:$0xff] }
 0x216   : > { %8737 = vst [vmem:[#allocation46_spill] sm:$0xff] %v6769_v5  ;;  %v6776_v30 = vadd.f32 %v2226_v51, %v2137_v37 }
 0x217   : > { %v1828_v29 = vmul.f32 1.442695, %v1716_v60  ;;  %v1830_v59 = vmul.f32 1.442695, %v1717_v46  ;;  %v5440_v24 = vpop.eup %5439 }
 0x218   : > { %8738 = vst [vmem:[#allocation47_spill] sm:$0xff] %v6776_v30  ;;  %v5442_v47 = vpop.eup %5441  ;;  %v2106_v42 = vpack.c.bf16 %v5440_v24, %v5436_v34 }
 0x219   : > { %5443 = vpow2.f32 %v1828_v29  ;;  %v1961_v14 = vadd.f32 %v5442_v47, %v5440_v24  ;;  %v2107_v8 = vpack.c.bf16 %v5442_v47, %v5438_v10 }
 0x21a   : > { %5445 = vpow2.f32 %v1830_v59  ;;  %2179 = vmatmul.bf16.gmra.mxu2 %v2106_v42 }
 0x21b   : > { %v2140_v36 = vpop.f32.mrf.mxu2  ;;  %1962 = vadd.xlane.f32.xlu1 %v1961_v14  ;;  %2268 = vmatmul.bf16.gmra.mxu3 %v2107_v8 }
 0x21c   : > { %v6778_v17 = vpop.xlane.xlu1 %1520  ;;  %v6780_v26 = vpop.xlane.xlu2 %1920 }
 0x21d   : > { %8739 = vst [vmem:[#allocation48_spill] sm:$0xff] %v6778_v17  ;;  %v1718_v31 = vsub.f32 %v6572_v55, %v6778_v17  ;;  %v1719_v37 = vsub.f32 %v6576_v21, %v6778_v17  ;;  %v2229_v61 = vpop.f32.mrf.mxu3 }
 0x21e   : > { %8740 = vst [vmem:[#allocation49_spill] sm:$0xff] %v6780_v26  ;;  %v6786_v34 = vadd.f32 %v2229_v61, %v2140_v36 }
 0x21f   : > { %v1832_v51 = vmul.f32 1.442695, %v1718_v31  ;;  %v1834_v10 = vmul.f32 1.442695, %v1719_v37  ;;  %v5444_v60 = vpop.eup %5443 }
 0x220   : > { %8741 = vst [vmem:[#allocation50_spill] sm:$0xff] %v6786_v34  ;;  %v5446_v46 = vpop.eup %5445 }
 0x221   : > { %5447 = vpow2.f32 %v1832_v51  ;;  %v1964_v29 = vadd.f32 %v5446_v46, %v5444_v60 }
 0x222   : > { %5449 = vpow2.f32 %v1834_v10 }
 0x223   : > { %v2142_v59 = vpop.f32.mrf.mxu2  ;;  %1965 = vadd.xlane.f32.xlu2 %v1964_v29 }
 0x224   : > { %v6788_v24 = vpop.xlane.xlu2 %1523  ;;  %v6790_v47 = vpop.xlane.xlu0 %1923 }
 0x225   : > { %8742 = vst [vmem:[#allocation51_spill] sm:$0xff] %v6788_v24  ;;  %v2231_v55 = vpop.f32.mrf.mxu3  ;;  %v1720_v21 = vsub.f32 %v6588_v43, %v6788_v24  ;;  %v1721_v42 = vsub.f32 %v6595_v58, %v6788_v24 }
 0x226   : > { %8743 = vst [vmem:[#allocation52_spill] sm:$0xff] %v6790_v47  ;;  %v6796_v14 = vadd.f32 %v2231_v55, %v2142_v59  ;;  %v5129_v47 = vld [vmem:[%s6288_s24 + $0x1d0] sm:$0xff] }
 0x227   : > { %v1836_v8 = vmul.f32 1.442695, %v1720_v21  ;;  %v1838_v36 = vmul.f32 1.442695, %v1721_v42  ;;  %v5448_v31 = vpop.eup %5447 }
 0x228   : > { %8744 = vst [vmem:[#allocation53_spill] sm:$0xff] %v6796_v14  ;;  %v5450_v37 = vpop.eup %5449  ;;  %v2108_v61 = vpack.c.bf16 %v5448_v31, %v5444_v60  ;;  %v624_v14 = vld [vmem:[%s6060_s10 + $0x1b8] sm:$0xff] }
 0x229   : > { %5451 = vpow2.f32 %v1836_v8  ;;  %v1967_v51 = vadd.f32 %v5450_v37, %v5448_v31  ;;  %v2109_v10 = vpack.c.bf16 %v5450_v37, %v5446_v46  ;;  %v5072_v31 = vld [vmem:[%s6034_s7 + $0x108] sm:$0xff]  ;;  %v5087_v37 = vld [vmem:[%s6034_s7 + $0x180] sm:$0xff] }
 0x22a   : > { %5453 = vpow2.f32 %v1838_v36  ;;  %2184 = vmatmul.bf16.gmra.mxu2 %v2108_v61  ;;  %v5071_v36 = vld [vmem:[%s6034_s7 + $0x100] sm:$0xff] }
 0x22b   : > { %v2145_v29 = vpop.f32.mrf.mxu2  ;;  %1968 = vadd.xlane.f32.xlu0 %v1967_v51  ;;  %2273 = vmatmul.bf16.gmra.mxu3 %v2109_v10  ;;  %v2360_v51 = vpack.c.bf16 %v5072_v31, %v5071_v36  ;;  %v5088_v10 = vld [vmem:[%s6034_s7 + $0x188] sm:$0xff] }
 0x22c   : > { %v6798_v43 = vpop.xlane.xlu1 %1926  ;;  %v6800_v58 = vpop.xlane.xlu0 %1526  ;;  %v2368_v24 = vpack.c.bf16 %v5088_v10, %v5087_v37 }
 0x22d   : > { %8745 = vst [vmem:[#allocation54_spill] sm:$0xff] %v6798_v43  ;;  %v2234_v59 = vpop.f32.mrf.mxu3  ;;  %v1722_v60 = vsub.f32 %v6610_v33, %v6800_v58  ;;  %v1723_v55 = vsub.f32 %v6614_v52, %v6800_v58  ;;  %v2554_v33 = vsel %vm1036_vm0, %v2360_v51, 0 }
 0x22e   : > { %8746 = vst [vmem:[#allocation55_spill] sm:$0xff] %v6800_v58  ;;  %v6806_v46 = vadd.f32 %v2234_v59, %v2145_v29  ;;  %2608 = vmatpush.bf16.xpose.msrb.mxu2 %v2554_v33  ;;  %v2578_v59 = vsel %vm1036_vm0, %v2368_v24, 0 }
 0x22f   : > { %v1840_v21 = vmul.f32 1.442695, %v1722_v60  ;;  %v1842_v42 = vmul.f32 1.442695, %v1723_v55  ;;  %v5452_v8 = vpop.eup %5451  ;;  %2697 = vmatpush.bf16.xpose.msrb.mxu3 %v2578_v59 }
 0x230   : > { %8747 = vst [vmem:[#allocation56_spill] sm:$0xff] %v6806_v46  ;;  %v5454_v61 = vpop.eup %5453 }
 0x231   : > { %5455 = vpow2.f32 %v1840_v21  ;;  %v1970_v5 = vadd.f32 %v5454_v61, %v5452_v8 }
 0x232   : > { %5457 = vpow2.f32 %v1842_v42 }
 0x233   : > { %v2147_v17 = vpop.f32.mrf.mxu2  ;;  %1971 = vadd.xlane.f32.xlu1 %v1970_v5 }
 0x234   : > { %v6813_v52 = vpop.xlane.xlu1 %1529  ;;  %v6815_v29 = vpop.xlane.xlu2 %1929 }
 0x235   : > { %8748 = vst [vmem:[#allocation57_spill] sm:$0xff] %v6813_v52  ;;  %v1724_v60 = vsub.f32 %v6626_v18, %v6813_v52  ;;  %v1725_v55 = vsub.f32 %v6630_v45, %v6813_v52  ;;  %v2236_v21 = vpop.f32.mrf.mxu3 }
 0x236   : > { %8749 = vst [vmem:[#allocation58_spill] sm:$0xff] %v6815_v29  ;;  %v6822_v42 = vadd.f32 %v2236_v21, %v2147_v17 }
 0x237   : > { %v1844_v36 = vmul.f32 1.442695, %v1724_v60  ;;  %v1846_v31 = vmul.f32 1.442695, %v1725_v55  ;;  %v5456_v5 = vpop.eup %5455 }
 0x238   : > { %8750 = vst [vmem:[#allocation59_spill] sm:$0xff] %v6822_v42  ;;  %v5458_v37 = vpop.eup %5457  ;;  %v2110_v51 = vpack.c.bf16 %v5456_v5, %v5452_v8 }
 0x239   : > { %5459 = vpow2.f32 %v1844_v36  ;;  %v2111_v10 = vpack.c.bf16 %v5458_v37, %v5454_v61  ;;  %v1973_v33 = vadd.f32 %v5458_v37, %v5456_v5  ;;  %v601_v36 = vld [vmem:[%s6060_s10 + $0x100] sm:$0xff] }
 0x23a   : > { %5461 = vpow2.f32 %v1846_v31  ;;  %2189 = vmatmul.bf16.gmra.mxu2 %v2110_v51  ;;  %v602_v31 = vld [vmem:[%s6060_s10 + $0x108] sm:$0xff]  ;;  %v665_v37 = vmul.f32 0.125, %v601_v36 }
 0x23b   : > { %v2150_v18 = vpop.f32.mrf.mxu2  ;;  %2278 = vmatmul.bf16.gmra.mxu3 %v2111_v10  ;;  %1974 = vadd.xlane.f32.xlu2 %v1973_v33  ;;  %v666_v51 = vmul.f32 0.125, %v602_v31 }
 0x23c   : > { %v6824_v45 = vpop.xlane.xlu2 %1532  ;;  %v6826_v24 = vpop.xlane.xlu0 %1932  ;;  %v729_v58 = vpack.c.bf16 %v665_v37, %v665_v37 }
 0x23d   : > { %8751 = vst [vmem:[#allocation60_spill] sm:$0xff] %v6824_v45  ;;  %v2239_v17 = vpop.f32.mrf.mxu3  ;;  %v1726_v59 = vsub.f32 %v6642_v4, %v6824_v45  ;;  %v1727_v8 = vsub.f32 %v6646_v20, %v6824_v45  ;;  %v730_v52 = vpack.c.bf16 %v666_v51, %v666_v51  ;;  %v611_v45 = vld [vmem:[%s6060_s10 + $0x150] sm:$0xff] }
 0x23e   : > { %8752 = vst [vmem:[#allocation61_spill] sm:$0xff] %v6826_v24  ;;  %v6832_v61 = vadd.f32 %v2239_v17, %v2150_v18 }
 0x23f   : > { %v1848_v60 = vmul.f32 1.442695, %v1726_v59  ;;  %v1850_v55 = vmul.f32 1.442695, %v1727_v8  ;;  %v5460_v21 = vpop.eup %5459  ;;  %794 = vst.msk [vmem:[#allocation2 + $0x80] sm:$0xf] %vm761_vm1, %v729_v58 }
 0x240   : > { %8753 = vst [vmem:[#allocation62_spill] sm:$0xff] %v6832_v61  ;;  %v5462_v5 = vpop.eup %5461 }
 0x241   : > { %5463 = vpow2.f32 %v1848_v60  ;;  %v1976_v10 = vadd.f32 %v5462_v5, %v5460_v21  ;;  %795 = vst.msk [vmem:[#allocation2 + $0x84] sm:$0xf] %vm761_vm1, %v730_v52 }
 0x242   : > { %5465 = vpow2.f32 %v1850_v55 }
 0x243   : > { %v2152_v33 = vpop.f32.mrf.mxu2  ;;  %1977 = vadd.xlane.f32.xlu0 %v1976_v10 }
 0x244   : > { %v6836_v4 = vpop.xlane.xlu1 %1935  ;;  %v6838_v20 = vpop.xlane.xlu0 %1535 }
 0x245   : > { %8754 = vst [vmem:[#allocation63_spill] sm:$0xff] %v6836_v4  ;;  %v2241_v18 = vpop.f32.mrf.mxu3  ;;  %v1728_v17 = vsub.f32 %v6658_v54, %v6838_v20  ;;  %v1729_v59 = vsub.f32 %v6662_v6, %v6838_v20 }
 0x246   : > { %8755 = vst [vmem:[#allocation64_spill] sm:$0xff] %v6838_v20  ;;  %v6845_v8 = vadd.f32 %v2241_v18, %v2152_v33 }
 0x247   : > { %v1852_v60 = vmul.f32 1.442695, %v1728_v17  ;;  %v1854_v55 = vmul.f32 1.442695, %v1729_v59  ;;  %v5464_v36 = vpop.eup %5463 }
 0x248   : > { %8756 = vst [vmem:[#allocation65_spill] sm:$0xff] %v6845_v8  ;;  %v5466_v31 = vpop.eup %5465  ;;  %v2112_v37 = vpack.c.bf16 %v5464_v36, %v5460_v21  ;;  %v5134_v8 = vld [vmem:[%s6288_s24 + $0x1f8] sm:$0xff] }
 0x249   : > { %5467 = vpow2.f32 %v1852_v60  ;;  %v1979_v51 = vadd.f32 %v5466_v31, %v5464_v36  ;;  %v2113_v10 = vpack.c.bf16 %v5466_v31, %v5462_v5  ;;  %v603_v5 = vld [vmem:[%s6060_s10 + $0x110] sm:$0xff]  ;;  %v604_v60 = vld [vmem:[%s6060_s10 + $0x118] sm:$0xff] }
 0x24a   : > { %5469 = vpow2.f32 %v1854_v55  ;;  %2194 = vmatmul.bf16.gmra.mxu2 %v2112_v37  ;;  %v667_v36 = vmul.f32 0.125, %v603_v5  ;;  %v668_v31 = vmul.f32 0.125, %v604_v60 }
 0x24b   : > { %v2155_v54 = vpop.f32.mrf.mxu2  ;;  %1980 = vadd.xlane.f32.xlu1 %v1979_v51  ;;  %2283 = vmatmul.bf16.gmra.mxu3 %v2113_v10 }
 0x24c   : > { %v6848_v6 = vpop.xlane.xlu1 %1538  ;;  %v731_v10 = vpack.c.bf16 %v667_v36, %v667_v36 }
 0x24d   : > { %8757 = vst [vmem:[#allocation66_spill] sm:$0xff] %v6848_v6  ;;  %v1730_v58 = vsub.f32 %v6678_v40, %v6848_v6  ;;  %v1731_v52 = vsub.f32 %v6682_v48, %v6848_v6  ;;  %v2244_v33 = vpop.f32.mrf.mxu3  ;;  %v732_v40 = vpack.c.bf16 %v668_v31, %v668_v31  ;;  %v605_v31 = vld [vmem:[%s6060_s10 + $0x120] sm:$0xff] }
 0x24e   : > { %v6854_v21 = vadd.f32 %v2244_v33, %v2155_v54  ;;  %796 = vst.msk [vmem:[#allocation2 + $0x88] sm:$0xf] %vm761_vm1, %v731_v10 }
 0x24f   : > { %v1856_v18 = vmul.f32 1.442695, %v1730_v58  ;;  %v1858_v17 = vmul.f32 1.442695, %v1731_v52  ;;  %v5468_v59 = vpop.eup %5467  ;;  %797 = vst.msk [vmem:[#allocation2 + $0x8c] sm:$0xf] %vm761_vm1, %v732_v40 }
 0x250   : > { %8758 = vst [vmem:[#allocation67_spill] sm:$0xff] %v6854_v21  ;;  %v5470_v55 = vpop.eup %5469 }
 0x251   : > { %5471 = vpow2.f32 %v1856_v18  ;;  %v1982_v37 = vadd.f32 %v5470_v55, %v5468_v59 }
 0x252   : > { %5473 = vpow2.f32 %v1858_v17 }
 0x253   : > { %v2157_v51 = vpop.f32.mrf.mxu2  ;;  %1983 = vadd.xlane.f32.xlu2 %v1982_v37  ;;  %v606_v37 = vld [vmem:[%s6060_s10 + $0x128] sm:$0xff] }
 0x254   : > { %v670_v10 = vmul.f32 0.125, %v606_v37 }
 0x255   : > { %v2246_v48 = vpop.f32.mrf.mxu3 }
 0x256   : > { %v6859_v54 = vadd.f32 %v2246_v48, %v2157_v51  ;;  %v669_v51 = vmul.f32 0.125, %v605_v31  ;;  %v734_v40 = vpack.c.bf16 %v670_v10, %v670_v10 }
 0x257   : > { %v5472_v58 = vpop.eup %5471 }
 0x258   : > { %8759 = vst [vmem:[#allocation68_spill] sm:$0xff] %v6859_v54  ;;  %v5474_v52 = vpop.eup %5473  ;;  %v2114_v33 = vpack.c.bf16 %v5472_v58, %v5468_v59  ;;  %v733_v48 = vpack.c.bf16 %v669_v51, %v669_v51 }
 0x259   : > { %v1985_v5 = vadd.f32 %v5474_v52, %v5472_v58  ;;  %v2115_v18 = vpack.c.bf16 %v5474_v52, %v5470_v55  ;;  %799 = vst.msk [vmem:[#allocation2 + $0x94] sm:$0xf] %vm761_vm1, %v734_v40  ;;  %v5255_v58 = vld [vmem:[#allocation2 + $0x80] sm:$0xff] }
 0x25a   : > { %2199 = vmatmul.bf16.gmra.mxu2 %v2114_v33  ;;  %798 = vst.msk [vmem:[#allocation2 + $0x90] sm:$0xf] %vm761_vm1, %v733_v48  ;;  %v5256_v48 = vld [vmem:[#allocation2 + $0x88] sm:$0xff] }
 0x25b   : > { %v2160_v17 = vpop.f32.mrf.mxu2  ;;  %1986 = vadd.xlane.f32.xlu0 %v1985_v5  ;;  %2288 = vmatmul.bf16.gmra.mxu3 %v2115_v18  ;;  %v607_v5 = vld [vmem:[%s6060_s10 + $0x130] sm:$0xff]  ;;  %v608_v18 = vld [vmem:[%s6060_s10 + $0x138] sm:$0xff] }
 0x25c   : > { %v672_v31 = vmul.f32 0.125, %v608_v18 }
 0x25d   : > { %v2249_v60 = vpop.f32.mrf.mxu3 }
 0x25e   : > { %v6862_v36 = vadd.f32 %v2249_v60, %v2160_v17  ;;  %v671_v60 = vmul.f32 0.125, %v607_v5  ;;  %v736_v51 = vpack.c.bf16 %v672_v31, %v672_v31  ;;  %v7068_v26 = vpop.xlane.xlu1 %1944 }
 0x25f   : > { %8782 = vst [vmem:[#allocation91_spill] sm:$0xff] %v7068_v26 }
 0x260   : > { %8760 = vst [vmem:[#allocation69_spill] sm:$0xff] %v6862_v36  ;;  %v735_v37 = vpack.c.bf16 %v671_v60, %v671_v60 }
 0x261   : > { %801 = vst.msk [vmem:[#allocation2 + $0x9c] sm:$0xf] %vm761_vm1, %v736_v51 }
 0x262   : > { %800 = vst.msk [vmem:[#allocation2 + $0x98] sm:$0xf] %vm761_vm1, %v735_v37 }
 0x263   : > { %v2162_v6 = vpop.f32.mrf.mxu2 }
 0x265   : > { %v2251_v59 = vpop.f32.mrf.mxu3 }
 0x266   : > { %v6868_v55 = vadd.f32 %v2251_v59, %v2162_v6 }
 0x268   : > { %8761 = vst [vmem:[#allocation70_spill] sm:$0xff] %v6868_v55  ;;  %v615_v55 = vld [vmem:[%s6060_s10 + $0x170] sm:$0xff] }
 0x269   : > { %v5258_v20 = vld [vmem:[#allocation2 + $0x98] sm:$0xff] }
 0x26a   : > { %5199 = vmatmul.msk.bf16.vlgmr.msrb.gmra.mxu2 %vm1036_vm0, %v5255_v58 }
 0x26b   : > { %5215 = vmatmul.msk.bf16.vlgmr.msrb.gmra.mxu3 %vm1036_vm0, %v5255_v58 }
 0x26d   : > { %v2165_v52 = vpop.f32.mrf.mxu2 }
 0x26e   : > { %v2254_v33 = vpop.f32.mrf.mxu3 }
 0x26f   : > { %v6874_v17 = vadd.f32 %v2254_v33, %v2165_v52  ;;  %v609_v52 = vld [vmem:[%s6060_s10 + $0x140] sm:$0xff]  ;;  %v610_v33 = vld [vmem:[%s6060_s10 + $0x148] sm:$0xff] }
 0x270   : > { %v673_v18 = vmul.f32 0.125, %v609_v52  ;;  %v674_v60 = vmul.f32 0.125, %v610_v33  ;;  %v612_v52 = vld [vmem:[%s6060_s10 + $0x158] sm:$0xff] }
 0x271   : > { %8762 = vst [vmem:[#allocation71_spill] sm:$0xff] %v6874_v17 }
 0x272   : > { %v737_v31 = vpack.c.bf16 %v673_v18, %v673_v18  ;;  %v738_v37 = vpack.c.bf16 %v674_v60, %v674_v60  ;;  %v675_v18 = vmul.f32 0.125, %v611_v45  ;;  %v676_v60 = vmul.f32 0.125, %v612_v52  ;;  %v614_v45 = vld [vmem:[%s6060_s10 + $0x168] sm:$0xff] }
 0x274   : > { %802 = vst.msk [vmem:[#allocation2 + $0xa0] sm:$0xf] %vm761_vm1, %v737_v31  ;;  %v739_v31 = vpack.c.bf16 %v675_v18, %v675_v18 }
 0x275   : > { %v2167_v6 = vpop.f32.mrf.mxu2  ;;  %803 = vst.msk [vmem:[#allocation2 + $0xa4] sm:$0xf] %vm761_vm1, %v738_v37  ;;  %v740_v37 = vpack.c.bf16 %v676_v60, %v676_v60  ;;  %v678_v60 = vmul.f32 0.125, %v614_v45 }
 0x276   : > { %v2256_v10 = vpop.f32.mrf.mxu3  ;;  %804 = vst.msk [vmem:[#allocation2 + $0xa8] sm:$0xf] %vm761_vm1, %v739_v31 }
 0x277   : > { %v6878_v40 = vadd.f32 %v2256_v10, %v2167_v6  ;;  %v5257_v10 = vld [vmem:[#allocation2 + $0x90] sm:$0xff]  ;;  %805 = vst.msk [vmem:[#allocation2 + $0xac] sm:$0xf] %vm761_vm1, %v740_v37  ;;  %v742_v37 = vpack.c.bf16 %v678_v60, %v678_v60 }
 0x279   : > { %8763 = vst [vmem:[#allocation72_spill] sm:$0xff] %v6878_v40 }
 0x27a   : > { %5200 = vmatmul.msk.bf16.gmra.mxu2 %vm1036_vm0, %v5256_v48  ;;  %807 = vst.msk [vmem:[#allocation2 + $0xb4] sm:$0xf] %vm761_vm1, %v742_v37 }
 0x27b   : > { %5216 = vmatmul.msk.bf16.gmra.mxu3 %vm1036_vm0, %v5256_v48 }
 0x27d   : > { %v2170_v59 = vpop.f32.mrf.mxu2 }
 0x27e   : > { %v2259_v58 = vpop.f32.mrf.mxu3 }
 0x27f   : > { %v6884_v5 = vadd.f32 %v2259_v58, %v2170_v59 }
 0x281   : > { %8764 = vst [vmem:[#allocation73_spill] sm:$0xff] %v6884_v5  ;;  %v613_v5 = vld [vmem:[%s6060_s10 + $0x160] sm:$0xff] }
 0x282   : > { %v677_v18 = vmul.f32 0.125, %v613_v5  ;;  %v616_v5 = vld [vmem:[%s6060_s10 + $0x178] sm:$0xff] }
 0x283   : > { %v680_v60 = vmul.f32 0.125, %v616_v5  ;;  %v617_v5 = vld [vmem:[%s6060_s10 + $0x180] sm:$0xff] }
 0x284   : > { %v741_v31 = vpack.c.bf16 %v677_v18, %v677_v18  ;;  %v679_v18 = vmul.f32 0.125, %v615_v55 }
 0x285   : > { %v2172_v51 = vpop.f32.mrf.mxu2  ;;  %v744_v37 = vpack.c.bf16 %v680_v60, %v680_v60  ;;  %v681_v60 = vmul.f32 0.125, %v617_v5 }
 0x286   : > { %v2261_v6 = vpop.f32.mrf.mxu3  ;;  %806 = vst.msk [vmem:[#allocation2 + $0xb0] sm:$0xf] %vm761_vm1, %v741_v31  ;;  %v743_v31 = vpack.c.bf16 %v679_v18, %v679_v18  ;;  %v618_v18 = vld [vmem:[%s6060_s10 + $0x188] sm:$0xff] }
 0x287   : > { %v6888_v48 = vadd.f32 %v2261_v6, %v2172_v51  ;;  %809 = vst.msk [vmem:[#allocation2 + $0xbc] sm:$0xf] %vm761_vm1, %v744_v37 }
 0x288   : > { %808 = vst.msk [vmem:[#allocation2 + $0xb8] sm:$0xf] %vm761_vm1, %v743_v31  ;;  %v745_v31 = vpack.c.bf16 %v681_v60, %v681_v60 }
 0x289   : > { %8765 = vst [vmem:[#allocation74_spill] sm:$0xff] %v6888_v48 }
 0x28a   : > { %5201 = vmatmul.msk.bf16.gmra.mxu2 %vm1036_vm0, %v5257_v10  ;;  %810 = vst.msk [vmem:[#allocation2 + $0xc0] sm:$0xf] %vm761_vm1, %v745_v31 }
 0x28b   : > { %5217 = vmatmul.msk.bf16.gmra.mxu3 %vm1036_vm0, %v5257_v10 }
 0x28d   : > { %v2175_v59 = vpop.f32.mrf.mxu2 }
 0x28e   : > { %v2264_v58 = vpop.f32.mrf.mxu3 }
 0x28f   : > { %v6894_v33 = vadd.f32 %v2264_v58, %v2175_v59 }
 0x291   : > { %8766 = vst [vmem:[#allocation75_spill] sm:$0xff] %v6894_v33 }
 0x295   : > { %v2177_v51 = vpop.f32.mrf.mxu2 }
 0x296   : > { %v2266_v6 = vpop.f32.mrf.mxu3 }
 0x297   : > { %v6898_v10 = vadd.f32 %v2266_v6, %v2177_v51 }
 0x299   : > { %8767 = vst [vmem:[#allocation76_spill] sm:$0xff] %v6898_v10  ;;  %v5259_v10 = vld [vmem:[#allocation2 + $0xa0] sm:$0xff] }
 0x29a   : > { %5202 = vmatmul.msk.bf16.gmra.mxu2 %vm1036_vm0, %v5258_v20 }
 0x29b   : > { %5218 = vmatmul.msk.bf16.gmra.mxu3 %vm1036_vm0, %v5258_v20 }
 0x29d   : > { %v2180_v59 = vpop.f32.mrf.mxu2 }
 0x29e   : > { %v2269_v58 = vpop.f32.mrf.mxu3 }
 0x29f   : > { %v6904_v52 = vadd.f32 %v2269_v58, %v2180_v59 }
 0x2a1   : > { %8768 = vst [vmem:[#allocation77_spill] sm:$0xff] %v6904_v52 }
 0x2a5   : > { %v2182_v51 = vpop.f32.mrf.mxu2 }
 0x2a6   : > { %v2271_v6 = vpop.f32.mrf.mxu3 }
 0x2a7   : > { %v6908_v20 = vadd.f32 %v2271_v6, %v2182_v51 }
 0x2a9   : > { %8769 = vst [vmem:[#allocation78_spill] sm:$0xff] %v6908_v20  ;;  %v5260_v20 = vld [vmem:[#allocation2 + $0xa8] sm:$0xff] }
 0x2aa   : > { %5203 = vmatmul.msk.bf16.gmra.mxu2 %vm1036_vm0, %v5259_v10 }
 0x2ab   : > { %5219 = vmatmul.msk.bf16.gmra.mxu3 %vm1036_vm0, %v5259_v10 }
 0x2ad   : > { %v2185_v59 = vpop.f32.mrf.mxu2 }
 0x2ae   : > { %v2274_v58 = vpop.f32.mrf.mxu3 }
 0x2af   : > { %v6914_v45 = vadd.f32 %v2274_v58, %v2185_v59 }
 0x2b1   : > { %8770 = vst [vmem:[#allocation79_spill] sm:$0xff] %v6914_v45  ;;  %v682_v45 = vmul.f32 0.125, %v618_v18  ;;  %v5262_v18 = vld [vmem:[#allocation2 + $0xb8] sm:$0xff] }
 0x2b3   : > { %v746_v33 = vpack.c.bf16 %v682_v45, %v682_v45 }
 0x2b5   : > { %v2187_v51 = vpop.f32.mrf.mxu2  ;;  %811 = vst.msk [vmem:[#allocation2 + $0xc4] sm:$0xf] %vm761_vm1, %v746_v33 }
 0x2b6   : > { %v2276_v6 = vpop.f32.mrf.mxu3 }
 0x2b7   : > { %v6918_v10 = vadd.f32 %v2276_v6, %v2187_v51  ;;  %v5261_v6 = vld [vmem:[#allocation2 + $0xb0] sm:$0xff] }
 0x2b9   : > { %8771 = vst [vmem:[#allocation80_spill] sm:$0xff] %v6918_v10 }
 0x2ba   : > { %5204 = vmatmul.msk.bf16.gmra.mxu2 %vm1036_vm0, %v5260_v20 }
 0x2bb   : > { %5220 = vmatmul.msk.bf16.gmra.mxu3 %vm1036_vm0, %v5260_v20 }
 0x2bd   : > { %v2190_v59 = vpop.f32.mrf.mxu2 }
 0x2be   : > { %v2279_v58 = vpop.f32.mrf.mxu3 }
 0x2bf   : > { %v6922_v55 = vadd.f32 %v2279_v58, %v2190_v59 }
 0x2c1   : > { %8772 = vst [vmem:[#allocation81_spill] sm:$0xff] %v6922_v55 }
 0x2c5   : > { %v6927_v37 = vpop.f32.mrf.mxu2 }
 0x2c6   : > { %8773 = vst [vmem:[#allocation82_spill] sm:$0xff] %v6927_v37  ;;  %v6930_v51 = vpop.f32.mrf.mxu3 }
 0x2c7   : > { %8774 = vst [vmem:[#allocation83_spill] sm:$0xff] %v6930_v51 }
 0x2ca   : > { %5205 = vmatmul.msk.bf16.gmra.mxu2 %vm1036_vm0, %v5261_v6 }
 0x2cb   : > { %5221 = vmatmul.msk.bf16.gmra.mxu3 %vm1036_vm0, %v5261_v6 }
 0x2cd   : > { %v2195_v20 = vpop.f32.mrf.mxu2 }
 0x2ce   : > { %v2284_v59 = vpop.f32.mrf.mxu3 }
 0x2cf   : > { %v6934_v58 = vadd.f32 %v2284_v59, %v2195_v20  ;;  %v5263_v20 = vld [vmem:[#allocation2 + $0xc0] sm:$0xff] }
 0x2d1   : > { %8775 = vst [vmem:[#allocation84_spill] sm:$0xff] %v6934_v58 }
 0x2d5   : > { %v6936_v5 = vpop.f32.mrf.mxu2 }
 0x2d6   : > { %8776 = vst [vmem:[#allocation85_spill] sm:$0xff] %v6936_v5  ;;  %v6938_v45 = vpop.f32.mrf.mxu3 }
 0x2d7   : > { %8777 = vst [vmem:[#allocation86_spill] sm:$0xff] %v6938_v45 }
 0x2da   : > { %5206 = vmatmul.msk.bf16.gmra.mxu2 %vm1036_vm0, %v5262_v18 }
 0x2db   : > { %5222 = vmatmul.msk.bf16.gmra.mxu3 %vm1036_vm0, %v5262_v18 }
 0x2dd   : > { %v2200_v33 = vpop.f32.mrf.mxu2 }
 0x2de   : > { %v2289_v60 = vpop.f32.mrf.mxu3 }
 0x2df   : > { %v6942_v31 = vadd.f32 %v2289_v60, %v2200_v33 }
 0x2e1   : > { %8778 = vst [vmem:[#allocation87_spill] sm:$0xff] %v6942_v31  ;;  %v619_v31 = vld [vmem:[%s6060_s10 + $0x190] sm:$0xff] }
 0x2e2   : > { %v683_v37 = vmul.f32 0.125, %v619_v31 }
 0x2e4   : > { %v747_v58 = vpack.c.bf16 %v683_v37, %v683_v37 }
 0x2e5   : > { %v6944_v51 = vpop.f32.mrf.mxu2 }
 0x2e6   : > { %8779 = vst [vmem:[#allocation88_spill] sm:$0xff] %v6944_v51  ;;  %v6946_v6 = vpop.f32.mrf.mxu3 }
 0x2e7   : > { %8780 = vst [vmem:[#allocation89_spill] sm:$0xff] %v6946_v6 }
 0x2e8   : > { %812 = vst.msk [vmem:[#allocation2 + $0xc8] sm:$0xf] %vm761_vm1, %v747_v58 }
 0x2ea   : > { %5207 = vmatmul.msk.bf16.gmra.mxu2 %vm1036_vm0, %v5263_v20 }
 0x2eb   : > { %5223 = vmatmul.msk.bf16.gmra.mxu3 %vm1036_vm0, %v5263_v20 }
 0x2ed   : > { %v2610_v59 = vpop.f32.mrf.mxu2 }
 0x2ee   : > { %v6952_v45 = vsel %vm6154_vm3, %v2610_v59, -3.4028235e+38  ;;  %v2699_v18 = vpop.f32.mrf.mxu3 }
 0x2ef   : > { %v6956_v33 = vsel %vm6158_vm4, %v2699_v18, -3.4028235e+38  ;;  %v620_v18 = vld [vmem:[%s6060_s10 + $0x198] sm:$0xff] }
 0x2f0   : > { %v2909_v60 = vmax.f32 %v6952_v45, %v6956_v33  ;;  %v684_v55 = vmul.f32 0.125, %v620_v18 }
 0x2f2   : > { %2910 = vmax.xlane.f32.xlu1 %v2909_v60  ;;  %v748_v60 = vpack.c.bf16 %v684_v55, %v684_v55 }
 0x2f4   : > { %813 = vst.msk [vmem:[#allocation2 + $0xcc] sm:$0xf] %vm761_vm1, %v748_v60  ;;  %v621_v60 = vld [vmem:[%s6060_s10 + $0x1a0] sm:$0xff] }
 0x2f5   : > { %v2612_v6 = vpop.f32.mrf.mxu2  ;;  %v685_v48 = vmul.f32 0.125, %v621_v60 }
 0x2f6   : > { %v6962_v51 = vsel %vm6154_vm3, %v2612_v6, -3.4028235e+38  ;;  %v2701_v20 = vpop.f32.mrf.mxu3 }
 0x2f7   : > { %v6966_v5 = vsel %vm6158_vm4, %v2701_v20, -3.4028235e+38  ;;  %v749_v17 = vpack.c.bf16 %v685_v48, %v685_v48 }
 0x2f8   : > { %v2912_v59 = vmax.f32 %v6962_v51, %v6966_v5 }
 0x2f9   : > { %814 = vst.msk [vmem:[#allocation2 + $0xd0] sm:$0xf] %vm761_vm1, %v749_v17 }
 0x2fa   : > { %2913 = vmax.xlane.f32.xlu2 %v2912_v59 }
 0x2fb   : > { %v5264_v59 = vld [vmem:[#allocation2 + $0xc8] sm:$0xff] }
 0x2fc   : > { %5208 = vmatmul.msk.bf16.gmra.mxu2 %vm1036_vm0, %v5264_v59  ;;  %5224 = vmatmul.msk.bf16.gmra.mxu3 %vm1036_vm0, %v5264_v59 }
 0x2fd   : > { %v2615_v10 = vpop.f32.mrf.mxu2 }
 0x2fe   : > { %v6974_v6 = vsel %vm6154_vm3, %v2615_v10, -3.4028235e+38  ;;  %v2704_v52 = vpop.f32.mrf.mxu3 }
 0x2ff   : > { %v6979_v20 = vsel %vm6158_vm4, %v2704_v52, -3.4028235e+38 }
 0x300   : > { %v2915_v37 = vmax.f32 %v6974_v6, %v6979_v20 }
 0x302   : > { %2916 = vmax.xlane.f32.xlu0 %v2915_v37  ;;  %v622_v37 = vld [vmem:[%s6060_s10 + $0x1a8] sm:$0xff] }
 0x303   : > { %v686_v21 = vmul.f32 0.125, %v622_v37 }
 0x305   : > { %v2617_v55 = vpop.f32.mrf.mxu2  ;;  %v750_v59 = vpack.c.bf16 %v686_v21, %v686_v21 }
 0x306   : > { %v6986_v10 = vsel %vm6154_vm3, %v2617_v55, -3.4028235e+38  ;;  %v2706_v31 = vpop.f32.mrf.mxu3 }
 0x307   : > { %v6990_v58 = vsel %vm6158_vm4, %v2706_v31, -3.4028235e+38  ;;  %815 = vst.msk [vmem:[#allocation2 + $0xd4] sm:$0xf] %vm761_vm1, %v750_v59 }
 0x308   : > { %v2918_v52 = vmax.f32 %v6986_v10, %v6990_v58 }
 0x30a   : > { %2919 = vmax.xlane.f32.xlu1 %v2918_v52 }
 0x30d   : > { %v2620_v18 = vpop.f32.mrf.mxu2 }
 0x30e   : > { %v7000_v55 = vsel %vm6154_vm3, %v2620_v18, -3.4028235e+38  ;;  %v2709_v40 = vpop.f32.mrf.mxu3  ;;  %v5265_v21 = vld [vmem:[#allocation2 + $0xd0] sm:$0xff] }
 0x30f   : > { %v7004_v31 = vsel %vm6158_vm4, %v2709_v40, -3.4028235e+38  ;;  %5209 = vmatmul.msk.bf16.gmra.mxu2 %vm1036_vm0, %v5265_v21  ;;  %5225 = vmatmul.msk.bf16.gmra.mxu3 %vm1036_vm0, %v5265_v21 }
 0x310   : > { %v2921_v36 = vmax.f32 %v7000_v55, %v7004_v31 }
 0x312   : > { %2922 = vmax.xlane.f32.xlu2 %v2921_v36 }
 0x315   : > { %v2622_v52 = vpop.f32.mrf.mxu2 }
 0x316   : > { %v7012_v18 = vsel %vm6154_vm3, %v2622_v52, -3.4028235e+38  ;;  %v2711_v60 = vpop.f32.mrf.mxu3 }
 0x317   : > { %v7016_v40 = vsel %vm6158_vm4, %v2711_v60, -3.4028235e+38 }
 0x318   : > { %v2924_v37 = vmax.f32 %v7012_v18, %v7016_v40 }
 0x31a   : > { %2925 = vmax.xlane.f32.xlu0 %v2924_v37 }
 0x31d   : > { %v2625_v36 = vpop.f32.mrf.mxu2 }
 0x31e   : > { %v7024_v17 = vsel %vm6154_vm3, %v2625_v36, -3.4028235e+38  ;;  %v2714_v48 = vpop.f32.mrf.mxu3 }
 0x31f   : > { %v7028_v59 = vsel %vm6158_vm4, %v2714_v48, -3.4028235e+38 }
 0x320   : > { %v2927_v52 = vmax.f32 %v7024_v17, %v7028_v59 }
 0x322   : > { %2928 = vmax.xlane.f32.xlu1 %v2927_v52 }
 0x325   : > { %v2627_v60 = vpop.f32.mrf.mxu2 }
 0x326   : > { %v7034_v37 = vsel %vm6154_vm3, %v2627_v60, -3.4028235e+38  ;;  %v2716_v21 = vpop.f32.mrf.mxu3 }
 0x327   : > { %v7038_v36 = vsel %vm6158_vm4, %v2716_v21, -3.4028235e+38 }
 0x328   : > { %v2930_v48 = vmax.f32 %v7034_v37, %v7038_v36 }
 0x32a   : > { %2931 = vmax.xlane.f32.xlu2 %v2930_v48 }
 0x32d   : > { %v2630_v4 = vpop.f32.mrf.mxu2 }
 0x32e   : > { %v7044_v52 = vsel %vm6154_vm3, %v2630_v4, -3.4028235e+38  ;;  %v2719_v60 = vpop.f32.mrf.mxu3 }
 0x32f   : > { %v7048_v29 = vsel %vm6158_vm4, %v2719_v60, -3.4028235e+38  ;;  %v5117_v60 = vld [vmem:[%s6288_s24 + $0x170] sm:$0xff] }
 0x330   : > { %v2933_v21 = vmax.f32 %v7044_v52, %v7048_v29  ;;  %v2383_v42 = vpack.c.bf16 %v5118_v22, %v5117_v60  ;;  %v5115_v22 = vld [vmem:[%s6288_s24 + $0x160] sm:$0xff]  ;;  %v5116_v60 = vld [vmem:[%s6288_s24 + $0x168] sm:$0xff] }
 0x332   : > { %2934 = vmax.xlane.f32.xlu0 %v2933_v21  ;;  %v5133_v21 = vld [vmem:[%s6288_s24 + $0x1f0] sm:$0xff]  ;;  %3581 = vmatpush.bf16.msrb.mxu0 %v2383_v42 }
 0x333   : > { %v2391_v43 = vpack.c.bf16 %v5134_v8, %v5133_v21  ;;  %5272 = vmatpush.bf16.msra.mxu2 %v2383_v42  ;;  %v2382_v21 = vpack.c.bf16 %v5116_v60, %v5115_v22  ;;  %v5132_v42 = vld [vmem:[%s6288_s24 + $0x1e8] sm:$0xff]  ;;  %v2389_v22 = vpack.c.bf16 %v5130_v44, %v5129_v47  ;;  %v7090_v60 = vpop.xlane.xlu1 %1953 }
 0x334   : > { %v2390_v26 = vpack.c.bf16 %v5132_v42, %v5131_v62  ;;  %8784 = vst [vmem:[#allocation93_spill] sm:$0xff] %v7090_v60  ;;  %v5112_v47 = vld [vmem:[%s6288_s24 + $0x148] sm:$0xff] }
 0x335   : > { %v2632_v54 = vpop.f32.mrf.mxu2  ;;  %3670 = vmatpush.bf16.msrb.mxu1 %v2391_v43  ;;  %5280 = vmatpush.bf16.msra.mxu3 %v2391_v43 }
 0x336   : > { %v7054_v7 = vsel %vm6154_vm3, %v2632_v54, -3.4028235e+38  ;;  %v2721_v48 = vpop.f32.mrf.mxu3  ;;  %v7066_v54 = vpop.xlane.xlu2 %1938  ;;  %3582 = vmatpush.bf16.msrb.mxu0 %v2382_v21 }
 0x337   : > { %v7058_v24 = vsel %vm6158_vm4, %v2721_v48, -3.4028235e+38  ;;  %8781 = vst [vmem:[#allocation90_spill] sm:$0xff] %v7066_v54  ;;  %5273 = vmatpush.bf16.msra.mxu2 %v2382_v21  ;;  %v5113_v54 = vld [vmem:[%s6288_s24 + $0x150] sm:$0xff]  ;;  %v7092_v21 = vpop.xlane.xlu0 %1941 }
 0x338   : > { %v2936_v4 = vmax.f32 %v7054_v7, %v7058_v24  ;;  %v2381_v43 = vpack.c.bf16 %v5114_v49, %v5113_v54  ;;  %8785 = vst [vmem:[#allocation94_spill] sm:$0xff] %v7092_v21  ;;  %v5127_v54 = vld [vmem:[%s6288_s24 + $0x1c0] sm:$0xff]  ;;  %v5110_v21 = vld [vmem:[%s6288_s24 + $0x138] sm:$0xff] }
 0x339   : > { %3671 = vmatpush.bf16.msrb.mxu1 %v2390_v26  ;;  %5281 = vmatpush.bf16.msra.mxu3 %v2390_v26  ;;  %v5111_v26 = vld [vmem:[%s6288_s24 + $0x140] sm:$0xff] }
 0x33a   : > { %2937 = vmax.xlane.f32.xlu1 %v2936_v4  ;;  %3583 = vmatpush.bf16.msrb.mxu0 %v2381_v43 }
 0x33b   : > { %5274 = vmatpush.bf16.msra.mxu2 %v2381_v43  ;;  %v2380_v43 = vpack.c.bf16 %v5112_v47, %v5111_v26  ;;  %v7116_v26 = vpop.xlane.xlu1 %1962 }
 0x33c   : > { %8787 = vst [vmem:[#allocation96_spill] sm:$0xff] %v7116_v26  ;;  %v5108_v26 = vld [vmem:[%s6288_s24 + $0x128] sm:$0xff] }
 0x33d   : > { %v2635_v48 = vpop.f32.mrf.mxu2  ;;  %3672 = vmatpush.bf16.msrb.mxu1 %v2389_v22  ;;  %5282 = vmatpush.bf16.msra.mxu3 %v2389_v22  ;;  %v623_v22 = vld [vmem:[%s6060_s10 + $0x1b0] sm:$0xff] }
 0x33e   : > { %v7072_v61 = vsel %vm6154_vm3, %v2635_v48, -3.4028235e+38  ;;  %v2724_v4 = vpop.f32.mrf.mxu3  ;;  %3584 = vmatpush.bf16.msrb.mxu0 %v2380_v43 }
 0x33f   : > { %v7079_v8 = vsel %vm6158_vm4, %v2724_v4, -3.4028235e+38  ;;  %v7088_v4 = vpop.xlane.xlu2 %1947  ;;  %5275 = vmatpush.bf16.msra.mxu2 %v2380_v43  ;;  %v7118_v41 = vpop.xlane.xlu0 %1950 }
 0x340   : > { %v2939_v48 = vmax.f32 %v7072_v61, %v7079_v8  ;;  %8783 = vst [vmem:[#allocation92_spill] sm:$0xff] %v7088_v4  ;;  %v5109_v4 = vld [vmem:[%s6288_s24 + $0x130] sm:$0xff] }
 0x341   : > { %v2379_v46 = vpack.c.bf16 %v5110_v21, %v5109_v4  ;;  %8788 = vst [vmem:[#allocation97_spill] sm:$0xff] %v7118_v41 }
 0x342   : > { %2940 = vmax.xlane.f32.xlu2 %v2939_v48 }
 0x343   : > { %3585 = vmatpush.bf16.msrb.mxu0 %v2379_v46  ;;  %5276 = vmatpush.bf16.msra.mxu2 %v2379_v46 }
 0x345   : > { %v2637_v62 = vpop.f32.mrf.mxu2 }
 0x346   : > { %v7096_v42 = vsel %vm6154_vm3, %v2637_v62, -3.4028235e+38  ;;  %v2726_v49 = vpop.f32.mrf.mxu3  ;;  %v5128_v62 = vld [vmem:[%s6288_s24 + $0x1c8] sm:$0xff] }
 0x347   : > { %v7100_v44 = vsel %vm6158_vm4, %v2726_v49, -3.4028235e+38  ;;  %v2388_v60 = vpack.c.bf16 %v5128_v62, %v5127_v54  ;;  %v5125_v49 = vld [vmem:[%s6288_s24 + $0x1b0] sm:$0xff]  ;;  %v7111_v34 = vpop.xlane.xlu2 %1956  ;;  %v688_v62 = vmul.f32 0.125, %v624_v14 }
 0x348   : > { %v2942_v48 = vmax.f32 %v7096_v42, %v7100_v44  ;;  %8786 = vst [vmem:[#allocation95_spill] sm:$0xff] %v7111_v34  ;;  %v2387_v54 = vpack.c.bf16 %v5126_v63, %v5125_v49  ;;  %v5123_v63 = vld [vmem:[%s6288_s24 + $0x1a0] sm:$0xff]  ;;  %v5124_v34 = vld [vmem:[%s6288_s24 + $0x1a8] sm:$0xff] }
 0x349   : > { %3673 = vmatpush.bf16.msrb.mxu1 %v2388_v60  ;;  %5283 = vmatpush.bf16.msra.mxu3 %v2388_v60  ;;  %v5107_v60 = vld [vmem:[%s6288_s24 + $0x120] sm:$0xff]  ;;  %v752_v49 = vpack.c.bf16 %v688_v62, %v688_v62  ;;  %v2386_v41 = vpack.c.bf16 %v5124_v34, %v5123_v63  ;;  %v5122_v62 = vld [vmem:[%s6288_s24 + $0x198] sm:$0xff]  ;;  %v7142_v34 = vpop.xlane.xlu1 %1971  ;;  %v7144_v63 = vpop.xlane.xlu0 %1959 }
 0x34a   : > { %2943 = vmax.xlane.f32.xlu0 %v2942_v48  ;;  %v687_v48 = vmul.f32 0.125, %v623_v22  ;;  %8790 = vst [vmem:[#allocation99_spill] sm:$0xff] %v7142_v34 }
 0x34b   : > { %817 = vst.msk [vmem:[#allocation2 + $0xdc] sm:$0xf] %vm761_vm1, %v752_v49 }
 0x34c   : > { %v751_v14 = vpack.c.bf16 %v687_v48, %v687_v48  ;;  %v5121_v48 = vld [vmem:[%s6288_s24 + $0x190] sm:$0xff]  ;;  %8791 = vst [vmem:[#allocation100_spill] sm:$0xff] %v7144_v63 }
 0x34d   : > { %v2640_v47 = vpop.f32.mrf.mxu2  ;;  %3674 = vmatpush.bf16.msrb.mxu1 %v2387_v54  ;;  %5284 = vmatpush.bf16.msra.mxu3 %v2387_v54 }
 0x34e   : > { %v7122_v43 = vsel %vm6154_vm3, %v2640_v47, -3.4028235e+38  ;;  %v2729_v4 = vpop.f32.mrf.mxu3  ;;  %v2378_v47 = vpack.c.bf16 %v5108_v26, %v5107_v60  ;;  %816 = vst.msk [vmem:[#allocation2 + $0xd8] sm:$0xf] %vm761_vm1, %v751_v14  ;;  %v2385_v60 = vpack.c.bf16 %v5122_v62, %v5121_v48  ;;  %v5120_v62 = vld [vmem:[%s6288_s24 + $0x188] sm:$0xff] }
 0x34f   : > { %v7126_v21 = vsel %vm6158_vm4, %v2729_v4, -3.4028235e+38  ;;  %v5105_v4 = vld [vmem:[%s6288_s24 + $0x110] sm:$0xff]  ;;  %v7139_v46 = vpop.xlane.xlu2 %1965 }
 0x350   : > { %v2945_v22 = vmax.f32 %v7122_v43, %v7126_v21  ;;  %3586 = vmatpush.bf16.msrb.mxu0 %v2378_v47  ;;  %5277 = vmatpush.bf16.msra.mxu2 %v2378_v47  ;;  %8789 = vst [vmem:[#allocation98_spill] sm:$0xff] %v7139_v46  ;;  %v2377_v26 = vpack.c.bf16 %v5106_v38, %v5105_v4  ;;  %v5103_v38 = vld [vmem:[%s6288_s24 + $0x100] sm:$0xff] }
 0x351   : > { %3675 = vmatpush.bf16.msrb.mxu1 %v2386_v41  ;;  %5285 = vmatpush.bf16.msra.mxu3 %v2386_v41  ;;  %v5104_v41 = vld [vmem:[%s6288_s24 + $0x108] sm:$0xff]  ;;  %v5119_v47 = vld [vmem:[%s6288_s24 + $0x180] sm:$0xff]  ;;  %v7164_v46 = vpop.xlane.xlu1 %1980  ;;  %v7166_v63 = vpop.xlane.xlu0 %1968 }
 0x352   : > { %2946 = vmax.xlane.f32.xlu1 %v2945_v22  ;;  %v2376_v48 = vpack.c.bf16 %v5104_v41, %v5103_v38  ;;  %8793 = vst [vmem:[#allocation102_spill] sm:$0xff] %v7164_v46 }
 0x353   : > { %8794 = vst [vmem:[#allocation103_spill] sm:$0xff] %v7166_v63 }
 0x354   : > { %3587 = vmatpush.bf16.msrb.mxu0 %v2377_v26  ;;  %5278 = vmatpush.bf16.msra.mxu2 %v2377_v26 }
 0x355   : > { %v2642_v54 = vpop.f32.mrf.mxu2  ;;  %3676 = vmatpush.bf16.msrb.mxu1 %v2385_v60  ;;  %5286 = vmatpush.bf16.msra.mxu3 %v2385_v60  ;;  %v5266_v34 = vld [vmem:[#allocation2 + $0xd8] sm:$0xff] }
 0x356   : > { %v7148_v14 = vsel %vm6154_vm3, %v2642_v54, -3.4028235e+38  ;;  %v2731_v49 = vpop.f32.mrf.mxu3  ;;  %v2384_v54 = vpack.c.bf16 %v5120_v62, %v5119_v47  ;;  %5210 = vmatmul.msk.bf16.gmra.mxu2 %vm1036_vm0, %v5266_v34  ;;  %5226 = vmatmul.msk.bf16.gmra.mxu3 %vm1036_vm0, %v5266_v34 }
 0x357   : > { %v7152_v22 = vsel %vm6158_vm4, %v2731_v49, -3.4028235e+38  ;;  %v7162_v49 = vpop.xlane.xlu2 %1974 }
 0x358   : > { %v2948_v4 = vmax.f32 %v7148_v14, %v7152_v22  ;;  %3588 = vmatpush.bf16.msrb.mxu0 %v2376_v48  ;;  %8792 = vst [vmem:[#allocation101_spill] sm:$0xff] %v7162_v49  ;;  %5279 = vmatpush.bf16.msra.mxu2 %v2376_v48 }
 0x359   : > { %3677 = vmatpush.bf16.msrb.mxu1 %v2384_v54  ;;  %5287 = vmatpush.bf16.msra.mxu3 %v2384_v54  ;;  %v7180_v62 = vpop.xlane.xlu0 %1977 }
 0x35a   : > { %2949 = vmax.xlane.f32.xlu2 %v2948_v4  ;;  %8796 = vst [vmem:[#allocation105_spill] sm:$0xff] %v7180_v62 }
 0x35d   : > { %v2645_v26 = vpop.f32.mrf.mxu2 }
 0x35e   : > { %v7170_v60 = vsel %vm6154_vm3, %v2645_v26, -3.4028235e+38  ;;  %v2734_v38 = vpop.f32.mrf.mxu3 }
 0x35f   : > { %v7174_v41 = vsel %vm6158_vm4, %v2734_v38, -3.4028235e+38  ;;  %v7178_v47 = vpop.xlane.xlu2 %1983 }
 0x360   : > { %v2951_v34 = vmax.f32 %v7170_v60, %v7174_v41  ;;  %8795 = vst [vmem:[#allocation104_spill] sm:$0xff] %v7178_v47 }
 0x362   : > { %2952 = vmax.xlane.f32.xlu0 %v2951_v34 }
 0x365   : > { %v2911_v4 = vpop.xlane.xlu1 %2910  ;;  %v2647_v48 = vpop.f32.mrf.mxu2 }
 0x366   : > { %v3037_v54 = vsub.f32 -inf, %v2911_v4  ;;  %v3133_v46 = vsub.f32 %v6952_v45, %v2911_v4  ;;  %v3134_v26 = vsub.f32 %v6956_v33, %v2911_v4  ;;  %v7186_v49 = vsel %vm6154_vm3, %v2647_v48, -3.4028235e+38  ;;  %v2736_v38 = vpop.f32.mrf.mxu3  ;;  %v7196_v4 = vpop.xlane.xlu0 %1986 }
 0x367   : > { %v7190_v63 = vsel %vm6158_vm4, %v2736_v38, -3.4028235e+38  ;;  %8797 = vst [vmem:[#allocation106_spill] sm:$0xff] %v7196_v4 }
 0x368   : > { %v3069_v34 = vmul.f32 1.442695, %v3037_v54  ;;  %v3197_v47 = vmul.f32 1.442695, %v3133_v46  ;;  %v3199_v27 = vmul.f32 1.442695, %v3134_v26  ;;  %v2954_v62 = vmax.f32 %v7186_v49, %v7190_v63 }
 0x36a   : > { %5475 = vpow2.f32 %v3069_v34  ;;  %2955 = vmax.xlane.f32.xlu1 %v2954_v62 }
 0x36b   : > { %5477 = vpow2.f32 %v3197_v47 }
 0x36c   : > { %5479 = vpow2.f32 %v3199_v27 }
 0x36d   : > { %v2914_v45 = vpop.xlane.xlu2 %2913  ;;  %v7194_v33 = vpop.f32.mrf.mxu2 }
 0x36e   : > { %v3135_v48 = vsub.f32 %v6962_v51, %v2914_v45  ;;  %v3136_v38 = vsub.f32 %v6966_v5, %v2914_v45  ;;  %v7200_v2 = vpop.f32.mrf.mxu3  ;;  %v3038_v47 = vsub.f32 -inf, %v2914_v45 }
 0x370   : > { %v7202_v46 = vpop.eup %5475  ;;  %v3201_v54 = vmul.f32 1.442695, %v3135_v48  ;;  %v3203_v26 = vmul.f32 1.442695, %v3136_v38  ;;  %v3071_v38 = vmul.f32 1.442695, %v3038_v47 }
 0x371   : > { %v5478_v53 = vpop.eup %5477 }
 0x372   : > { %v5480_v34 = vpop.eup %5479  ;;  %3951 = vrot.lane.b32.xlu2 %v7202_v46, %s5940_s26  ;;  %5481 = vpow2.f32 %v3201_v54 }
 0x373   : > { %v3357_v27 = vadd.f32 %v5480_v34, %v5478_v53  ;;  %5483 = vpow2.f32 %v3203_v26 }
 0x374   : > { %5485 = vpow2.f32 %v3071_v38 }
 0x375   : > { %3358 = vadd.xlane.f32.xlu0 %v3357_v27  ;;  %v2652_v51 = vpop.f32.mrf.mxu2  ;;  %v2917_v62 = vpop.xlane.xlu0 %2916 }
 0x376   : > { %v7208_v5 = vsel %vm6154_vm3, %v2652_v51, -3.4028235e+38  ;;  %v2741_v4 = vpop.f32.mrf.mxu3  ;;  %v3137_v54 = vsub.f32 %v6974_v6, %v2917_v62  ;;  %v3138_v27 = vsub.f32 %v6979_v20, %v2917_v62 }
 0x377   : > { %v7212_v48 = vsel %vm6158_vm4, %v2741_v4, -3.4028235e+38 }
 0x378   : > { %v7214_v0 = vpop.eup %5481  ;;  %v2960_v45 = vmax.f32 %v7208_v5, %v7212_v48  ;;  %v3205_v4 = vmul.f32 1.442695, %v3137_v54  ;;  %v3207_v39 = vmul.f32 1.442695, %v3138_v27 }
 0x379   : > { %v7219_v26 = vpop.eup %5483  ;;  %v3549_v51 = vpack.c.bf16 %v7214_v0, %v5478_v53 }
 0x37a   : > { %v3550_v30 = vpack.c.bf16 %v7219_v26, %v5480_v34  ;;  %5487 = vpow2.f32 %v3205_v4  ;;  %v7230_v53 = vpop.eup %5485  ;;  %v3039_v34 = vsub.f32 -inf, %v2917_v62  ;;  %v626_v4 = vld [vmem:[%s6060_s10 + $0x1c8] sm:$0xff] }
 0x37b   : > { %3589 = vmatmul.bf16.vlgmr.msrb.gmra.mxu0 %v3549_v51  ;;  %5489 = vpow2.f32 %v3207_v39  ;;  %v625_v51 = vld [vmem:[%s6060_s10 + $0x1c0] sm:$0xff] }
 0x37c   : > { %3678 = vmatmul.bf16.vlgmr.msrb.gmra.mxu1 %v3550_v30 }
 0x37d   : > { %2961 = vmax.xlane.f32.xlu0 %v2960_v45  ;;  %v7224_v47 = vpop.xlane.xlu1 %2919 }
 0x37e   : > { %v3139_v6 = vsub.f32 %v6986_v10, %v7224_v47  ;;  %v3140_v13 = vsub.f32 %v6990_v58, %v7224_v47  ;;  %v3073_v10 = vmul.f32 1.442695, %v3039_v34 }
 0x380   : > { %v3209_v3 = vmul.f32 1.442695, %v3139_v6  ;;  %v3211_v20 = vmul.f32 1.442695, %v3140_v13  ;;  %v7240_v38 = vpop.eup %5487  ;;  %v690_v6 = vmul.f32 0.125, %v626_v4 }
 0x381   : > { %v7242_v62 = vpop.eup %5489 }
 0x382   : > { %5491 = vpow2.f32 %v3209_v3 }
 0x383   : > { %3953 = vrot.lane.b32.xlu1 %v7230_v53, %s5940_s26  ;;  %5493 = vpow2.f32 %v3211_v20 }
 0x384   : > { %5495 = vpow2.f32 %v3073_v10 }
 0x385   : > { %v7234_v30 = vpop.xlane.xlu2 %2922 }
 0x386   : > { %v3141_v58 = vsub.f32 %v7000_v55, %v7234_v30  ;;  %v3142_v13 = vsub.f32 %v7004_v31, %v7234_v30  ;;  %v689_v31 = vmul.f32 0.125, %v625_v51 }
 0x388   : > { %v3213_v39 = vmul.f32 1.442695, %v3141_v58  ;;  %v3215_v3 = vmul.f32 1.442695, %v3142_v13  ;;  %v7244_v54 = vpop.eup %5491  ;;  %v753_v34 = vpack.c.bf16 %v689_v31, %v689_v31  ;;  %v754_v58 = vpack.c.bf16 %v690_v6, %v690_v6 }
 0x389   : > { %v7246_v45 = vpop.eup %5493  ;;  %v3551_v27 = vpack.c.bf16 %v7244_v54, %v7240_v38 }
 0x38a   : > { %5497 = vpow2.f32 %v3213_v39  ;;  %v3552_v55 = vpack.c.bf16 %v7246_v45, %v7242_v62  ;;  %818 = vst.msk [vmem:[#allocation2 + $0xe0] sm:$0xf] %vm761_vm1, %v753_v34  ;;  %v7261_v39 = vpop.eup %5495 }
 0x38b   : > { %5499 = vpow2.f32 %v3215_v3  ;;  %3594 = vmatmul.bf16.gmra.mxu0 %v3551_v27  ;;  %819 = vst.msk [vmem:[#allocation2 + $0xe4] sm:$0xf] %vm761_vm1, %v754_v58 }
 0x38c   : > { %3683 = vmatmul.bf16.gmra.mxu1 %v3552_v55 }
 0x38d   : > { %v7254_v20 = vpop.xlane.xlu0 %2925 }
 0x38e   : > { %v3143_v10 = vsub.f32 %v7012_v18, %v7254_v20  ;;  %v3144_v13 = vsub.f32 %v7016_v40, %v7254_v20  ;;  %v7271_v18 = vsel %vm6154_vm3, %v7194_v33, -3.4028235e+38  ;;  %v7276_v40 = vsel %vm6158_vm4, %v7200_v2, -3.4028235e+38 }
 0x38f   : > { %v2957_v33 = vmax.f32 %v7271_v18, %v7276_v40 }
 0x390   : > { %v3217_v11 = vmul.f32 1.442695, %v3143_v10  ;;  %v3219_v51 = vmul.f32 1.442695, %v3144_v13  ;;  %v5498_v4 = vpop.eup %5497 }
 0x391   : > { %3955 = vrot.lane.b32.xlu0 %v7261_v39, %s5940_s26  ;;  %v5500_v3 = vpop.eup %5499 }
 0x392   : > { %5501 = vpow2.f32 %v3217_v11  ;;  %v7266_v27 = vadd.f32 %v5500_v3, %v5498_v4  ;;  %v5267_v10 = vld [vmem:[#allocation2 + $0xe0] sm:$0xff] }
 0x393   : > { %5503 = vpow2.f32 %v3219_v51  ;;  %5211 = vmatmul.msk.bf16.gmra.mxu2 %vm1036_vm0, %v5267_v10  ;;  %5227 = vmatmul.msk.bf16.gmra.mxu3 %vm1036_vm0, %v5267_v10 }
 0x395   : > { %v7278_v55 = vpop.xlane.xlu1 %2928 }
 0x396   : > { %v3145_v11 = vsub.f32 %v7024_v17, %v7278_v55  ;;  %v3146_v31 = vsub.f32 %v7028_v59, %v7278_v55  ;;  %v691_v59 = vmul.f32 0.125, %v627_v50 }
 0x398   : > { %v3221_v6 = vmul.f32 1.442695, %v3145_v11  ;;  %v3223_v34 = vmul.f32 1.442695, %v3146_v31  ;;  %v5502_v58 = vpop.eup %5501  ;;  %v692_v11 = vmul.f32 0.125, %v628_v1 }
 0x399   : > { %v5504_v2 = vpop.eup %5503  ;;  %v3553_v13 = vpack.c.bf16 %v5502_v58, %v5498_v4 }
 0x39a   : > { %5505 = vpow2.f32 %v3221_v6  ;;  %v3554_v51 = vpack.c.bf16 %v5504_v2, %v5500_v3  ;;  %v7289_v17 = vadd.f32 %v5504_v2, %v5502_v58  ;;  %v756_v6 = vpack.c.bf16 %v692_v11, %v692_v11 }
 0x39b   : > { %2958 = vmax.xlane.f32.xlu2 %v2957_v33  ;;  %5507 = vpow2.f32 %v3223_v34  ;;  %3599 = vmatmul.bf16.gmra.mxu0 %v3553_v13  ;;  %v755_v33 = vpack.c.bf16 %v691_v59, %v691_v59  ;;  %v3363_v34 = vadd.f32 %v7242_v62, %v7240_v38  ;;  %v2655_v13 = vpop.f32.mrf.mxu2  ;;  %v2744_v38 = vpop.f32.mrf.mxu3  ;;  %v3040_v11 = vsub.f32 -inf, %v7224_v47 }
 0x39c   : > { %3688 = vmatmul.bf16.gmra.mxu1 %v3554_v51  ;;  %821 = vst.msk [vmem:[#allocation2 + $0xec] sm:$0xf] %vm761_vm1, %v756_v6  ;;  %v3360_v6 = vadd.f32 %v7219_v26, %v7214_v0  ;;  %v7321_v47 = vsel %vm6154_vm3, %v2655_v13, -3.4028235e+38  ;;  %v7325_v0 = vsel %vm6158_vm4, %v2744_v38, -3.4028235e+38 }
 0x39d   : > { %v7292_v31 = vpop.xlane.xlu2 %2931  ;;  %820 = vst.msk [vmem:[#allocation2 + $0xe8] sm:$0xf] %vm761_vm1, %v755_v33  ;;  %v2963_v13 = vmax.f32 %v7321_v47, %v7325_v0 }
 0x39e   : > { %v3147_v4 = vsub.f32 %v7034_v37, %v7292_v31  ;;  %v3148_v3 = vsub.f32 %v7038_v36, %v7292_v31 }
 0x3a0   : > { %v3225_v32 = vmul.f32 1.442695, %v3147_v4  ;;  %v3227_v58 = vmul.f32 1.442695, %v3148_v3  ;;  %v5506_v2 = vpop.eup %5505 }
 0x3a1   : > { %v5508_v1 = vpop.eup %5507 }
 0x3a2   : > { %5509 = vpow2.f32 %v3225_v32  ;;  %v7302_v50 = vadd.f32 %v5508_v1, %v5506_v2 }
 0x3a3   : > { %3364 = vadd.xlane.f32.xlu2 %v3363_v34  ;;  %5511 = vpow2.f32 %v3227_v58 }
 0x3a4   : > { %v5268_v32 = vld [vmem:[#allocation2 + $0xe8] sm:$0xff] }
 0x3a5   : > { %v7304_v37 = vpop.xlane.xlu0 %2934  ;;  %5212 = vmatmul.msk.bf16.gmra.mxu2 %vm1036_vm0, %v5268_v32  ;;  %5228 = vmatmul.msk.bf16.gmra.mxu3 %vm1036_vm0, %v5268_v32 }
 0x3a6   : > { %v3149_v36 = vsub.f32 %v7044_v52, %v7304_v37  ;;  %v3150_v10 = vsub.f32 %v7048_v29, %v7304_v37  ;;  %v3075_v29 = vmul.f32 1.442695, %v3040_v11 }
 0x3a8   : > { %v3229_v62 = vmul.f32 1.442695, %v3149_v36  ;;  %v3231_v51 = vmul.f32 1.442695, %v3150_v10  ;;  %v5510_v59 = vpop.eup %5509  ;;  %v7331_v10 = vpop.f32.mrf.mxu2 }
 0x3a9   : > { %v5512_v4 = vpop.eup %5511  ;;  %v3555_v3 = vpack.c.bf16 %v5510_v59, %v5506_v2 }
 0x3aa   : > { %5513 = vpow2.f32 %v3229_v62  ;;  %v3556_v33 = vpack.c.bf16 %v5512_v4, %v5508_v1  ;;  %v7314_v52 = vadd.f32 %v5512_v4, %v5510_v59  ;;  %v7333_v62 = vpop.f32.mrf.mxu3 }
 0x3ab   : > { %5515 = vpow2.f32 %v3231_v51  ;;  %3604 = vmatmul.bf16.gmra.mxu0 %v3555_v3 }
 0x3ac   : > { %3693 = vmatmul.bf16.gmra.mxu1 %v3556_v33  ;;  %5517 = vpow2.f32 %v3075_v29  ;;  %v3366_v33 = vadd.f32 %v7246_v45, %v7244_v54 }
 0x3ad   : > { %v7317_v58 = vpop.xlane.xlu1 %2937  ;;  %3361 = vadd.xlane.f32.xlu1 %v3360_v6 }
 0x3ae   : > { %v3151_v26 = vsub.f32 %v7054_v7, %v7317_v58  ;;  %v3152_v2 = vsub.f32 %v7058_v24, %v7317_v58 }
 0x3b0   : > { %v3233_v34 = vmul.f32 1.442695, %v3151_v26  ;;  %v3235_v1 = vmul.f32 1.442695, %v3152_v2  ;;  %v5514_v36 = vpop.eup %5513  ;;  %v2660_v6 = vpop.f32.mrf.mxu2 }
 0x3b1   : > { %v5516_v51 = vpop.eup %5515 }
 0x3b2   : > { %5519 = vpow2.f32 %v3233_v34  ;;  %v7337_v38 = vadd.f32 %v5516_v51, %v5514_v36  ;;  %v7345_v11 = vpop.eup %5517  ;;  %v2749_v29 = vpop.f32.mrf.mxu3 }
 0x3b3   : > { %5521 = vpow2.f32 %v3235_v1  ;;  %v7359_v54 = vsel %vm6158_vm4, %v2749_v29, -3.4028235e+38 }
 0x3b5   : > { %2964 = vmax.xlane.f32.xlu1 %v2963_v13  ;;  %v7339_v7 = vpop.xlane.xlu2 %2940  ;;  %v3041_v13 = vsub.f32 -inf, %v7234_v30  ;;  %v3042_v30 = vsub.f32 -inf, %v7254_v20 }
 0x3b6   : > { %v3153_v24 = vsub.f32 %v7072_v61, %v7339_v7  ;;  %v3154_v59 = vsub.f32 %v7079_v8, %v7339_v7  ;;  %v7355_v8 = vsel %vm6154_vm3, %v2660_v6, -3.4028235e+38 }
 0x3b8   : > { %v3237_v32 = vmul.f32 1.442695, %v3153_v24  ;;  %v3239_v4 = vmul.f32 1.442695, %v3154_v59  ;;  %v5520_v3 = vpop.eup %5519 }
 0x3b9   : > { %v5522_v26 = vpop.eup %5521  ;;  %v3557_v2 = vpack.c.bf16 %v5520_v3, %v5514_v36 }
 0x3ba   : > { %5523 = vpow2.f32 %v3237_v32  ;;  %v3558_v61 = vpack.c.bf16 %v5522_v26, %v5516_v51  ;;  %v7351_v34 = vadd.f32 %v5522_v26, %v5520_v3  ;;  %v2969_v51 = vmax.f32 %v7355_v8, %v7359_v54 }
 0x3bb   : > { %3367 = vadd.xlane.f32.xlu0 %v3366_v33  ;;  %3957 = vrot.lane.b32.xlu2 %v7345_v11, %s5940_s26  ;;  %5525 = vpow2.f32 %v3239_v4  ;;  %v3077_v3 = vmul.f32 1.442695, %v3041_v13 }
 0x3bc   : > { %3609 = vmatmul.bf16.gmra.mxu0 %v3557_v2  ;;  %3698 = vmatmul.bf16.gmra.mxu1 %v3558_v61 }
 0x3bd   : > { %v7361_v45 = vpop.xlane.xlu0 %2943 }
 0x3be   : > { %v3155_v1 = vsub.f32 %v7096_v42, %v7361_v45  ;;  %v3156_v36 = vsub.f32 %v7100_v44, %v7361_v45 }
 0x3c0   : > { %v3241_v24 = vmul.f32 1.442695, %v3155_v1  ;;  %v3243_v59 = vmul.f32 1.442695, %v3156_v36  ;;  %v5524_v32 = vpop.eup %5523 }
 0x3c1   : > { %v5526_v4 = vpop.eup %5525 }
 0x3c2   : > { %5527 = vpow2.f32 %v3241_v24  ;;  %v7370_v33 = vadd.f32 %v5526_v4, %v5524_v32 }
 0x3c3   : > { %2970 = vmax.xlane.f32.xlu0 %v2969_v51  ;;  %5529 = vpow2.f32 %v3243_v59  ;;  %v3079_v51 = vmul.f32 1.442695, %v3042_v30 }
 0x3c4   : > { %5531 = vpow2.f32 %v3077_v3 }
 0x3c5   : > { %v7372_v6 = vpop.xlane.xlu1 %2946 }
 0x3c6   : > { %v3157_v42 = vsub.f32 %v7122_v43, %v7372_v6  ;;  %v3158_v44 = vsub.f32 %v7126_v21, %v7372_v6 }
 0x3c8   : > { %v3245_v29 = vmul.f32 1.442695, %v3157_v42  ;;  %v3247_v26 = vmul.f32 1.442695, %v3158_v44  ;;  %v5528_v2 = vpop.eup %5527 }
 0x3c9   : > { %v5530_v61 = vpop.eup %5529  ;;  %v3559_v1 = vpack.c.bf16 %v5528_v2, %v5524_v32 }
 0x3ca   : > { %5533 = vpow2.f32 %v3245_v29  ;;  %v3560_v36 = vpack.c.bf16 %v5530_v61, %v5526_v4  ;;  %v7379_v13 = vadd.f32 %v5530_v61, %v5528_v2  ;;  %v7381_v24 = vpop.eup %5531 }
 0x3cb   : > { %5535 = vpow2.f32 %v3247_v26 }
 0x3cc   : > { %3614 = vmatmul.bf16.gmra.mxu0 %v3559_v1  ;;  %3703 = vmatmul.bf16.gmra.mxu1 %v3560_v36  ;;  %5537 = vpow2.f32 %v3079_v51  ;;  %v629_v36 = vld [vmem:[%s6060_s10 + $0x1e0] sm:$0xff]  ;;  %v630_v51 = vld [vmem:[%s6060_s10 + $0x1e8] sm:$0xff] }
 0x3cd   : > { %v7383_v43 = vpop.xlane.xlu2 %2949 }
 0x3ce   : > { %v3159_v21 = vsub.f32 %v7148_v14, %v7383_v43  ;;  %v3160_v20 = vsub.f32 %v7152_v22, %v7383_v43  ;;  %3959 = vrot.lane.b32.xlu1 %v7381_v24, %s5940_s26 }
 0x3d0   : > { %v3249_v59 = vmul.f32 1.442695, %v3159_v21  ;;  %v3251_v32 = vmul.f32 1.442695, %v3160_v20  ;;  %v5534_v4 = vpop.eup %5533  ;;  %v693_v20 = vmul.f32 0.125, %v629_v36 }
 0x3d1   : > { %v5536_v3 = vpop.eup %5535 }
 0x3d2   : > { %5539 = vpow2.f32 %v3249_v59  ;;  %v7391_v42 = vadd.f32 %v5536_v3, %v5534_v4  ;;  %v7395_v14 = vpop.eup %5537  ;;  %v694_v59 = vmul.f32 0.125, %v630_v51 }
 0x3d3   : > { %5541 = vpow2.f32 %v3251_v32  ;;  %v757_v32 = vpack.c.bf16 %v693_v20, %v693_v20 }
 0x3d4   : > { %v758_v9 = vpack.c.bf16 %v694_v59, %v694_v59  ;;  %v2662_v59 = vpop.f32.mrf.mxu2 }
 0x3d5   : > { %v7393_v44 = vpop.xlane.xlu0 %2952  ;;  %822 = vst.msk [vmem:[#allocation2 + $0xf0] sm:$0xf] %vm761_vm1, %v757_v32  ;;  %v2751_v32 = vpop.f32.mrf.mxu3 }
 0x3d6   : > { %v3161_v22 = vsub.f32 %v7170_v60, %v7393_v44  ;;  %v3162_v30 = vsub.f32 %v7174_v41, %v7393_v44  ;;  %823 = vst.msk [vmem:[#allocation2 + $0xf4] sm:$0xf] %vm761_vm1, %v758_v9 }
 0x3d7   : > { %3961 = vrot.lane.b32.xlu0 %v7395_v14, %s5940_s26 }
 0x3d8   : > { %v3253_v29 = vmul.f32 1.442695, %v3161_v22  ;;  %v3255_v26 = vmul.f32 1.442695, %v3162_v30  ;;  %v5540_v2 = vpop.eup %5539  ;;  %v7421_v30 = vsel %vm6158_vm4, %v7333_v62, -3.4028235e+38 }
 0x3d9   : > { %v5542_v61 = vpop.eup %5541  ;;  %v3561_v1 = vpack.c.bf16 %v5540_v2, %v5534_v4 }
 0x3da   : > { %5543 = vpow2.f32 %v3253_v29  ;;  %v3562_v21 = vpack.c.bf16 %v5542_v61, %v5536_v3  ;;  %v7405_v60 = vadd.f32 %v5542_v61, %v5540_v2  ;;  %v7416_v3 = vsel %vm6154_vm3, %v7331_v10, -3.4028235e+38 }
 0x3db   : > { %5545 = vpow2.f32 %v3255_v26  ;;  %v3325_v10 = vmul.f32 0.0, %v7202_v46 }
 0x3dc   : > { %3619 = vmatmul.bf16.gmra.mxu0 %v3561_v1  ;;  %3708 = vmatmul.bf16.gmra.mxu1 %v3562_v21 }
 0x3dd   : > { %v7407_v41 = vpop.xlane.xlu1 %2955  ;;  %v5269_v1 = vld [vmem:[#allocation2 + $0xf0] sm:$0xff] }
 0x3de   : > { %v3163_v22 = vsub.f32 %v7186_v49, %v7407_v41  ;;  %v3164_v4 = vsub.f32 %v7190_v63, %v7407_v41  ;;  %v2966_v63 = vmax.f32 %v7416_v3, %v7421_v30  ;;  %5213 = vmatmul.msk.bf16.gmra.mxu2 %vm1036_vm0, %v5269_v1  ;;  %5229 = vmatmul.msk.bf16.gmra.mxu3 %vm1036_vm0, %v5269_v1 }
 0x3e0   : > { %v3257_v29 = vmul.f32 1.442695, %v3163_v22  ;;  %v3259_v26 = vmul.f32 1.442695, %v3164_v4  ;;  %v5544_v2 = vpop.eup %5543 }
 0x3e1   : > { %v5546_v49 = vpop.eup %5545 }
 0x3e2   : > { %5547 = vpow2.f32 %v3257_v29  ;;  %v7427_v61 = vadd.f32 %v5546_v49, %v5544_v2 }
 0x3e3   : > { %5549 = vpow2.f32 %v3259_v26 }
 0x3e4   : > { %2967 = vmax.xlane.f32.xlu2 %v2966_v63  ;;  %v7444_v63 = vpop.f32.mrf.mxu2 }
 0x3e8   : > { %v3359_v62 = vpop.xlane.xlu0 %3358  ;;  %v5548_v36 = vpop.eup %5547 }
 0x3e9   : > { %v7430_v51 = vadd.f32 %v3359_v62, %v3325_v10  ;;  %v5550_v21 = vpop.eup %5549  ;;  %v3563_v20 = vpack.c.bf16 %v5548_v36, %v5544_v2  ;;  %v7446_v10 = vpop.f32.mrf.mxu3 }
 0x3ea   : > { %v3564_v9 = vpack.c.bf16 %v5550_v21, %v5546_v49  ;;  %v7434_v22 = vadd.f32 %v5550_v21, %v5548_v36  ;;  %v3043_v49 = vsub.f32 -inf, %v7278_v55 }
 0x3ec   : > { %3624 = vmatmul.bf16.gmra.mxu0 %v3563_v20  ;;  %3373 = vadd.xlane.f32.xlu2 %v7289_v17  ;;  %v3081_v17 = vmul.f32 1.442695, %v3043_v49  ;;  %v2667_v20 = vpop.f32.mrf.mxu2 }
 0x3ed   : > { %3713 = vmatmul.bf16.gmra.mxu1 %v3564_v9 }
 0x3f0   : > { %v7437_v46 = vpop.xlane.xlu0 %2961 }
 0x3f1   : > { %v3167_v4 = vsub.f32 %v7208_v5, %v7437_v46  ;;  %v3168_v29 = vsub.f32 %v7212_v48, %v7437_v46  ;;  %v7455_v5 = vsel %vm6154_vm3, %v2662_v59, -3.4028235e+38  ;;  %v7459_v48 = vsel %vm6158_vm4, %v2751_v32, -3.4028235e+38  ;;  %v2756_v9 = vpop.f32.mrf.mxu3 }
 0x3f2   : > { %v2972_v21 = vmax.f32 %v7455_v5, %v7459_v48  ;;  %v7472_v32 = vsel %vm6154_vm3, %v2667_v20, -3.4028235e+38 }
 0x3f3   : > { %v3265_v26 = vmul.f32 1.442695, %v3167_v4  ;;  %v3267_v2 = vmul.f32 1.442695, %v3168_v29  ;;  %v7476_v29 = vsel %vm6158_vm4, %v2756_v9, -3.4028235e+38 }
 0x3f4   : > { %v3045_v9 = vsub.f32 -inf, %v7304_v37  ;;  %v3327_v37 = vmul.f32 0.0, %v7261_v39 }
 0x3f5   : > { %5551 = vpow2.f32 %v3265_v26 }
 0x3f6   : > { %5553 = vpow2.f32 %v3267_v2  ;;  %v7484_v2 = vpop.permute.xlu2 %3951 }
 0x3f7   : > { %5555 = vpow2.f32 %v3081_v17  ;;  %8798 = vst [vmem:[#allocation107_spill] sm:$0xff] %v7484_v2  ;;  %v3044_v17 = vsub.f32 -inf, %v7292_v31  ;;  %v3085_v31 = vmul.f32 1.442695, %v3045_v9 }
 0x3f8   : > { %3370 = vadd.xlane.f32.xlu1 %v7266_v27  ;;  %v7449_v62 = vpop.f32.mrf.mxu0 }
 0x3f9   : > { %v7451_v1 = vpop.f32.mrf.mxu1  ;;  %v3083_v35 = vmul.f32 1.442695, %v3044_v17 }
 0x3fb   : > { %v5552_v55 = vpop.eup %5551  ;;  %5557 = vpow2.f32 %v3083_v35 }
 0x3fc   : > { %v5554_v36 = vpop.eup %5553 }
 0x3fd   : > { %v7463_v27 = vadd.f32 %v5554_v36, %v5552_v55  ;;  %v7478_v26 = vpop.eup %5555 }
 0x400   : > { %2973 = vmax.xlane.f32.xlu1 %v2972_v21  ;;  %v7466_v4 = vpop.f32.mrf.mxu0 }
 0x401   : > { %3376 = vadd.xlane.f32.xlu0 %v7302_v50  ;;  %v7468_v59 = vpop.f32.mrf.mxu1  ;;  %v2978_v50 = vmax.f32 %v7472_v32, %v7476_v29 }
 0x404   : > { %3963 = vrot.lane.b32.xlu2 %v7478_v26, %s5940_s26 }
 0x408   : > { %v3595_v49 = vpop.f32.mrf.mxu0 }
 0x409   : > { %2979 = vmax.xlane.f32.xlu0 %v2978_v50  ;;  %v3684_v21 = vpop.f32.mrf.mxu1 }
 0x40a   : > { %v7487_v20 = vadd.f32 %v3684_v21, %v3595_v49  ;;  %v7505_v21 = vpop.permute.xlu1 %3953 }
 0x40b   : > { %8803 = vst [vmem:[#allocation112_spill] sm:$0xff] %v7505_v21 }
 0x40c   : > { %8799 = vst [vmem:[#allocation108_spill] sm:$0xff] %v7487_v20 }
 0x40e   : > { %v7490_v57 = vpop.xlane.xlu2 %2958 }
 0x40f   : > { %v3165_v12 = vsub.f32 %v7271_v18, %v7490_v57  ;;  %v3166_v25 = vsub.f32 %v7276_v40, %v7490_v57  ;;  %v7503_v18 = vpop.eup %5557 }
 0x410   : > { %v7496_v50 = vpop.f32.mrf.mxu0  ;;  %8802 = vst [vmem:[#allocation111_spill] sm:$0xff] %v7503_v18 }
 0x411   : > { %v3261_v23 = vmul.f32 1.442695, %v3165_v12  ;;  %v3263_v2 = vmul.f32 1.442695, %v3166_v25  ;;  %8800 = vst [vmem:[#allocation109_spill] sm:$0xff] %v7496_v50  ;;  %v7498_v28 = vpop.f32.mrf.mxu1 }
 0x412   : > { %8801 = vst [vmem:[#allocation110_spill] sm:$0xff] %v7498_v28 }
 0x413   : > { %5559 = vpow2.f32 %v3261_v23 }
 0x414   : > { %5561 = vpow2.f32 %v3263_v2 }
 0x415   : > { %5563 = vpow2.f32 %v3085_v31  ;;  %v3326_v31 = vmul.f32 0.0, %v7230_v53 }
 0x416   : > { %v3365_v49 = vpop.xlane.xlu2 %3364 }
 0x417   : > { %v7501_v17 = vadd.f32 %v3365_v49, %v3327_v37 }
 0x418   : > { %v7507_v12 = vpop.f32.mrf.mxu0 }
 0x419   : > { %8804 = vst [vmem:[#allocation113_spill] sm:$0xff] %v7507_v12  ;;  %3965 = vrot.lane.b32.xlu1 %v7503_v18, %s5940_s26  ;;  %v5560_v35 = vpop.eup %5559  ;;  %v7511_v25 = vpop.f32.mrf.mxu1  ;;  %v3328_v12 = vmul.f32 0.0, %v7345_v11 }
 0x41a   : > { %8805 = vst [vmem:[#allocation114_spill] sm:$0xff] %v7511_v25  ;;  %v5562_v23 = vpop.eup %5561  ;;  %v3565_v40 = vpack.c.bf16 %v5552_v55, %v5560_v35 }
 0x41b   : > { %v7513_v39 = vpop.eup %5563  ;;  %v3566_v2 = vpack.c.bf16 %v5554_v36, %v5562_v23  ;;  %v7515_v9 = vadd.f32 %v5562_v23, %v5560_v35  ;;  %v7529_v36 = vsel %vm6154_vm3, %v7444_v63, -3.4028235e+38  ;;  %v7534_v35 = vsel %vm6158_vm4, %v7446_v10, -3.4028235e+38  ;;  %v7536_v23 = vpop.permute.xlu0 %3955 }
 0x41c   : > { %8806 = vst [vmem:[#allocation115_spill] sm:$0xff] %v7513_v39  ;;  %3629 = vmatmul.bf16.gmra.mxu0 %v3565_v40  ;;  %v631_v40 = vld [vmem:[%s6060_s10 + $0x1f0] sm:$0xff]  ;;  %v2975_v63 = vmax.f32 %v7529_v36, %v7534_v35 }
 0x41d   : > { %3967 = vrot.lane.b32.xlu0 %v7513_v39, %s5940_s26  ;;  %3718 = vmatmul.bf16.gmra.mxu1 %v3566_v2  ;;  %8809 = vst [vmem:[#allocation118_spill] sm:$0xff] %v7536_v23  ;;  %v632_v2 = vld [vmem:[%s6060_s10 + $0x1f8] sm:$0xff]  ;;  %v695_v21 = vmul.f32 0.125, %v631_v40  ;;  %v2670_v40 = vpop.f32.mrf.mxu2  ;;  %s4805_s10 = sshll.u32 %s4802_s8, 4  ;;  %s4806_s10 = int_to_ptr.hbm [resolvable:$true] %s4805_s10 }
 0x41e   : > { %s5873_s12 = sshra.s32 %s4806_s10, 4  ;;  %s5874_s12 = int_to_ptr.hbm [resolvable:$true] %s5873_s12 }
 0x41f   : > { %v759_v20 = vpack.c.bf16 %v695_v21, %v695_v21  ;;  %s5875_s13 = scalar_lea.hbm %s5874_s12, 256  ;;  %p5880_p1 = scmp.lt.s32.totalorder %s5874_s12, %s8650_s4 }
 0x420   : > { %v3362_v37 = vpop.xlane.xlu1 %3361  ;;  %v7522_v18 = vpop.f32.mrf.mxu0  ;;  %p5876_p12 = scmp.ne.s32.totalorder %s5874_s12, %s5875_s13  ;;  %p5881_p2 = scmp.lt.s32.totalorder %s5879_s22, %s5875_s13 }
 0x421   : > { %v7520_v49 = vadd.f32 %v3362_v37, %v3326_v31  ;;  %8807 = vst [vmem:[#allocation116_spill] sm:$0xff] %v7522_v18  ;;  %v7524_v55 = vpop.f32.mrf.mxu1 }
 0x422   : > { %8808 = vst [vmem:[#allocation117_spill] sm:$0xff] %v7524_v55  ;;  %v696_v55 = vmul.f32 0.125, %v632_v2  ;;  %v2759_v2 = vpop.f32.mrf.mxu3  ;;  %p5877_p13 = pnand %p5876_p12, %p6008_p4  ;;  %p5882_p3 = por %p5881_p2, %p5880_p1 }
 0x423   : > { %824 = vst.msk [vmem:[#allocation2 + $0xf8] sm:$0xf] %vm761_vm1, %v759_v20 }
 0x424   : > { %v760_v25 = vpack.c.bf16 %v696_v55, %v696_v55  ;;  %p5878_p0 = pneg %p5877_p13 }
 0x426   : > { %825 = vst.msk [vmem:[#allocation2 + $0xfc] sm:$0xf] %vm761_vm1, %v760_v25  ;;  %p5883_p5 = pnand %p5882_p3, %p5878_p0 }
 0x428   : > { %v7538_v53 = vpop.xlane.xlu1 %2964  ;;  %v7546_v39 = vpop.f32.mrf.mxu0 }
 0x429   : > { %v3169_v31 = vsub.f32 %v7321_v47, %v7538_v53  ;;  %v3170_v37 = vsub.f32 %v7325_v0, %v7538_v53  ;;  %8810 = vst [vmem:[#allocation119_spill] sm:$0xff] %v7546_v39  ;;  %v7550_v10 = vpop.f32.mrf.mxu1 }
 0x42a   : > { %8811 = vst [vmem:[#allocation120_spill] sm:$0xff] %v7550_v10  ;;  %v7584_v10 = vpop.f32.mrf.mxu3 }
 0x42b   : > { %v3269_v23 = vmul.f32 1.442695, %v3169_v31  ;;  %v3271_v18 = vmul.f32 1.442695, %v3170_v37 }
 0x42d   : > { %2976 = vmax.xlane.f32.xlu2 %v2975_v63  ;;  %5565 = vpow2.f32 %v3269_v23  ;;  %v5270_v20 = vld [vmem:[#allocation2 + $0xf8] sm:$0xff] }
 0x42e   : > { %v3368_v47 = vpop.xlane.xlu0 %3367  ;;  %5567 = vpow2.f32 %v3271_v18  ;;  %5214 = vmatmul.msk.bf16.gmra.mxu2 %vm1036_vm0, %v5270_v20  ;;  %5230 = vmatmul.msk.bf16.gmra.mxu3 %vm1036_vm0, %v5270_v20 }
 0x42f   : > { %v7554_v0 = vadd.f32 %v3368_v47, %v3328_v12  ;;  %v7582_v47 = vpop.f32.mrf.mxu2 }
 0x430   : > { %v7557_v39 = vpop.f32.mrf.mxu0 }
 0x431   : > { %8812 = vst [vmem:[#allocation121_spill] sm:$0xff] %v7557_v39  ;;  %v7559_v31 = vpop.f32.mrf.mxu1 }
 0x432   : > { %8813 = vst [vmem:[#allocation122_spill] sm:$0xff] %v7559_v31 }
 0x433   : > { %v7561_v21 = vpop.eup %5565 }
 0x434   : > { %v7563_v55 = vpop.eup %5567 }
 0x435   : > { %3382 = vadd.xlane.f32.xlu2 %v7337_v38  ;;  %v7570_v18 = vadd.f32 %v7563_v55, %v7561_v21 }
 0x436   : > { %v7566_v11 = vpop.xlane.xlu0 %2970 }
 0x437   : > { %v3173_v12 = vsub.f32 %v7355_v8, %v7566_v11  ;;  %v3174_v25 = vsub.f32 %v7359_v54, %v7566_v11  ;;  %v3046_v8 = vsub.f32 -inf, %v7317_v58 }
 0x439   : > { %v3277_v23 = vmul.f32 1.442695, %v3173_v12  ;;  %v3279_v37 = vmul.f32 1.442695, %v3174_v25  ;;  %v7578_v38 = vpop.f32.mrf.mxu0  ;;  %v7580_v63 = vpop.f32.mrf.mxu1  ;;  %v3087_v39 = vmul.f32 1.442695, %v3046_v8 }
 0x43a   : > { %8814 = vst [vmem:[#allocation123_spill] sm:$0xff] %v7578_v38  ;;  %v7598_v25 = vsel %vm6154_vm3, %v2670_v40, -3.4028235e+38  ;;  %v2764_v8 = vpop.f32.mrf.mxu3 }
 0x43b   : > { %8815 = vst [vmem:[#allocation124_spill] sm:$0xff] %v7580_v63  ;;  %5569 = vpow2.f32 %v3277_v23  ;;  %v7602_v23 = vsel %vm6158_vm4, %v2759_v2, -3.4028235e+38  ;;  %v7617_v2 = vsel %vm6158_vm4, %v2764_v8, -3.4028235e+38  ;;  %v7629_v63 = vpop.permute.xlu2 %3957 }
 0x43c   : > { %5571 = vpow2.f32 %v3279_v37  ;;  %v2675_v37 = vpop.f32.mrf.mxu2  ;;  %8821 = vst [vmem:[#allocation130_spill] sm:$0xff] %v7629_v63 }
 0x43d   : > { %5573 = vpow2.f32 %v3087_v39  ;;  %v7613_v40 = vsel %vm6154_vm3, %v2675_v37, -3.4028235e+38 }
 0x43e   : > { %v2987_v39 = vmax.f32 %v7613_v40, %v7617_v2 }
 0x441   : > { %v7587_v31 = vpop.f32.mrf.mxu0  ;;  %v7589_v54 = vpop.eup %5569 }
 0x442   : > { %8816 = vst [vmem:[#allocation125_spill] sm:$0xff] %v7587_v31  ;;  %v7591_v20 = vpop.f32.mrf.mxu1  ;;  %v7593_v12 = vpop.eup %5571 }
 0x443   : > { %8817 = vst [vmem:[#allocation126_spill] sm:$0xff] %v7591_v20  ;;  %3379 = vadd.xlane.f32.xlu1 %v7314_v52  ;;  %v7606_v58 = vadd.f32 %v7593_v12, %v7589_v54  ;;  %v2981_v52 = vmax.f32 %v7598_v25, %v7602_v23 }
 0x447   : > { %3385 = vadd.xlane.f32.xlu0 %v7351_v34  ;;  %v7625_v34 = vpop.eup %5573 }
 0x448   : > { %8820 = vst [vmem:[#allocation129_spill] sm:$0xff] %v7625_v34 }
 0x449   : > { %v7619_v20 = vpop.f32.mrf.mxu0 }
 0x44a   : > { %8818 = vst [vmem:[#allocation127_spill] sm:$0xff] %v7619_v20  ;;  %v7621_v31 = vpop.f32.mrf.mxu1  ;;  %v3047_v20 = vsub.f32 -inf, %v7339_v7  ;;  %v3330_v7 = vmul.f32 0.0, %v7395_v14 }
 0x44b   : > { %8819 = vst [vmem:[#allocation128_spill] sm:$0xff] %v7621_v31  ;;  %2982 = vmax.xlane.f32.xlu1 %v2981_v52  ;;  %v3048_v31 = vsub.f32 -inf, %v7361_v45 }
 0x44c   : > { %v3089_v52 = vmul.f32 1.442695, %v3047_v20 }
 0x44d   : > { %3969 = vrot.lane.b32.xlu2 %v7625_v34, %s5940_s26  ;;  %v3091_v28 = vmul.f32 1.442695, %v3048_v31 }
 0x44e   : > { %5575 = vpow2.f32 %v3089_v52  ;;  %v7656_v52 = vpop.permute.xlu1 %3959 }
 0x44f   : > { %2988 = vmax.xlane.f32.xlu0 %v2987_v39  ;;  %5577 = vpow2.f32 %v3091_v28  ;;  %8829 = vst [vmem:[#allocation138_spill] sm:$0xff] %v7656_v52 }
 0x451   : > { %v7631_v37 = vpop.f32.mrf.mxu0 }
 0x452   : > { %8822 = vst [vmem:[#allocation131_spill] sm:$0xff] %v7631_v37  ;;  %v7633_v8 = vpop.f32.mrf.mxu1 }
 0x453   : > { %8823 = vst [vmem:[#allocation132_spill] sm:$0xff] %v7633_v8 }
 0x454   : > { %v7648_v20 = vpop.eup %5575 }
 0x455   : > { %8825 = vst [vmem:[#allocation134_spill] sm:$0xff] %v7648_v20 }
 0x457   : > { %v7637_v38 = vpop.xlane.xlu2 %2967 }
 0x458   : > { %v3171_v50 = vsub.f32 %v7416_v3, %v7637_v38  ;;  %v3172_v34 = vsub.f32 %v7421_v30, %v7637_v38  ;;  %v7652_v30 = vpop.eup %5577 }
 0x459   : > { %v3620_v63 = vpop.f32.mrf.mxu0  ;;  %8827 = vst [vmem:[#allocation136_spill] sm:$0xff] %v7652_v30 }
 0x45a   : > { %v3273_v39 = vmul.f32 1.442695, %v3171_v50  ;;  %v3275_v19 = vmul.f32 1.442695, %v3172_v34  ;;  %v3709_v37 = vpop.f32.mrf.mxu1 }
 0x45b   : > { %v7643_v8 = vadd.f32 %v3709_v37, %v3620_v63 }
 0x45c   : > { %5579 = vpow2.f32 %v3273_v39 }
 0x45d   : > { %8824 = vst [vmem:[#allocation133_spill] sm:$0xff] %v7643_v8  ;;  %5581 = vpow2.f32 %v3275_v19  ;;  %v7671_v8 = vpop.permute.xlu0 %3961 }
 0x45e   : > { %8832 = vst [vmem:[#allocation141_spill] sm:$0xff] %v7671_v8 }
 0x45f   : > { %v3374_v45 = vpop.xlane.xlu2 %3373 }
 0x460   : > { %v7646_v31 = vadd.f32 %v3374_v45, %v3330_v7  ;;  %v3329_v7 = vmul.f32 0.0, %v7381_v24 }
 0x461   : > { %v7650_v3 = vpop.f32.mrf.mxu0 }
 0x462   : > { %8826 = vst [vmem:[#allocation135_spill] sm:$0xff] %v7650_v3  ;;  %v7654_v50 = vpop.f32.mrf.mxu1  ;;  %v5580_v34 = vpop.eup %5579 }
 0x463   : > { %8828 = vst [vmem:[#allocation137_spill] sm:$0xff] %v7654_v50  ;;  %3973 = vrot.lane.b32.xlu0 %v7652_v30, %s5940_s26  ;;  %v5582_v19 = vpop.eup %5581  ;;  %v3567_v28 = vpack.c.bf16 %v5580_v34, %v7561_v21  ;;  %v7678_v21 = vsel %vm6154_vm3, %v7582_v47, -3.4028235e+38  ;;  %v2766_v3 = vpop.f32.mrf.mxu3 }
 0x464   : > { %3971 = vrot.lane.b32.xlu1 %v7648_v20, %s5940_s26  ;;  %v3568_v14 = vpack.c.bf16 %v5582_v19, %v7563_v55  ;;  %v7664_v63 = vadd.f32 %v5582_v19, %v5580_v34  ;;  %v7683_v55 = vsel %vm6158_vm4, %v7584_v10, -3.4028235e+38 }
 0x465   : > { %3634 = vmatmul.bf16.gmra.mxu0 %v3567_v28 }
 0x466   : > { %3723 = vmatmul.bf16.gmra.mxu1 %v3568_v14 }
 0x469   : > { %v7666_v37 = vpop.f32.mrf.mxu0 }
 0x46a   : > { %8830 = vst [vmem:[#allocation139_spill] sm:$0xff] %v7666_v37  ;;  %v7668_v39 = vpop.f32.mrf.mxu1  ;;  %v2677_v37 = vpop.f32.mrf.mxu2 }
 0x46b   : > { %8831 = vst [vmem:[#allocation140_spill] sm:$0xff] %v7668_v39  ;;  %v3371_v45 = vpop.xlane.xlu1 %3370 }
 0x46c   : > { %v7673_v50 = vadd.f32 %v3371_v45, %v3329_v7  ;;  %v2984_v45 = vmax.f32 %v7678_v21, %v7683_v55 }
 0x471   : > { %v3627_v34 = vpop.f32.mrf.mxu0 }
 0x472   : > { %v3716_v19 = vpop.f32.mrf.mxu1 }
 0x473   : > { %v7685_v28 = vadd.f32 %v3716_v19, %v3627_v34  ;;  %v7687_v24 = vpop.xlane.xlu1 %2973 }
 0x474   : > { %v7689_v14 = vpop.xlane.xlu0 %3376  ;;  %v3175_v7 = vsub.f32 %v7455_v5, %v7687_v24  ;;  %v3176_v47 = vsub.f32 %v7459_v48, %v7687_v24 }
 0x475   : > { %8833 = vst [vmem:[#allocation142_spill] sm:$0xff] %v7685_v28 }
 0x476   : > { %v3281_v39 = vmul.f32 1.442695, %v3175_v7  ;;  %v3283_v10 = vmul.f32 1.442695, %v3176_v47  ;;  %2985 = vmax.xlane.f32.xlu2 %v2984_v45 }
 0x478   : > { %5583 = vpow2.f32 %v3281_v39  ;;  %v2680_v39 = vpop.f32.mrf.mxu2 }
 0x479   : > { %5585 = vpow2.f32 %v3283_v10  ;;  %v2769_v10 = vpop.f32.mrf.mxu3 }
 0x47c   : > { %v7697_v34 = vpop.xlane.xlu0 %2979 }
 0x47d   : > { %v3179_v19 = vsub.f32 %v7472_v32, %v7697_v34  ;;  %v3180_v5 = vsub.f32 %v7476_v29, %v7697_v34  ;;  %v3049_v32 = vsub.f32 -inf, %v7372_v6  ;;  %v7723_v6 = vsel %vm6154_vm3, %v2677_v37, -3.4028235e+38 }
 0x47e   : > { %3391 = vadd.xlane.f32.xlu2 %v7379_v13  ;;  %v5584_v48 = vpop.eup %5583  ;;  %v3051_v37 = vsub.f32 -inf, %v7393_v44 }
 0x47f   : > { %v3289_v28 = vmul.f32 1.442695, %v3179_v19  ;;  %v3291_v30 = vmul.f32 1.442695, %v3180_v5  ;;  %v5586_v7 = vpop.eup %5585  ;;  %v3569_v47 = vpack.c.bf16 %v5584_v48, %v7589_v54  ;;  %v3093_v19 = vmul.f32 1.442695, %v3049_v32 }
 0x480   : > { %v3570_v45 = vpack.c.bf16 %v5586_v7, %v7593_v12  ;;  %v7706_v20 = vadd.f32 %v5586_v7, %v5584_v48  ;;  %v2682_v5 = vpop.f32.mrf.mxu2  ;;  %v3097_v48 = vmul.f32 1.442695, %v3051_v37 }
 0x481   : > { %5587 = vpow2.f32 %v3289_v28  ;;  %3639 = vmatmul.bf16.gmra.mxu0 %v3569_v47  ;;  %v2771_v52 = vpop.f32.mrf.mxu3  ;;  %v7715_v54 = vsel %vm6154_vm3, %v2682_v5, -3.4028235e+38 }
 0x482   : > { %5589 = vpow2.f32 %v3291_v30  ;;  %3728 = vmatmul.bf16.gmra.mxu1 %v3570_v45  ;;  %v7719_v12 = vsel %vm6158_vm4, %v2771_v52, -3.4028235e+38  ;;  %v7727_v30 = vsel %vm6158_vm4, %v2766_v3, -3.4028235e+38  ;;  %v7737_v52 = vpop.permute.xlu2 %3963  ;;  %v3050_v3 = vsub.f32 -inf, %v7383_v43 }
 0x483   : > { %5591 = vpow2.f32 %v3093_v19  ;;  %8834 = vst [vmem:[#allocation143_spill] sm:$0xff] %v7737_v52 }
 0x484   : > { %5593 = vpow2.f32 %v3097_v48  ;;  %v3095_v5 = vmul.f32 1.442695, %v3050_v3 }
 0x487   : > { %v5588_v29 = vpop.eup %5587 }
 0x488   : > { %v5590_v13 = vpop.eup %5589 }
 0x489   : > { %v7709_v8 = vadd.f32 %v5590_v13, %v5588_v29  ;;  %v7733_v28 = vpop.eup %5591 }
 0x48d   : > { %3394 = vadd.xlane.f32.xlu0 %v7391_v42  ;;  %v2990_v42 = vmax.f32 %v7723_v6, %v7727_v30 }
 0x48e   : > { %3388 = vadd.xlane.f32.xlu1 %v7370_v33  ;;  %v2996_v33 = vmax.f32 %v7715_v54, %v7719_v12 }
 0x495   : > { %2997 = vmax.xlane.f32.xlu0 %v2996_v33  ;;  %v7747_v33 = vpop.eup %5593 }
 0x496   : > { %2991 = vmax.xlane.f32.xlu1 %v2990_v42  ;;  %3975 = vrot.lane.b32.xlu2 %v7733_v28, %s5940_s26  ;;  %8835 = vst [vmem:[#allocation144_spill] sm:$0xff] %v7747_v33 }
 0x4a0   : > { %v7741_v7 = vpop.xlane.xlu2 %2976 }
 0x4a1   : > { %v3177_v47 = vsub.f32 %v7529_v36, %v7741_v7  ;;  %v3178_v45 = vsub.f32 %v7534_v35, %v7741_v7  ;;  %v7753_v36 = vpop.permute.xlu1 %3965 }
 0x4a3   : > { %v3285_v32 = vmul.f32 1.442695, %v3177_v47  ;;  %v3287_v19 = vmul.f32 1.442695, %v3178_v45  ;;  %v7763_v47 = vsel %vm6154_vm3, %v2680_v39, -3.4028235e+38 }
 0x4a5   : > { %5595 = vpow2.f32 %v3285_v32 }
 0x4a6   : > { %5597 = vpow2.f32 %v3287_v19 }
 0x4a7   : > { %5599 = vpow2.f32 %v3095_v5 }
 0x4a9   : > { %3979 = vrot.lane.b32.xlu0 %v7747_v33, %s5940_s26  ;;  %v7783_v33 = vpop.f32.mrf.mxu1 }
 0x4aa   : > { %8838 = vst [vmem:[#allocation147_spill] sm:$0xff] %v7783_v33 }
 0x4ab   : > { %v5596_v43 = vpop.eup %5595 }
 0x4ac   : > { %v5598_v44 = vpop.eup %5597  ;;  %v3571_v42 = vpack.c.bf16 %v5588_v29, %v5596_v43  ;;  %v7767_v29 = vsel %vm6158_vm4, %v2769_v10, -3.4028235e+38 }
 0x4ad   : > { %v7751_v37 = vpop.eup %5599  ;;  %v3572_v35 = vpack.c.bf16 %v5590_v13, %v5598_v44  ;;  %v7755_v48 = vadd.f32 %v5598_v44, %v5596_v43  ;;  %v2993_v13 = vmax.f32 %v7763_v47, %v7767_v29 }
 0x4ae   : > { %8836 = vst [vmem:[#allocation145_spill] sm:$0xff] %v7751_v37  ;;  %3644 = vmatmul.bf16.gmra.mxu0 %v3571_v42  ;;  %v3052_v42 = vsub.f32 -inf, %v7407_v41 }
 0x4af   : > { %3977 = vrot.lane.b32.xlu1 %v7751_v37, %s5940_s26  ;;  %3733 = vmatmul.bf16.gmra.mxu1 %v3572_v35  ;;  %v7781_v35 = vpop.f32.mrf.mxu0 }
 0x4b0   : > { %8837 = vst [vmem:[#allocation146_spill] sm:$0xff] %v7781_v35 }
 0x4b6   : > { %v7759_v3 = vpop.xlane.xlu1 %3379 }
 0x4be   : > { %v7771_v45 = vpop.xlane.xlu1 %2982 }
 0x4bf   : > { %v3181_v32 = vsub.f32 %v7598_v25, %v7771_v45  ;;  %v3182_v19 = vsub.f32 %v7602_v23, %v7771_v45  ;;  %2994 = vmax.xlane.f32.xlu2 %v2993_v13  ;;  %v3099_v25 = vmul.f32 1.442695, %v3052_v42  ;;  %v7787_v23 = vpop.xlane.xlu2 %3382  ;;  %v2685_v13 = vpop.f32.mrf.mxu2 }
 0x4c0   : > { %v7792_v41 = vsel %vm6154_vm3, %v2685_v13, -3.4028235e+38  ;;  %v3054_v13 = vsub.f32 -inf, %v7437_v46 }
 0x4c1   : > { %v3293_v5 = vmul.f32 1.442695, %v3181_v32  ;;  %v3295_v43 = vmul.f32 1.442695, %v3182_v19 }
 0x4c3   : > { %5601 = vpow2.f32 %v3293_v5  ;;  %v7800_v5 = vpop.f32.mrf.mxu1 }
 0x4c4   : > { %5603 = vpow2.f32 %v3295_v43  ;;  %8840 = vst [vmem:[#allocation149_spill] sm:$0xff] %v7800_v5  ;;  %v3103_v5 = vmul.f32 1.442695, %v3054_v13 }
 0x4c5   : > { %5605 = vrcp.f32 %v7430_v51 }
 0x4c6   : > { %5607 = vpow2.f32 %v3099_v25 }
 0x4c7   : > { %3400 = vadd.xlane.f32.xlu2 %v7427_v61  ;;  %v2774_v61 = vpop.f32.mrf.mxu3  ;;  %v7812_v33 = vpop.permute.xlu2 %3969  ;;  %5609 = vpow2.f32 %v3103_v5 }
 0x4c8   : > { %v7796_v19 = vsel %vm6158_vm4, %v2774_v61, -3.4028235e+38  ;;  %8842 = vst [vmem:[#allocation151_spill] sm:$0xff] %v7812_v33 }
 0x4c9   : > { %v5602_v39 = vpop.eup %5601  ;;  %v2999_v42 = vmax.f32 %v7792_v41, %v7796_v19 }
 0x4ca   : > { %v5604_v10 = vpop.eup %5603 }
 0x4cb   : > { %v7778_v44 = vadd.f32 %v5604_v10, %v5602_v39  ;;  %v5606_v32 = vpop.eup %5605 }
 0x4cc   : > { %v4434_v43 = vmul.f32 %v5606_v32, %v7430_v51  ;;  %v7805_v25 = vpop.eup %5607 }
 0x4ce   : > { %v4466_v61 = vsub.f32 2.0, %v4434_v43 }
 0x4d0   : > { %v4498_v37 = vmul.f32 %v5606_v32, %v4466_v61 }
 0x4d3   : > { %3403 = vadd.xlane.f32.xlu0 %v7434_v22  ;;  %v7798_v22 = vpop.f32.mrf.mxu0 }
 0x4d4   : > { %8839 = vst [vmem:[#allocation148_spill] sm:$0xff] %v7798_v22 }
 0x4d9   : > { %3397 = vadd.xlane.f32.xlu1 %v7405_v60  ;;  %v7807_v60 = vpop.permute.xlu0 %3967 }
 0x4da   : > { %8841 = vst [vmem:[#allocation150_spill] sm:$0xff] %v7807_v60 }
 0x4df   : > { %3981 = vrot.lane.b32.xlu2 %v7805_v25, %s5940_s26 }
 0x4e1   : > { %3000 = vmax.xlane.f32.xlu1 %v2999_v42  ;;  %v7816_v52 = vpop.xlane.xlu0 %3385  ;;  %v3053_v42 = vsub.f32 -inf, %v7490_v57 }
 0x4e2   : > { %v3635_v22 = vpop.f32.mrf.mxu0 }
 0x4e3   : > { %v3724_v35 = vpop.f32.mrf.mxu1  ;;  %v3101_v32 = vmul.f32 1.442695, %v3053_v42 }
 0x4e4   : > { %v7814_v51 = vadd.f32 %v3724_v35, %v3635_v22  ;;  %v7826_v35 = vpop.eup %5609 }
 0x4e5   : > { %8844 = vst [vmem:[#allocation153_spill] sm:$0xff] %v7826_v35 }
 0x4e6   : > { %8843 = vst [vmem:[#allocation152_spill] sm:$0xff] %v7814_v51 }
 0x4e7   : > { %4562 = vrot.lane.b32.xlu0 %v4498_v37, %s5940_s26 }
 0x4e9   : > { %v7819_v60 = vpop.xlane.xlu2 %2985  ;;  %v7830_v37 = vpop.xlane.xlu0 %2988 }
 0x4ea   : > { %v3183_v46 = vsub.f32 %v7678_v21, %v7819_v60  ;;  %v3184_v43 = vsub.f32 %v7683_v55, %v7819_v60  ;;  %v7832_v61 = vpop.f32.mrf.mxu0  ;;  %v3185_v51 = vsub.f32 %v7613_v40, %v7830_v37 }
 0x4eb   : > { %8845 = vst [vmem:[#allocation154_spill] sm:$0xff] %v7832_v61 }
 0x4ec   : > { %v3297_v13 = vmul.f32 1.442695, %v3183_v46  ;;  %v3299_v33 = vmul.f32 1.442695, %v3184_v43  ;;  %v7838_v43 = vpop.f32.mrf.mxu1  ;;  %v3301_v15 = vmul.f32 1.442695, %v3185_v51 }
 0x4ed   : > { %8847 = vst [vmem:[#allocation156_spill] sm:$0xff] %v7838_v43 }
 0x4ee   : > { %5611 = vpow2.f32 %v3297_v13  ;;  %v7842_v13 = vpop.permute.xlu1 %3971 }
 0x4ef   : > { %3985 = vrot.lane.b32.xlu0 %v7826_v35, %s5940_s26  ;;  %5613 = vpow2.f32 %v3299_v33  ;;  %8849 = vst [vmem:[#allocation158_spill] sm:$0xff] %v7842_v13  ;;  %v2687_v33 = vpop.f32.mrf.mxu2 }
 0x4f0   : > { %5615 = vpow2.f32 %v3101_v32 }
 0x4f1   : > { %v7836_v46 = vpop.permute.xlu0 %3973  ;;  %5617 = vpow2.f32 %v3301_v15 }
 0x4f2   : > { %8846 = vst [vmem:[#allocation155_spill] sm:$0xff] %v7836_v46 }
 0x4f4   : > { %v5612_v22 = vpop.eup %5611 }
 0x4f5   : > { %v5614_v21 = vpop.eup %5613  ;;  %v3573_v5 = vpack.c.bf16 %v5612_v22, %v5602_v39  ;;  %v2776_v39 = vpop.f32.mrf.mxu3 }
 0x4f6   : > { %v3574_v55 = vpack.c.bf16 %v5614_v21, %v5604_v10  ;;  %v7834_v57 = vadd.f32 %v5614_v21, %v5612_v22  ;;  %v7840_v42 = vpop.eup %5615 }
 0x4f7   : > { %3649 = vmatmul.bf16.gmra.mxu0 %v3573_v5  ;;  %8848 = vst [vmem:[#allocation157_spill] sm:$0xff] %v7840_v42  ;;  %v7856_v5 = vsel %vm6154_vm3, %v2687_v33, -3.4028235e+38 }
 0x4f8   : > { %3738 = vmatmul.bf16.gmra.mxu1 %v3574_v55  ;;  %v7860_v55 = vsel %vm6158_vm4, %v2776_v39, -3.4028235e+38 }
 0x4f9   : > { %v3002_v35 = vmax.f32 %v7856_v5, %v7860_v55 }
 0x4fa   : > { %3983 = vrot.lane.b32.xlu1 %v7840_v42, %s5940_s26 }
 0x4fe   : > { %v7846_v32 = vpop.f32.mrf.mxu0 }
 0x4ff   : > { %8850 = vst [vmem:[#allocation159_spill] sm:$0xff] %v7846_v32  ;;  %v7848_v10 = vpop.f32.mrf.mxu1 }
 0x500   : > { %8851 = vst [vmem:[#allocation160_spill] sm:$0xff] %v7848_v10  ;;  %v7850_v22 = vpop.xlane.xlu0 %3394  ;;  %v3186_v10 = vsub.f32 %v7617_v2, %v7830_v37 }
 0x501   : > { %v7852_v21 = vpop.xlane.xlu1 %3388 }
 0x506   : > { %v3642_v32 = vpop.f32.mrf.mxu0 }
 0x507   : > { %v3731_v46 = vpop.f32.mrf.mxu1 }
 0x508   : > { %v7868_v13 = vpop.xlane.xlu0 %2997  ;;  %3003 = vmax.xlane.f32.xlu2 %v3002_v35  ;;  %v7870_v33 = vadd.f32 %v3731_v46, %v3642_v32  ;;  %v3303_v35 = vmul.f32 1.442695, %v3186_v10 }
 0x509   : > { %v3191_v16 = vsub.f32 %v7715_v54, %v7868_v13  ;;  %v3192_v40 = vsub.f32 %v7719_v12, %v7868_v13  ;;  %v7876_v39 = vpop.xlane.xlu1 %2991  ;;  %v7883_v54 = vpop.eup %5617 }
 0x50a   : > { %8852 = vst [vmem:[#allocation161_spill] sm:$0xff] %v7870_v33  ;;  %v3187_v43 = vsub.f32 %v7723_v6, %v7876_v39  ;;  %v3188_v2 = vsub.f32 %v7727_v30, %v7876_v39 }
 0x50b   : > { %v3313_v61 = vmul.f32 1.442695, %v3191_v16  ;;  %v3315_v42 = vmul.f32 1.442695, %v3192_v40  ;;  %v3680_v40 = vadd.f32 %v7451_v1, %v7449_v62  ;;  %v3057_v62 = vsub.f32 -inf, %v7566_v11 }
 0x50c   : > { %v3305_v51 = vmul.f32 1.442695, %v3187_v43  ;;  %v3307_v46 = vmul.f32 1.442695, %v3188_v2 }
 0x50d   : > { %5619 = vpow2.f32 %v3313_v61 }
 0x50e   : > { %5621 = vpow2.f32 %v3315_v42 }
 0x50f   : > { %5623 = vpow2.f32 %v3303_v35  ;;  %v3055_v35 = vsub.f32 -inf, %v7538_v53  ;;  %v3109_v53 = vmul.f32 1.442695, %v3057_v62 }
 0x510   : > { %3409 = vadd.xlane.f32.xlu2 %v7463_v27  ;;  %5625 = vpow2.f32 %v3305_v51  ;;  %v7895_v27 = vpop.xlane.xlu2 %3391 }
 0x511   : > { %5627 = vpow2.f32 %v3307_v46 }
 0x512   : > { %5629 = vrcp.f32 %v7520_v49 }
 0x513   : > { %v5620_v12 = vpop.eup %5619  ;;  %5631 = vrcp.f32 %v7554_v0 }
 0x514   : > { %v5622_v6 = vpop.eup %5621  ;;  %5633 = vrcp.f32 %v7501_v17 }
 0x515   : > { %v7885_v32 = vpop.eup %5623  ;;  %v7887_v30 = vadd.f32 %v5622_v6, %v5620_v12 }
 0x516   : > { %v5626_v16 = vpop.eup %5625 }
 0x517   : > { %v5628_v10 = vpop.eup %5627  ;;  %v3575_v43 = vpack.c.bf16 %v5626_v16, %v7883_v54 }
 0x518   : > { %v3576_v61 = vpack.c.bf16 %v5628_v10, %v7885_v32  ;;  %v7892_v42 = vadd.f32 %v5628_v10, %v5626_v16  ;;  %v5630_v15 = vpop.eup %5629  ;;  %v7905_v46 = vpop.permute.xlu2 %3975  ;;  %v3682_v16 = vadd.f32 %v7468_v59, %v7466_v4  ;;  %v3105_v10 = vmul.f32 1.442695, %v3055_v35 }
 0x519   : > { %3412 = vadd.xlane.f32.xlu0 %v7570_v18  ;;  %3654 = vmatmul.bf16.gmra.mxu0 %v3575_v43  ;;  %v4435_v18 = vmul.f32 %v5630_v15, %v7520_v49  ;;  %v5632_v2 = vpop.eup %5631  ;;  %8853 = vst [vmem:[#allocation162_spill] sm:$0xff] %v7905_v46  ;;  %v8864_v46 = vld [vmem:[#allocation113_spill] sm:$0xff] }
 0x51a   : > { %3743 = vmatmul.bf16.gmra.mxu1 %v3576_v61  ;;  %v5634_v43 = vpop.eup %5633  ;;  %5635 = vpow2.f32 %v3105_v10 }
 0x51b   : > { %v4467_v51 = vsub.f32 2.0, %v4435_v18  ;;  %5637 = vpow2.f32 %v3109_v53 }
 0x51d   : > { %v4499_v1 = vmul.f32 %v5630_v15, %v4467_v51  ;;  %v3056_v15 = vsub.f32 -inf, %v7637_v38 }
 0x520   : > { %v7922_v35 = vpop.eup %5635 }
 0x524   : > { %3406 = vadd.xlane.f32.xlu1 %v7515_v9  ;;  %v4437_v9 = vmul.f32 %v5632_v2, %v7554_v0 }
 0x526   : > { %v4469_v49 = vsub.f32 2.0, %v4437_v9 }
 0x528   : > { %3791 = vrot.lane.b32.xlu2 %v3680_v40, %s5940_s26  ;;  %v4436_v40 = vmul.f32 %v5634_v43, %v7501_v17  ;;  %v4501_v0 = vmul.f32 %v5632_v2, %v4469_v49  ;;  %v3107_v17 = vmul.f32 1.442695, %v3056_v15 }
 0x52a   : > { %v4468_v51 = vsub.f32 2.0, %v4436_v40 }
 0x52d   : > { %3793 = vrot.lane.b32.xlu0 %v3682_v16, %s5940_s26  ;;  %v7926_v16 = vpop.eup %5637 }
 0x52e   : > { %8854 = vst [vmem:[#allocation163_spill] sm:$0xff] %v7926_v16 }
 0x530   : > { %4564 = vrot.lane.b32.xlu2 %v4499_v1, %s5940_s26  ;;  %v7935_v1 = vpop.permute.xlu1 %3977 }
 0x531   : > { %8855 = vst [vmem:[#allocation164_spill] sm:$0xff] %v7935_v1  ;;  %v8865_v1 = vld [vmem:[#allocation114_spill] sm:$0xff] }
 0x532   : > { %v7913_v61 = vpop.xlane.xlu2 %2994 }
 0x533   : > { %v3189_v4 = vsub.f32 %v7763_v47, %v7913_v61  ;;  %v3190_v59 = vsub.f32 %v7767_v29, %v7913_v61  ;;  %v4500_v47 = vmul.f32 %v5634_v43, %v4468_v51  ;;  %v3331_v51 = vmul.f32 0.0, %v7478_v26 }
 0x535   : > { %v3309_v18 = vmul.f32 1.442695, %v3189_v4  ;;  %v3311_v11 = vmul.f32 1.442695, %v3190_v59  ;;  %4568 = vrot.lane.b32.xlu0 %v4501_v0, %s5940_s26 }
 0x537   : > { %5639 = vpow2.f32 %v3309_v18  ;;  %v7956_v18 = vpop.f32.mrf.mxu0 }
 0x538   : > { %3987 = vrot.lane.b32.xlu2 %v7922_v35, %s5940_s26  ;;  %5641 = vpow2.f32 %v3311_v11  ;;  %v7959_v11 = vpop.f32.mrf.mxu1 }
 0x539   : > { %5643 = vpow2.f32 %v3107_v17 }
 0x53a   : > { %v7962_v15 = vpop.xlane.xlu2 %3400 }
 0x53d   : > { %3991 = vrot.lane.b32.xlu0 %v7926_v16, %s5940_s26  ;;  %4566 = vrot.lane.b32.xlu1 %v4500_v47, %s5940_s26  ;;  %v5640_v29 = vpop.eup %5639  ;;  %v3690_v16 = vadd.f32 %v8865_v1, %v8864_v46 }
 0x53e   : > { %v5642_v38 = vpop.eup %5641  ;;  %v3577_v2 = vpack.c.bf16 %v5620_v12, %v5640_v29 }
 0x53f   : > { %v3578_v9 = vpack.c.bf16 %v5622_v6, %v5642_v38  ;;  %v7931_v10 = vadd.f32 %v5642_v38, %v5640_v29  ;;  %v7933_v62 = vpop.eup %5643  ;;  %v7966_v17 = vpop.f32.mrf.mxu0 }
 0x540   : > { %3659 = vmatmul.bf16.gmra.mxu0 %v3577_v2  ;;  %v7969_v47 = vpop.f32.mrf.mxu1  ;;  %v7974_v2 = vpop.permute.xlu0 %3979 }
 0x541   : > { %3748 = vmatmul.bf16.gmra.mxu1 %v3578_v9  ;;  %8856 = vst [vmem:[#allocation165_spill] sm:$0xff] %v7969_v47 }
 0x542   : > { %v7972_v29 = vpop.permute.xlu2 %3981  ;;  %8858 = vst [vmem:[#allocation167_spill] sm:$0xff] %v7974_v2 }
 0x543   : > { %8857 = vst [vmem:[#allocation166_spill] sm:$0xff] %v7972_v29  ;;  %v3058_v29 = vsub.f32 -inf, %v7687_v24 }
 0x545   : > { %3989 = vrot.lane.b32.xlu1 %v7933_v62, %s5940_s26 }
 0x548   : > { %v7996_v1 = vpop.xlane.xlu0 %3403 }
 0x54c   : > { %v7939_v49 = vpop.xlane.xlu1 %3397 }
 0x554   : > { %v7941_v43 = vpop.xlane.xlu1 %3000 }
 0x555   : > { %v3193_v53 = vsub.f32 %v7792_v41, %v7941_v43  ;;  %v3194_v12 = vsub.f32 %v7796_v19, %v7941_v43  ;;  %v1572_v41 = vsub.f32 -inf, %v6392_v56 }
 0x557   : > { %v3317_v6 = vmul.f32 1.442695, %v3193_v53  ;;  %v3319_v40 = vmul.f32 1.442695, %v3194_v12  ;;  %v1604_v19 = vmul.f32 1.442695, %v1572_v41 }
 0x558   : > { %v8859_v53 = vld [vmem:[#allocation9_spill] sm:$0xff] }
 0x559   : > { %5645 = vpow2.f32 %v3317_v6  ;;  %v8860_v6 = vld [vmem:[#allocation25_spill] sm:$0xff] }
 0x55a   : > { %5647 = vpow2.f32 %v3319_v40  ;;  %v8861_v41 = vld [vmem:[#allocation109_spill] sm:$0xff] }
 0x55b   : > { %5649 = vpow2.f32 %v1604_v19  ;;  %v8862_v19 = vld [vmem:[#allocation110_spill] sm:$0xff] }
 0x55c   : > { %5651 = vrcp.f32 %v7673_v50 }
 0x55f   : > { %v7947_v4 = vpop.eup %5645 }
 0x560   : > { %v7949_v59 = vpop.eup %5647 }
 0x561   : > { %3418 = vadd.xlane.f32.xlu2 %v7606_v58  ;;  %v7954_v0 = vadd.f32 %v7949_v59, %v7947_v4  ;;  %v3459_v58 = vadd.f32 %v7689_v14, %v3331_v51  ;;  %v5650_v56 = vpop.eup %5649  ;;  %v1573_v14 = vsub.f32 -inf, %v8859_v53  ;;  %v3687_v51 = vadd.f32 %v8862_v19, %v8861_v41  ;;  %v4563_v19 = vpop.permute.xlu0 %4562 }
 0x562   : > { %v1860_v38 = vmul.f32 0.0, %v5650_v56 }
 0x563   : > { %5653 = vrcp.f32 %v3459_v58  ;;  %v1606_v47 = vmul.f32 1.442695, %v1573_v14 }
 0x564   : > { %v1988_v40 = vadd.f32 %v8860_v6, %v1860_v38  ;;  %v3111_v6 = vmul.f32 1.442695, %v3058_v29 }
 0x566   : > { %5655 = vrcp.f32 %v1988_v40 }
 0x567   : > { %3421 = vadd.xlane.f32.xlu0 %v7706_v20  ;;  %v5652_v20 = vpop.eup %5651  ;;  %5657 = vrcp.f32 %v7646_v31 }
 0x568   : > { %5659 = vpow2.f32 %v1606_v47 }
 0x569   : > { %v5654_v9 = vpop.eup %5653  ;;  %5661 = vpow2.f32 %v3111_v6 }
 0x56a   : > { %v4440_v2 = vmul.f32 %v5654_v9, %v3459_v58 }
 0x56c   : > { %v4472_v46 = vsub.f32 2.0, %v4440_v2  ;;  %v5656_v29 = vpop.eup %5655 }
 0x56e   : > { %v4504_v41 = vmul.f32 %v5654_v9, %v4472_v46 }
 0x56f   : > { %3415 = vadd.xlane.f32.xlu1 %v7664_v63  ;;  %v4438_v63 = vmul.f32 %v5652_v20, %v7673_v50  ;;  %v3060_v50 = vsub.f32 -inf, %v7697_v34  ;;  %v5658_v34 = vpop.eup %5657 }
 0x570   : > { %v5660_v2 = vpop.eup %5659 }
 0x571   : > { %v4470_v53 = vsub.f32 2.0, %v4438_v63  ;;  %v8002_v47 = vpop.eup %5661 }
 0x574   : > { %v3650_v26 = vpop.f32.mrf.mxu0 }
 0x575   : > { %v3739_v12 = vpop.f32.mrf.mxu1 }
 0x576   : > { %v7981_v33 = vadd.f32 %v3739_v12, %v3650_v26  ;;  %v3115_v12 = vmul.f32 1.442695, %v3060_v50 }
 0x578   : > { %8863 = vst [vmem:[#allocation9_spill] sm:$0xff] %v7981_v33 }
 0x579   : > { %3797 = vrot.lane.b32.xlu2 %v3687_v51, %s5940_s26 }
 0x57b   : > { %3799 = vrot.lane.b32.xlu0 %v3690_v16, %s5940_s26  ;;  %v7988_v38 = vpop.xlane.xlu2 %3003  ;;  %v4502_v16 = vmul.f32 %v5652_v20, %v4470_v53  ;;  %v4439_v20 = vmul.f32 %v5658_v34, %v7646_v31  ;;  %v8866_v53 = vld [vmem:[#allocation107_spill] sm:$0xff] }
 0x57c   : > { %v3195_v26 = vsub.f32 %v7856_v5, %v7988_v38  ;;  %v3196_v24 = vsub.f32 %v7860_v55, %v7988_v38  ;;  %v4274_v55 = vmul.f32 %v5656_v29, %v1988_v40  ;;  %v4047_v6 = vsel %vm1036_vm0, %v5650_v56, %v8866_v53  ;;  %v8871_v53 = vld [vmem:[#allocation116_spill] sm:$0xff] }
 0x57d   : > { %v1861_v40 = vmul.f32 0.0, %v5660_v2  ;;  %v4471_v56 = vsub.f32 2.0, %v4439_v20 }
 0x57e   : > { %v3321_v58 = vmul.f32 1.442695, %v3195_v26  ;;  %v3323_v14 = vmul.f32 1.442695, %v3196_v24  ;;  %v4306_v63 = vsub.f32 2.0, %v4274_v55  ;;  %v8867_v26 = vld [vmem:[#allocation108_spill] sm:$0xff] }
 0x57f   : > { %v3059_v24 = vsub.f32 -inf, %v7741_v7  ;;  %v4503_v20 = vmul.f32 %v5658_v34, %v4471_v56 }
 0x580   : > { %5663 = vpow2.f32 %v3321_v58  ;;  %v4338_v7 = vmul.f32 %v5656_v29, %v4306_v63 }
 0x581   : > { %4570 = vrot.lane.b32.xlu2 %v4502_v16, %s5940_s26  ;;  %5665 = vpow2.f32 %v3323_v14  ;;  %v4111_v16 = vmul.f32 0.0, %v4047_v6  ;;  %v3113_v55 = vmul.f32 1.442695, %v3059_v24 }
 0x582   : > { %5667 = vpow2.f32 %v3115_v12 }
 0x583   : > { %4574 = vrot.lane.b32.xlu0 %v4504_v41, %s5940_s26  ;;  %v8000_v5 = vpop.xlane.xlu2 %3409 }
 0x586   : > { %v5664_v51 = vpop.eup %5663 }
 0x587   : > { %v5666_v9 = vpop.eup %5665  ;;  %v3579_v50 = vpack.c.bf16 %v5664_v51, %v7947_v4  ;;  %v8869_v4 = vld [vmem:[#allocation27_spill] sm:$0xff] }
 0x588   : > { %3795 = vrot.lane.b32.xlu1 %v8867_v26, %s5940_s26  ;;  %v3580_v46 = vpack.c.bf16 %v5666_v9, %v7949_v59  ;;  %v8015_v31 = vadd.f32 %v5666_v9, %v5664_v51  ;;  %v8017_v58 = vpop.eup %5667  ;;  %v1989_v14 = vadd.f32 %v8869_v4, %v1861_v40  ;;  %v8870_v59 = vld [vmem:[#allocation32_spill] sm:$0xff]  ;;  %v4658_v9 = vsel %vm1036_vm0, %v4338_v7, %v4563_v19  ;;  %v8029_v26 = vpop.permute.xlu0 %3985 }
 0x589   : > { %3993 = vrot.lane.b32.xlu2 %v8002_v47, %s5940_s26  ;;  %8868 = vst [vmem:[#allocation25_spill] sm:$0xff] %v8017_v58  ;;  %3664 = vmatmul.bf16.vlgmr.msra.gmra.mxu2 %v3579_v50  ;;  %v8872_v50 = vld [vmem:[#allocation117_spill] sm:$0xff]  ;;  %v8031_v40 = vpop.f32.mrf.mxu0  ;;  %v8033_v4 = vpop.f32.mrf.mxu1 }
 0x58a   : > { %3753 = vmatmul.bf16.vlgmr.msra.gmra.mxu3 %v3580_v46  ;;  %5669 = vrcp.f32 %v1989_v14  ;;  %v3692_v6 = vadd.f32 %v8872_v50, %v8871_v53  ;;  %8873 = vst [vmem:[#allocation109_spill] sm:$0xff] %v8029_v26  ;;  %v8875_v53 = vld [vmem:[#allocation35_spill] sm:$0xff] }
 0x58b   : > { %3997 = vrot.lane.b32.xlu0 %v8017_v58, %s5940_s26  ;;  %v3792_v12 = vpop.permute.xlu2 %3791  ;;  %5671 = vpow2.f32 %v3113_v55  ;;  %v8879_v58 = vld [vmem:[#allocation111_spill] sm:$0xff] }
 0x58c   : > { %v3887_v41 = vsel %vm1036_vm0, %v8870_v59, %v3792_v12  ;;  %v8874_v12 = vld [vmem:[#allocation112_spill] sm:$0xff] }
 0x58d   : > { %v4143_v51 = vadd.f32 %v4111_v16, %v3887_v41  ;;  %v4048_v7 = vsel %vm1036_vm0, %v5660_v2, %v8874_v12  ;;  %v8878_v2 = vld [vmem:[#allocation129_spill] sm:$0xff] }
 0x58e   : > { %v4112_v41 = vmul.f32 0.0, %v4048_v7  ;;  %v3334_v12 = vmul.f32 0.0, %v8878_v2  ;;  %v3061_v2 = vsub.f32 -inf, %v7771_v45 }
 0x58f   : > { %v4722_v46 = vmul.f32 %v4658_v9, %v4143_v51 }
 0x590   : > { %4572 = vrot.lane.b32.xlu1 %v4503_v20, %s5940_s26  ;;  %v5670_v29 = vpop.eup %5669  ;;  %v8042_v19 = vpop.xlane.xlu0 %3412 }
 0x591   : > { %4754 = vst [vmem:[%s8036_s5] sm:$0xff] %v4722_v46  ;;  %3801 = vrot.lane.b32.xlu2 %v3692_v6, %s5940_s26  ;;  %v8040_v34 = vpop.eup %5671  ;;  %v4275_v24 = vmul.f32 %v5670_v29, %v1989_v14 }
 0x593   : > { %v4307_v16 = vsub.f32 2.0, %v4275_v24  ;;  %v4565_v59 = vpop.permute.xlu2 %4564  ;;  %v8877_v24 = vld [vmem:[#allocation11_spill] sm:$0xff] }
 0x594   : > { %v1575_v26 = vsub.f32 -inf, %v8877_v24 }
 0x595   : > { %v4339_v9 = vmul.f32 %v5670_v29, %v4307_v16  ;;  %v3332_v29 = vmul.f32 0.0, %v8879_v58  ;;  %v3462_v16 = vadd.f32 %v7816_v52, %v3334_v12  ;;  %v8883_v52 = vld [vmem:[#allocation31_spill] sm:$0xff] }
 0x596   : > { %v8044_v63 = vpop.f32.mrf.mxu0  ;;  %v1610_v7 = vmul.f32 1.442695, %v1575_v26  ;;  %v8881_v26 = vld [vmem:[#allocation121_spill] sm:$0xff] }
 0x597   : > { %v8046_v56 = vpop.f32.mrf.mxu1  ;;  %v4659_v46 = vsel %vm1036_vm0, %v4339_v9, %v4565_v59 }
 0x598   : > { %3995 = vrot.lane.b32.xlu1 %v8040_v34, %s5940_s26  ;;  %5673 = vpow2.f32 %v1610_v7 }
 0x599   : > { %5675 = vrcp.f32 %v3462_v16 }
 0x59e   : > { %v3657_v55 = vpop.f32.mrf.mxu0 }
 0x59f   : > { %v3794_v51 = vpop.permute.xlu0 %3793  ;;  %v3746_v20 = vpop.f32.mrf.mxu1 }
 0x5a0   : > { %v3888_v50 = vsel %vm1036_vm0, %v8875_v53, %v3794_v51  ;;  %v8054_v14 = vadd.f32 %v3746_v20, %v3657_v55  ;;  %v3460_v55 = vadd.f32 %v7759_v3, %v3332_v29  ;;  %v8882_v20 = vld [vmem:[#allocation122_spill] sm:$0xff]  ;;  %v8884_v3 = vld [vmem:[#allocation115_spill] sm:$0xff]  ;;  %v8075_v29 = vpop.permute.xlu2 %3987 }
 0x5a1   : > { %v4144_v6 = vadd.f32 %v4112_v41, %v3888_v50  ;;  %v3697_v58 = vadd.f32 %v8882_v20, %v8881_v26  ;;  %8885 = vst [vmem:[#allocation113_spill] sm:$0xff] %v8075_v29  ;;  %v8887_v26 = vld [vmem:[#allocation10_spill] sm:$0xff] }
 0x5a2   : > { %8876 = vst [vmem:[#allocation110_spill] sm:$0xff] %v8054_v14  ;;  %5677 = vrcp.f32 %v3460_v55  ;;  %v8898_v14 = vld [vmem:[#allocation124_spill] sm:$0xff] }
 0x5a3   : > { %v4723_v33 = vmul.f32 %v4659_v46, %v4144_v6  ;;  %v3333_v46 = vmul.f32 0.0, %v8884_v3 }
 0x5a5   : > { %4755 = vst [vmem:[%s8036_s5 + $0x8] sm:$0xff] %v4723_v33  ;;  %v5674_v33 = vpop.eup %5673  ;;  %v3461_v12 = vadd.f32 %v7787_v23, %v3333_v46  ;;  %v1574_v23 = vsub.f32 -inf, %v8887_v26  ;;  %v8891_v46 = vld [vmem:[#allocation34_spill] sm:$0xff] }
 0x5a6   : > { %v5676_v59 = vpop.eup %5675  ;;  %v1863_v9 = vmul.f32 0.0, %v5674_v33 }
 0x5a7   : > { %v4443_v53 = vmul.f32 %v5676_v59, %v3462_v16  ;;  %v4569_v20 = vpop.permute.xlu0 %4568 }
 0x5a8   : > { %v5678_v41 = vpop.eup %5677  ;;  %v1991_v50 = vadd.f32 %v8883_v52, %v1863_v9  ;;  %v8077_v9 = vpop.permute.xlu1 %3983 }
 0x5a9   : > { %v4475_v24 = vsub.f32 2.0, %v4443_v53  ;;  %8886 = vst [vmem:[#allocation114_spill] sm:$0xff] %v8077_v9 }
 0x5aa   : > { %5679 = vrcp.f32 %v1991_v50 }
 0x5b5   : > { %3430 = vadd.xlane.f32.xlu0 %v7778_v44  ;;  %v8880_v44 = vld [vmem:[#allocation12_spill] sm:$0xff] }
 0x5b6   : > { %v1576_v51 = vsub.f32 -inf, %v8880_v44  ;;  %v4507_v44 = vmul.f32 %v5676_v59, %v4475_v24  ;;  %v8088_v24 = vpop.xlane.xlu1 %3406 }
 0x5b8   : > { %v1612_v6 = vmul.f32 1.442695, %v1576_v51 }
 0x5ba   : > { %3427 = vadd.xlane.f32.xlu2 %v7709_v8  ;;  %v4441_v8 = vmul.f32 %v5678_v41, %v3460_v55  ;;  %5681 = vpow2.f32 %v1612_v6  ;;  %v3117_v55 = vmul.f32 1.442695, %v3061_v2  ;;  %v8890_v6 = vld [vmem:[#allocation13_spill] sm:$0xff] }
 0x5bb   : > { %5683 = vrcp.f32 %v3461_v12  ;;  %v1577_v3 = vsub.f32 -inf, %v8890_v6 }
 0x5bc   : > { %v4473_v7 = vsub.f32 2.0, %v4441_v8  ;;  %v1608_v8 = vmul.f32 1.442695, %v1574_v23 }
 0x5bd   : > { %v1614_v23 = vmul.f32 1.442695, %v1577_v3 }
 0x5be   : > { %v4505_v51 = vmul.f32 %v5678_v41, %v4473_v7 }
 0x5c2   : > { %3424 = vadd.xlane.f32.xlu1 %v7755_v48  ;;  %v3063_v48 = vsub.f32 -inf, %v7830_v37  ;;  %v5680_v37 = vpop.eup %5679 }
 0x5c3   : > { %v5682_v45 = vpop.eup %5681  ;;  %v4277_v53 = vmul.f32 %v5680_v37, %v1991_v50 }
 0x5c4   : > { %v3121_v16 = vmul.f32 1.442695, %v3063_v48  ;;  %v5684_v59 = vpop.eup %5683  ;;  %v1864_v52 = vmul.f32 0.0, %v5682_v45 }
 0x5c5   : > { %v4309_v7 = vsub.f32 2.0, %v4277_v53  ;;  %v4442_v26 = vmul.f32 %v5684_v59, %v3461_v12  ;;  %v3062_v53 = vsub.f32 -inf, %v7819_v60  ;;  %v8896_v12 = vld [vmem:[#allocation41_spill] sm:$0xff] }
 0x5c6   : > { %5685 = vpow2.f32 %v3121_v16  ;;  %v1992_v48 = vadd.f32 %v8891_v46, %v1864_v52  ;;  %v8892_v16 = vld [vmem:[#allocation130_spill] sm:$0xff] }
 0x5c7   : > { %5687 = vpow2.f32 %v3117_v55  ;;  %v8893_v55 = vld [vmem:[#allocation119_spill] sm:$0xff]  ;;  %v4341_v46 = vmul.f32 %v5680_v37, %v4309_v7  ;;  %v3119_v3 = vmul.f32 1.442695, %v3062_v53 }
 0x5c8   : > { %5689 = vpow2.f32 %v1608_v8  ;;  %v8897_v8 = vld [vmem:[#allocation123_spill] sm:$0xff] }
 0x5c9   : > { %3805 = vrot.lane.b32.xlu0 %v3697_v58, %s5940_s26  ;;  %5691 = vrcp.f32 %v1992_v48  ;;  %v4661_v29 = vsel %vm1036_vm0, %v4341_v46, %v4569_v20  ;;  %v8899_v20 = vld [vmem:[#allocation28_spill] sm:$0xff] }
 0x5ca   : > { %5693 = vpow2.f32 %v1614_v23 }
 0x5cb   : > { %5695 = vpow2.f32 %v3119_v3 }
 0x5cc   : > { %v8084_v41 = vpop.eup %5685 }
 0x5cd   : > { %8889 = vst [vmem:[#allocation108_spill] sm:$0xff] %v8084_v41  ;;  %v8090_v2 = vpop.eup %5687 }
 0x5ce   : > { %v5690_v60 = vpop.eup %5689 }
 0x5cf   : > { %v5692_v37 = vpop.eup %5691  ;;  %v1862_v7 = vmul.f32 0.0, %v5690_v60 }
 0x5d0   : > { %v5694_v53 = vpop.eup %5693 }
 0x5d1   : > { %4580 = vrot.lane.b32.xlu0 %v4507_v44, %s5940_s26  ;;  %v4050_v44 = vsel %vm1036_vm0, %v5674_v33, %v8892_v16  ;;  %v4474_v33 = vsub.f32 2.0, %v4442_v26  ;;  %v8102_v16 = vpop.permute.xlu0 %3991  ;;  %v8115_v46 = vpop.eup %5695 }
 0x5d2   : > { %4576 = vrot.lane.b32.xlu2 %v4505_v51, %s5940_s26  ;;  %v8894_v51 = vld [vmem:[#allocation120_spill] sm:$0xff]  ;;  %v4114_v52 = vmul.f32 0.0, %v4050_v44  ;;  %8895 = vst [vmem:[#allocation27_spill] sm:$0xff] %v8102_v16  ;;  %v4567_v44 = vpop.permute.xlu1 %4566 }
 0x5d3   : > { %v3695_v50 = vadd.f32 %v8894_v51, %v8893_v55  ;;  %v4506_v9 = vmul.f32 %v5684_v59, %v4474_v33  ;;  %v1865_v59 = vmul.f32 0.0, %v5694_v53 }
 0x5d4   : > { %v8082_v58 = vpop.xlane.xlu2 %3418 }
 0x5d5   : > { %8888 = vst [vmem:[#allocation107_spill] sm:$0xff] %v8082_v58 }
 0x5d9   : > { %4003 = vrot.lane.b32.xlu0 %v8084_v41, %s5940_s26 }
 0x5da   : > { %3999 = vrot.lane.b32.xlu2 %v8090_v2, %s5940_s26  ;;  %v8119_v33 = vpop.permute.xlu1 %3989 }
 0x5db   : > { %3803 = vrot.lane.b32.xlu1 %v3695_v50, %s5940_s26  ;;  %v3700_v50 = vadd.f32 %v8898_v14, %v8897_v8  ;;  %v4278_v14 = vmul.f32 %v5692_v37, %v1992_v48  ;;  %8901 = vst [vmem:[#allocation32_spill] sm:$0xff] %v8119_v33 }
 0x5dc   : > { %v3798_v6 = vpop.permute.xlu2 %3797 }
 0x5dd   : > { %v3890_v55 = vsel %vm1036_vm0, %v8896_v12, %v3798_v6  ;;  %v1990_v6 = vadd.f32 %v8899_v20, %v1862_v7 }
 0x5de   : > { %v4146_v51 = vadd.f32 %v4114_v52, %v3890_v55  ;;  %v8112_v52 = vpop.xlane.xlu0 %3421 }
 0x5df   : > { %5697 = vrcp.f32 %v1990_v6 }
 0x5e0   : > { %v4725_v41 = vmul.f32 %v4661_v29, %v4146_v51  ;;  %v4310_v29 = vsub.f32 2.0, %v4278_v14  ;;  %v8905_v14 = vld [vmem:[#allocation141_spill] sm:$0xff] }
 0x5e2   : > { %4757 = vst [vmem:[%s8036_s5 + $0x18] sm:$0xff] %v4725_v41  ;;  %3807 = vrot.lane.b32.xlu2 %v3700_v50, %s5940_s26  ;;  %v8900_v41 = vld [vmem:[#allocation138_spill] sm:$0xff]  ;;  %v4342_v8 = vmul.f32 %v5692_v37, %v4310_v29  ;;  %v8904_v50 = vld [vmem:[#allocation44_spill] sm:$0xff]  ;;  %v8131_v33 = vpop.xlane.xlu1 %3415  ;;  %v8906_v37 = vld [vmem:[#allocation47_spill] sm:$0xff] }
 0x5e3   : > { %4578 = vrot.lane.b32.xlu1 %v4506_v9, %s5940_s26  ;;  %v4051_v23 = vsel %vm1036_vm0, %v5682_v45, %v8900_v41  ;;  %v8902_v9 = vld [vmem:[#allocation36_spill] sm:$0xff]  ;;  %v4052_v41 = vsel %vm1036_vm0, %v5694_v53, %v8905_v14  ;;  %v8908_v14 = vld [vmem:[#allocation38_spill] sm:$0xff] }
 0x5e4   : > { %v4571_v26 = vpop.permute.xlu2 %4570  ;;  %v1993_v12 = vadd.f32 %v8902_v9, %v1865_v59  ;;  %v4115_v48 = vmul.f32 0.0, %v4051_v23  ;;  %v4116_v9 = vmul.f32 0.0, %v4052_v41 }
 0x5e5   : > { %v5698_v20 = vpop.eup %5697  ;;  %v4662_v45 = vsel %vm1036_vm0, %v4342_v8, %v4571_v26 }
 0x5e6   : > { %5699 = vrcp.f32 %v1993_v12  ;;  %v4276_v59 = vmul.f32 %v5698_v20, %v1990_v6 }
 0x5eb   : > { %4001 = vrot.lane.b32.xlu1 %v8115_v46, %s5940_s26 }
 0x5ec   : > { %v8124_v55 = vpop.permute.xlu2 %3993 }
 0x5ed   : > { %8903 = vst [vmem:[#allocation116_spill] sm:$0xff] %v8124_v55  ;;  %v3800_v51 = vpop.permute.xlu0 %3799 }
 0x5ee   : > { %v3891_v3 = vsel %vm1036_vm0, %v8904_v50, %v3800_v51  ;;  %v5700_v51 = vpop.eup %5699  ;;  %v4308_v50 = vsub.f32 2.0, %v4276_v59  ;;  %v3337_v59 = vmul.f32 0.0, %v7733_v28 }
 0x5ef   : > { %v4147_v7 = vadd.f32 %v4115_v48, %v3891_v3  ;;  %v8907_v3 = vld [vmem:[#allocation118_spill] sm:$0xff]  ;;  %v4279_v8 = vmul.f32 %v5700_v51, %v1993_v12 }
 0x5f0   : > { %v4049_v26 = vsel %vm1036_vm0, %v5690_v60, %v8907_v3  ;;  %v8911_v3 = vld [vmem:[#allocation127_spill] sm:$0xff] }
 0x5f1   : > { %v4726_v16 = vmul.f32 %v4662_v45, %v4147_v7  ;;  %v4113_v53 = vmul.f32 0.0, %v4049_v26  ;;  %v4340_v45 = vmul.f32 %v5698_v20, %v4308_v50  ;;  %v4311_v41 = vsub.f32 2.0, %v4279_v8  ;;  %v8912_v26 = vld [vmem:[#allocation128_spill] sm:$0xff] }
 0x5f2   : > { %v3465_v20 = vadd.f32 %v7850_v22, %v3337_v59  ;;  %v3705_v22 = vadd.f32 %v8912_v26, %v8911_v3  ;;  %v8918_v3 = vld [vmem:[#allocation126_spill] sm:$0xff] }
 0x5f3   : > { %4758 = vst [vmem:[%s8036_s5 + $0x20] sm:$0xff] %v4726_v16  ;;  %v4660_v55 = vsel %vm1036_vm0, %v4340_v45, %v4567_v44 }
 0x5f4   : > { %v3802_v23 = vpop.permute.xlu2 %3801  ;;  %5701 = vrcp.f32 %v3465_v20 }
 0x5f5   : > { %v3892_v29 = vsel %vm1036_vm0, %v8906_v37, %v3802_v23  ;;  %v4343_v23 = vmul.f32 %v5700_v51, %v4311_v41  ;;  %v3435_v37 = vadd.f32 %v7885_v32, %v7883_v54 }
 0x5f6   : > { %v4148_v48 = vadd.f32 %v4116_v9, %v3892_v29  ;;  %v8909_v29 = vld [vmem:[#allocation134_spill] sm:$0xff] }
 0x5f7   : > { %v3335_v50 = vmul.f32 0.0, %v8909_v29  ;;  %v8915_v29 = vld [vmem:[#allocation43_spill] sm:$0xff] }
 0x5fa   : > { %v3796_v7 = vpop.permute.xlu1 %3795  ;;  %v5702_v51 = vpop.eup %5701 }
 0x5fb   : > { %v3889_v16 = vsel %vm1036_vm0, %v8908_v14, %v3796_v7  ;;  %v4446_v8 = vmul.f32 %v5702_v51, %v3465_v20  ;;  %v3064_v14 = vsub.f32 -inf, %v7876_v39  ;;  %v8914_v20 = vld [vmem:[#allocation14_spill] sm:$0xff] }
 0x5fc   : > { %v4145_v6 = vadd.f32 %v4113_v53, %v3889_v16  ;;  %v8913_v16 = vld [vmem:[#allocation136_spill] sm:$0xff] }
 0x5fd   : > { %v4478_v53 = vsub.f32 2.0, %v4446_v8 }
 0x5fe   : > { %v4724_v58 = vmul.f32 %v4660_v55, %v4145_v6  ;;  %v3336_v6 = vmul.f32 0.0, %v8913_v16 }
 0x5ff   : > { %v4510_v41 = vmul.f32 %v5702_v51, %v4478_v53  ;;  %v8916_v51 = vld [vmem:[#allocation16_spill] sm:$0xff] }
 0x600   : > { %4756 = vst [vmem:[%s8036_s5 + $0x10] sm:$0xff] %v4724_v58  ;;  %v3463_v58 = vadd.f32 %v7852_v21, %v3335_v50  ;;  %v3066_v21 = vsub.f32 -inf, %v7868_v13 }
 0x602   : > { %v4573_v9 = vpop.permute.xlu1 %4572  ;;  %5703 = vrcp.f32 %v3463_v58  ;;  %v3127_v45 = vmul.f32 1.442695, %v3066_v21 }
 0x603   : > { %3439 = vadd.xlane.f32.xlu0 %v7892_v42  ;;  %v4663_v60 = vsel %vm1036_vm0, %v4343_v23, %v4573_v9  ;;  %v3464_v9 = vadd.f32 %v7895_v27, %v3336_v6 }
 0x604   : > { %v4727_v12 = vmul.f32 %v4663_v60, %v4148_v48  ;;  %v8910_v48 = vld [vmem:[#allocation15_spill] sm:$0xff] }
 0x605   : > { %v1579_v28 = vsub.f32 -inf, %v8910_v48  ;;  %v1580_v48 = vsub.f32 -inf, %v8916_v51 }
 0x606   : > { %4759 = vst [vmem:[%s8036_s5 + $0x28] sm:$0xff] %v4727_v12  ;;  %v8163_v12 = vpop.permute.xlu0 %4574 }
 0x607   : > { %v1618_v32 = vmul.f32 1.442695, %v1579_v28  ;;  %v8917_v28 = vld [vmem:[#allocation125_spill] sm:$0xff] }
 0x608   : > { %v5704_v54 = vpop.eup %5703  ;;  %v3702_v26 = vadd.f32 %v8918_v3, %v8917_v28  ;;  %v8922_v28 = vld [vmem:[#allocation53_spill] sm:$0xff] }
 0x609   : > { %v4444_v7 = vmul.f32 %v5704_v54, %v3463_v58  ;;  %5705 = vpow2.f32 %v1618_v32  ;;  %v1620_v32 = vmul.f32 1.442695, %v1580_v48 }
 0x60a   : > { %5707 = vpow2.f32 %v3127_v45  ;;  %v8920_v45 = vld [vmem:[#allocation132_spill] sm:$0xff] }
 0x60b   : > { %3436 = vadd.xlane.f32.xlu2 %v3435_v37  ;;  %v4476_v23 = vsub.f32 2.0, %v4444_v7  ;;  %5709 = vrcp.f32 %v3464_v9  ;;  %v1578_v37 = vsub.f32 -inf, %v8914_v20  ;;  %v8919_v7 = vld [vmem:[#allocation131_spill] sm:$0xff]  ;;  %v8921_v20 = vld [vmem:[#allocation40_spill] sm:$0xff] }
 0x60c   : > { %v3665_v44 = vpop.f32.mrf.mxu2 }
 0x60d   : > { %v3754_v55 = vpop.f32.mrf.mxu3  ;;  %v4508_v60 = vmul.f32 %v5704_v54, %v4476_v23  ;;  %v3065_v54 = vsub.f32 -inf, %v7913_v61 }
 0x60e   : > { %v8151_v42 = vadd.f32 %v3754_v55, %v3665_v44  ;;  %v1616_v44 = vmul.f32 1.442695, %v1578_v37  ;;  %v8174_v55 = vpop.permute.xlu0 %3997 }
 0x60f   : > { %v5706_v13 = vpop.eup %5705  ;;  %v3125_v16 = vmul.f32 1.442695, %v3065_v54 }
 0x610   : > { %v1867_v59 = vmul.f32 0.0, %v5706_v13  ;;  %v8166_v39 = vpop.eup %5707 }
 0x611   : > { %v5710_v27 = vpop.eup %5709 }
 0x612   : > { %v1995_v50 = vadd.f32 %v8915_v29, %v1867_v59  ;;  %v4054_v59 = vsel %vm1036_vm0, %v5706_v13, %v7753_v36  ;;  %v8923_v13 = vld [vmem:[#allocation45_spill] sm:$0xff] }
 0x615   : > { %3433 = vadd.xlane.f32.xlu1 %v7834_v57  ;;  %v3123_v57 = vmul.f32 1.442695, %v3064_v14  ;;  %v3707_v14 = vadd.f32 %v8920_v45, %v8919_v7 }
 0x617   : > { %3811 = vrot.lane.b32.xlu0 %v3705_v22, %s5940_s26  ;;  %5711 = vpow2.f32 %v3123_v57  ;;  %v4445_v22 = vmul.f32 %v5710_v27, %v3464_v9 }
 0x618   : > { %5713 = vrcp.f32 %v1995_v50 }
 0x619   : > { %5715 = vpow2.f32 %v1616_v44  ;;  %v4477_v21 = vsub.f32 2.0, %v4445_v22  ;;  %v4118_v44 = vmul.f32 0.0, %v4054_v59 }
 0x61a   : > { %5717 = vpow2.f32 %v1620_v32 }
 0x61b   : > { %v4509_v9 = vmul.f32 %v5710_v27, %v4477_v21  ;;  %5719 = vpow2.f32 %v3125_v16 }
 0x61d   : > { %v8172_v58 = vpop.eup %5711 }
 0x61e   : > { %v5714_v53 = vpop.eup %5713 }
 0x61f   : > { %4586 = vrot.lane.b32.xlu0 %v4510_v41, %s5940_s26  ;;  %v5716_v41 = vpop.eup %5715  ;;  %v4281_v23 = vmul.f32 %v5714_v53, %v1995_v50 }
 0x620   : > { %v5718_v29 = vpop.eup %5717 }
 0x621   : > { %v4313_v61 = vsub.f32 2.0, %v4281_v23  ;;  %v8196_v27 = vpop.eup %5719  ;;  %v1868_v3 = vmul.f32 0.0, %v5718_v29 }
 0x623   : > { %4582 = vrot.lane.b32.xlu2 %v4508_v60, %s5940_s26  ;;  %v1866_v60 = vmul.f32 0.0, %v5716_v41  ;;  %v4345_v48 = vmul.f32 %v5714_v53, %v4313_v61  ;;  %v1996_v32 = vadd.f32 %v8923_v13, %v1868_v3  ;;  %v8924_v53 = vld [vmem:[#allocation150_spill] sm:$0xff] }
 0x624   : > { %v4055_v7 = vsel %vm1036_vm0, %v5718_v29, %v8924_v53  ;;  %v8927_v3 = vld [vmem:[#allocation50_spill] sm:$0xff]  ;;  %v3340_v53 = vmul.f32 0.0, %v7805_v25  ;;  %v8930_v25 = vld [vmem:[#allocation135_spill] sm:$0xff] }
 0x625   : > { %v1994_v37 = vadd.f32 %v8921_v20, %v1866_v60  ;;  %v8925_v60 = vld [vmem:[#allocation56_spill] sm:$0xff] }
 0x627   : > { %4009 = vrot.lane.b32.xlu0 %v8166_v39, %s5940_s26  ;;  %5721 = vrcp.f32 %v1994_v37 }
 0x628   : > { %v8187_v6 = vpop.xlane.xlu0 %3430  ;;  %5723 = vrcp.f32 %v1996_v32 }
 0x62b   : > { %4005 = vrot.lane.b32.xlu2 %v8172_v58, %s5940_s26 }
 0x62d   : > { %v8181_v8 = vpop.xlane.xlu2 %3427  ;;  %v5722_v45 = vpop.eup %5721 }
 0x62e   : > { %3809 = vrot.lane.b32.xlu1 %v3702_v26, %s5940_s26  ;;  %v8198_v26 = vpop.permute.xlu1 %3995  ;;  %v5724_v59 = vpop.eup %5723 }
 0x633   : > { %3813 = vrot.lane.b32.xlu2 %v3707_v14, %s5940_s26  ;;  %v4119_v14 = vmul.f32 0.0, %v4055_v7  ;;  %v3468_v7 = vadd.f32 %v7996_v1, %v3340_v53  ;;  %v3343_v1 = vmul.f32 0.0, %v7922_v35  ;;  %v8933_v53 = vld [vmem:[#allocation146_spill] sm:$0xff] }
 0x635   : > { %v4577_v57 = vpop.permute.xlu2 %4576  ;;  %5725 = vrcp.f32 %v3468_v7 }
 0x636   : > { %4584 = vrot.lane.b32.xlu1 %v4509_v9, %s5940_s26  ;;  %v4665_v36 = vsel %vm1036_vm0, %v4345_v48, %v4577_v57  ;;  %v8209_v16 = vpop.xlane.xlu1 %3424  ;;  %v4280_v9 = vmul.f32 %v5722_v45, %v1994_v37  ;;  %v4282_v48 = vmul.f32 %v5724_v59, %v1996_v32 }
 0x638   : > { %v4312_v20 = vsub.f32 2.0, %v4280_v9  ;;  %v4314_v37 = vsub.f32 2.0, %v4282_v48 }
 0x63b   : > { %v3806_v51 = vpop.permute.xlu0 %3805 }
 0x63c   : > { %v3894_v50 = vsel %vm1036_vm0, %v8922_v28, %v3806_v51 }
 0x63d   : > { %v4150_v22 = vadd.f32 %v4118_v44, %v3894_v50  ;;  %v8200_v54 = vpop.permute.xlu2 %3999  ;;  %v8926_v44 = vld [vmem:[#allocation143_spill] sm:$0xff]  ;;  %v4344_v50 = vmul.f32 %v5722_v45, %v4312_v20 }
 0x63e   : > { %4007 = vrot.lane.b32.xlu1 %v8196_v27, %s5940_s26  ;;  %v4053_v51 = vsel %vm1036_vm0, %v5716_v41, %v8926_v44  ;;  %v4346_v41 = vmul.f32 %v5724_v59, %v4314_v37  ;;  %v8931_v59 = vld [vmem:[#allocation137_spill] sm:$0xff] }
 0x63f   : > { %v4729_v21 = vmul.f32 %v4665_v36, %v4150_v22  ;;  %v4117_v28 = vmul.f32 0.0, %v4053_v51  ;;  %v4664_v13 = vsel %vm1036_vm0, %v4344_v50, %v8163_v12  ;;  %v3712_v20 = vadd.f32 %v8931_v59, %v8930_v25 }
 0x641   : > { %4761 = vst [vmem:[%s8036_s5 + $0x38] sm:$0xff] %v4729_v21 }
 0x643   : > { %v8237_v35 = vpop.permute.xlu0 %4580 }
 0x645   : > { %v3808_v23 = vpop.permute.xlu2 %3807 }
 0x646   : > { %v3895_v57 = vsel %vm1036_vm0, %v8925_v60, %v3808_v23  ;;  %v8928_v23 = vld [vmem:[#allocation145_spill] sm:$0xff]  ;;  %v5726_v60 = vpop.eup %5725 }
 0x647   : > { %v4151_v61 = vadd.f32 %v4119_v14, %v3895_v57  ;;  %v3338_v9 = vmul.f32 0.0, %v8928_v23  ;;  %v4449_v44 = vmul.f32 %v5726_v60, %v3468_v7 }
 0x649   : > { %v3466_v12 = vadd.f32 %v7939_v49, %v3338_v9  ;;  %v3346_v9 = vmul.f32 0.0, %v8002_v47 }
 0x64b   : > { %5727 = vrcp.f32 %v3466_v12  ;;  %v8251_v25 = vpop.permute.xlu0 %4003 }
 0x64d   : > { %v3804_v29 = vpop.permute.xlu1 %3803 }
 0x64e   : > { %v3893_v22 = vsel %vm1036_vm0, %v8927_v3, %v3804_v29  ;;  %v3067_v29 = vsub.f32 -inf, %v7941_v43 }
 0x64f   : > { %v4149_v36 = vadd.f32 %v4117_v28, %v3893_v22  ;;  %v4481_v28 = vsub.f32 2.0, %v4449_v44 }
 0x651   : > { %v4728_v21 = vmul.f32 %v4664_v13, %v4149_v36  ;;  %3448 = vadd.xlane.f32.xlu0 %v7954_v0  ;;  %v8929_v0 = vld [vmem:[#allocation18_spill] sm:$0xff]  ;;  %v5728_v48 = vpop.eup %5727  ;;  %v4513_v49 = vmul.f32 %v5726_v60, %v4481_v28  ;;  %v8932_v36 = vld [vmem:[#allocation144_spill] sm:$0xff] }
 0x652   : > { %v1582_v57 = vsub.f32 -inf, %v8929_v0  ;;  %v3339_v37 = vmul.f32 0.0, %v8932_v36  ;;  %v8937_v0 = vld [vmem:[#allocation17_spill] sm:$0xff]  ;;  %v8940_v36 = vld [vmem:[#allocation139_spill] sm:$0xff] }
 0x653   : > { %4760 = vst [vmem:[%s8036_s5 + $0x30] sm:$0xff] %v4728_v21 }
 0x654   : > { %v1624_v51 = vmul.f32 1.442695, %v1582_v57  ;;  %v3467_v21 = vadd.f32 %v7962_v15, %v3339_v37  ;;  %v3474_v15 = vadd.f32 %v8112_v52, %v3346_v9  ;;  %v1581_v57 = vsub.f32 -inf, %v8937_v0  ;;  %v8941_v37 = vld [vmem:[#allocation140_spill] sm:$0xff]  ;;  %v8944_v9 = vld [vmem:[#allocation158_spill] sm:$0xff] }
 0x655   : > { %v4579_v32 = vpop.permute.xlu1 %4578 }
 0x656   : > { %v4666_v45 = vsel %vm1036_vm0, %v4346_v41, %v4579_v32  ;;  %5729 = vpow2.f32 %v1624_v51  ;;  %v8934_v41 = vld [vmem:[#allocation147_spill] sm:$0xff]  ;;  %v1622_v44 = vmul.f32 1.442695, %v1581_v57 }
 0x657   : > { %v4730_v14 = vmul.f32 %v4666_v45, %v4151_v61  ;;  %v3471_v61 = vadd.f32 %v8042_v19, %v3343_v1  ;;  %v3129_v19 = vmul.f32 1.442695, %v3067_v29  ;;  %v3720_v32 = vadd.f32 %v8934_v41, %v8933_v53  ;;  %v8935_v45 = vld [vmem:[#allocation157_spill] sm:$0xff]  ;;  %v8943_v53 = vld [vmem:[#allocation156_spill] sm:$0xff] }
 0x658   : > { %v3341_v43 = vmul.f32 0.0, %v8935_v45 }
 0x659   : > { %4762 = vst [vmem:[%s8036_s5 + $0x40] sm:$0xff] %v4730_v14  ;;  %5731 = vrcp.f32 %v3471_v61  ;;  %v8936_v14 = vld [vmem:[#allocation52_spill] sm:$0xff] }
 0x65a   : > { %5733 = vpow2.f32 %v3129_v19  ;;  %v3715_v19 = vadd.f32 %v8941_v37, %v8940_v36 }
 0x65b   : > { %5735 = vrcp.f32 %v3467_v21 }
 0x65c   : > { %3445 = vadd.xlane.f32.xlu2 %v7887_v30  ;;  %v4447_v30 = vmul.f32 %v5728_v48, %v3466_v12  ;;  %v5730_v3 = vpop.eup %5729  ;;  %v3469_v12 = vadd.f32 %v8088_v24, %v3341_v43  ;;  %v8938_v24 = vld [vmem:[#allocation19_spill] sm:$0xff] }
 0x65d   : > { %v1870_v13 = vmul.f32 0.0, %v5730_v3  ;;  %v1583_v1 = vsub.f32 -inf, %v8938_v24 }
 0x65e   : > { %v4479_v50 = vsub.f32 2.0, %v4447_v30  ;;  %v3068_v30 = vsub.f32 -inf, %v7988_v38  ;;  %v3349_v38 = vmul.f32 0.0, %v8090_v2 }
 0x65f   : > { %v5732_v22 = vpop.eup %5731  ;;  %v1998_v23 = vadd.f32 %v8936_v14, %v1870_v13 }
 0x660   : > { %v4452_v7 = vmul.f32 %v5732_v22, %v3471_v61  ;;  %v8253_v59 = vpop.eup %5733  ;;  %v3131_v45 = vmul.f32 1.442695, %v3068_v30 }
 0x661   : > { %5737 = vrcp.f32 %v1998_v23 }
 0x662   : > { %v4484_v60 = vsub.f32 2.0, %v4452_v7  ;;  %5739 = vrcp.f32 %v3469_v12  ;;  %v3344_v7 = vmul.f32 0.0, %v7933_v62 }
 0x663   : > { %5741 = vrcp.f32 %v3474_v15 }
 0x664   : > { %v4516_v47 = vmul.f32 %v5732_v22, %v4484_v60  ;;  %5743 = vpow2.f32 %v1622_v44  ;;  %v3472_v43 = vadd.f32 %v8131_v33, %v3344_v7  ;;  %v8950_v7 = vld [vmem:[#allocation155_spill] sm:$0xff] }
 0x665   : > { %3817 = vrot.lane.b32.xlu0 %v3712_v20, %s5940_s26  ;;  %v5736_v20 = vpop.eup %5735 }
 0x667   : > { %v5738_v52 = vpop.eup %5737 }
 0x668   : > { %3442 = vadd.xlane.f32.xlu1 %v7931_v10  ;;  %v4511_v10 = vmul.f32 %v5728_v48, %v4479_v50  ;;  %v5740_v61 = vpop.eup %5739  ;;  %v4448_v48 = vmul.f32 %v5736_v20, %v3467_v21  ;;  %v8939_v50 = vld [vmem:[#allocation133_spill] sm:$0xff]  ;;  %v4284_v22 = vmul.f32 %v5738_v52, %v1998_v23 }
 0x669   : > { %v5742_v28 = vpop.eup %5741  ;;  %v4450_v13 = vmul.f32 %v5740_v61, %v3469_v12  ;;  %v4057_v12 = vsel %vm1036_vm0, %v5730_v3, %v8944_v9  ;;  %v3347_v9 = vmul.f32 0.0, %v8040_v34 }
 0x66a   : > { %v4455_v21 = vmul.f32 %v5742_v28, %v3474_v15  ;;  %v8275_v14 = vpop.eup %5743  ;;  %v4316_v23 = vsub.f32 2.0, %v4284_v22  ;;  %v3477_v15 = vadd.f32 %v8187_v6, %v3349_v38  ;;  %v3735_v38 = vadd.f32 %v7959_v11, %v7956_v18  ;;  %v8951_v18 = vld [vmem:[#allocation65_spill] sm:$0xff] }
 0x66b   : > { %v4482_v60 = vsub.f32 2.0, %v4450_v13  ;;  %v1869_v2 = vmul.f32 0.0, %v8275_v14  ;;  %v8947_v13 = vld [vmem:[#allocation54_spill] sm:$0xff] }
 0x66c   : > { %v4487_v57 = vsub.f32 2.0, %v4455_v21  ;;  %v4348_v24 = vmul.f32 %v5738_v52, %v4316_v23 }
 0x66d   : > { %4592 = vrot.lane.b32.xlu0 %v4513_v49, %s5940_s26  ;;  %v1626_v49 = vmul.f32 1.442695, %v1583_v1  ;;  %v4514_v44 = vmul.f32 %v5740_v61, %v4482_v60  ;;  %v8945_v1 = vld [vmem:[#allocation62_spill] sm:$0xff]  ;;  %v3475_v60 = vadd.f32 %v8209_v16, %v3347_v9 }
 0x66e   : > { %v4519_v6 = vmul.f32 %v5742_v28, %v4487_v57  ;;  %v8293_v28 = vpop.permute.xlu1 %4001 }
 0x66f   : > { %5745 = vpow2.f32 %v1626_v49 }
 0x670   : > { %5747 = vpow2.f32 %v3131_v45 }
 0x671   : > { %5749 = vrcp.f32 %v3472_v43 }
 0x672   : > { %5751 = vrcp.f32 %v3477_v15 }
 0x674   : > { %4588 = vrot.lane.b32.xlu2 %v4511_v10, %s5940_s26  ;;  %v8942_v10 = vld [vmem:[#allocation154_spill] sm:$0xff] }
 0x675   : > { %3823 = vrot.lane.b32.xlu0 %v3720_v32, %s5940_s26  ;;  %v3727_v41 = vadd.f32 %v8943_v53, %v8942_v10  ;;  %v4480_v32 = vsub.f32 2.0, %v4448_v48  ;;  %v5746_v48 = vpop.eup %5745  ;;  %v8948_v53 = vld [vmem:[#allocation148_spill] sm:$0xff] }
 0x676   : > { %v8262_v29 = vpop.xlane.xlu0 %3439  ;;  %v8288_v36 = vpop.eup %5747  ;;  %v1871_v37 = vmul.f32 0.0, %v5746_v48  ;;  %v4058_v45 = vsel %vm1036_vm0, %v5746_v48, %v8950_v7 }
 0x677   : > { %v4512_v0 = vmul.f32 %v5736_v20, %v4480_v32  ;;  %v8946_v20 = vld [vmem:[#allocation49_spill] sm:$0xff]  ;;  %v5750_v52 = vpop.eup %5749 }
 0x678   : > { %v1997_v49 = vadd.f32 %v8946_v20, %v1869_v2  ;;  %v1999_v10 = vadd.f32 %v8947_v13, %v1871_v37  ;;  %v4453_v21 = vmul.f32 %v5750_v52, %v3472_v43  ;;  %v4122_v43 = vmul.f32 0.0, %v4058_v45  ;;  %v8954_v37 = vld [vmem:[#allocation159_spill] sm:$0xff] }
 0x67a   : > { %5753 = vrcp.f32 %v1997_v49 }
 0x67b   : > { %5755 = vrcp.f32 %v1999_v10 }
 0x67c   : > { %4011 = vrot.lane.b32.xlu2 %v8253_v59, %s5940_s26  ;;  %5757 = vrcp.f32 %v3475_v60 }
 0x67d   : > { %4598 = vrot.lane.b32.xlu0 %v4516_v47, %s5940_s26  ;;  %v4121_v47 = vmul.f32 0.0, %v4057_v12  ;;  %v3352_v12 = vmul.f32 0.0, %v8172_v58 }
 0x67e   : > { %v8259_v51 = vpop.xlane.xlu2 %3436 }
 0x67f   : > { %v3480_v57 = vadd.f32 %v8262_v29, %v3352_v12 }
 0x681   : > { %3815 = vrot.lane.b32.xlu1 %v8939_v50, %s5940_s26  ;;  %5759 = vrcp.f32 %v3480_v57 }
 0x684   : > { %3819 = vrot.lane.b32.xlu2 %v3715_v19, %s5940_s26  ;;  %v5752_v19 = vpop.eup %5751 }
 0x685   : > { %3829 = vrot.lane.b32.xlu0 %v3727_v41, %s5940_s26  ;;  %v8949_v41 = vld [vmem:[#allocation149_spill] sm:$0xff]  ;;  %v4458_v23 = vmul.f32 %v5752_v19, %v3477_v15 }
 0x686   : > { %v4583_v62 = vpop.permute.xlu2 %4582  ;;  %v3722_v32 = vadd.f32 %v8949_v41, %v8948_v53 }
 0x687   : > { %v4668_v50 = vsel %vm1036_vm0, %v4348_v24, %v4583_v62  ;;  %v5754_v62 = vpop.eup %5753 }
 0x688   : > { %v3434_v34 = vpop.xlane.xlu1 %3433  ;;  %v4283_v58 = vmul.f32 %v5754_v62, %v1997_v49 }
 0x689   : > { %v3812_v33 = vpop.permute.xlu0 %3811  ;;  %4590 = vrot.lane.b32.xlu1 %v4512_v0, %s5940_s26  ;;  %v4485_v0 = vsub.f32 2.0, %v4453_v21  ;;  %v3350_v21 = vmul.f32 0.0, %v8115_v46  ;;  %v8956_v46 = vld [vmem:[#allocation21_spill] sm:$0xff] }
 0x68a   : > { %v3897_v3 = vsel %vm1036_vm0, %v8945_v1, %v3812_v33  ;;  %v4315_v24 = vsub.f32 2.0, %v4283_v58  ;;  %v8952_v1 = vld [vmem:[#allocation151_spill] sm:$0xff] }
 0x68b   : > { %v4153_v30 = vadd.f32 %v4121_v47, %v3897_v3  ;;  %v4490_v47 = vsub.f32 2.0, %v4458_v23  ;;  %v4517_v33 = vmul.f32 %v5750_v52, %v4485_v0  ;;  %v4056_v29 = vsel %vm1036_vm0, %v8275_v14, %v8952_v1  ;;  %v3660_v0 = vpop.f32.mrf.mxu0 }
 0x68c   : > { %4594 = vrot.lane.b32.xlu2 %v4514_v44, %s5940_s26  ;;  %v5756_v44 = vpop.eup %5755  ;;  %v4347_v49 = vmul.f32 %v5754_v62, %v4315_v24  ;;  %v3742_v14 = vadd.f32 %v8033_v4, %v8031_v40  ;;  %v3478_v45 = vadd.f32 %v3434_v34, %v3350_v21  ;;  %v1585_v62 = vsub.f32 -inf, %v8956_v46  ;;  %v8962_v21 = vld [vmem:[#allocation22_spill] sm:$0xff] }
 0x68d   : > { %v4732_v22 = vmul.f32 %v4668_v50, %v4153_v30  ;;  %4604 = vrot.lane.b32.xlu0 %v4519_v6, %s5940_s26  ;;  %v4522_v16 = vmul.f32 %v5752_v19, %v4490_v47  ;;  %v4285_v3 = vmul.f32 %v5756_v44, %v1999_v10  ;;  %v5758_v48 = vpop.eup %5757  ;;  %v4120_v30 = vmul.f32 0.0, %v4056_v29  ;;  %v8953_v50 = vld [vmem:[#allocation59_spill] sm:$0xff]  ;;  %v8955_v19 = vld [vmem:[#allocation160_spill] sm:$0xff]  ;;  %v8957_v47 = vld [vmem:[#allocation165_spill] sm:$0xff] }
 0x68e   : > { %v8290_v61 = vpop.permute.xlu2 %4005  ;;  %v5760_v6 = vpop.eup %5759  ;;  %v3730_v13 = vadd.f32 %v8955_v19, %v8954_v37  ;;  %v4456_v53 = vmul.f32 %v5758_v48, %v3475_v60  ;;  %v4667_v10 = vsel %vm1036_vm0, %v4347_v49, %v8237_v35  ;;  %5761 = vrcp.f32 %v3478_v45 }
 0x68f   : > { %4764 = vst [vmem:[%s8036_s5 + $0x50] sm:$0xff] %v4732_v22  ;;  %v4317_v52 = vsub.f32 2.0, %v4285_v3  ;;  %v8958_v3 = vld [vmem:[#allocation61_spill] sm:$0xff]  ;;  %v3355_v49 = vmul.f32 0.0, %v8253_v59 }
 0x691   : > { %4013 = vrot.lane.b32.xlu1 %v8288_v36, %s5940_s26  ;;  %v4349_v9 = vmul.f32 %v5756_v44, %v4317_v52  ;;  %v8336_v34 = vpop.permute.xlu0 %4586  ;;  %v3756_v44 = vpop.f32.mrf.mxu3  ;;  %v8960_v52 = vld [vmem:[#allocation24_spill] sm:$0xff] }
 0x692   : > { %v1588_v37 = vsub.f32 -inf, %v8960_v52 }
 0x694   : > { %3825 = vrot.lane.b32.xlu2 %v3722_v32, %s5940_s26  ;;  %v4461_v32 = vmul.f32 %v5760_v6, %v3480_v57  ;;  %v3749_v57 = vpop.f32.mrf.mxu1  ;;  %v1636_v19 = vmul.f32 1.442695, %v1588_v37 }
 0x695   : > { %3835 = vrot.lane.b32.xlu0 %v3735_v38, %s5940_s26  ;;  %v4488_v38 = vsub.f32 2.0, %v4456_v53  ;;  %v3750_v58 = vadd.f32 %v3749_v57, %v3660_v0  ;;  %v8961_v53 = vld [vmem:[#allocation20_spill] sm:$0xff]  ;;  %v8966_v0 = vld [vmem:[#allocation142_spill] sm:$0xff]  ;;  %v8967_v57 = vld [vmem:[#allocation107_spill] sm:$0xff] }
 0x696   : > { %v3814_v2 = vpop.permute.xlu2 %3813  ;;  %v4493_v23 = vsub.f32 2.0, %v4461_v32 }
 0x697   : > { %v3898_v11 = vsel %vm1036_vm0, %v8951_v18, %v3814_v2  ;;  %v4520_v4 = vmul.f32 %v5758_v48, %v4488_v38  ;;  %v1630_v2 = vmul.f32 1.442695, %v1585_v62  ;;  %v3737_v18 = vadd.f32 %v8957_v47, %v7966_v17  ;;  %v8965_v62 = vld [vmem:[#allocation164_spill] sm:$0xff] }
 0x698   : > { %v4154_v15 = vadd.f32 %v4122_v43, %v3898_v11  ;;  %v4525_v60 = vmul.f32 %v5760_v6, %v4493_v23  ;;  %v5762_v43 = vpop.eup %5761  ;;  %v3745_v6 = vadd.f32 %v8046_v56, %v8044_v63 }
 0x699   : > { %v4459_v11 = vmul.f32 %v5762_v43, %v3478_v45  ;;  %5763 = vpow2.f32 %v1630_v2  ;;  %v8341_v29 = vpop.permute.xlu0 %4009 }
 0x69c   : > { %4600 = vrot.lane.b32.xlu2 %v4517_v33, %s5940_s26  ;;  %v3667_v33 = vpop.f32.mrf.mxu2 }
 0x69d   : > { %4610 = vrot.lane.b32.xlu0 %v4522_v16, %s5940_s26  ;;  %v3757_v24 = vadd.f32 %v3756_v44, %v3667_v33 }
 0x69f   : > { %v5764_v1 = vpop.eup %5763 }
 0x6a0   : > { %v3810_v20 = vpop.permute.xlu1 %3809  ;;  %v1873_v17 = vmul.f32 0.0, %v5764_v1 }
 0x6a1   : > { %v3896_v22 = vsel %vm1036_vm0, %v8953_v50, %v3810_v20 }
 0x6a2   : > { %v4152_v41 = vadd.f32 %v4120_v30, %v3896_v22  ;;  %v2001_v48 = vadd.f32 %v8958_v3, %v1873_v17  ;;  %v8959_v30 = vld [vmem:[#allocation153_spill] sm:$0xff]  ;;  %v8969_v17 = vld [vmem:[#allocation94_spill] sm:$0xff] }
 0x6a3   : > { %v3342_v20 = vmul.f32 0.0, %v8959_v30 }
 0x6a4   : > { %v4731_v7 = vmul.f32 %v4667_v10, %v4152_v41  ;;  %3831 = vrot.lane.b32.xlu2 %v3730_v13, %s5940_s26  ;;  %5765 = vrcp.f32 %v2001_v48  ;;  %v1584_v41 = vsub.f32 -inf, %v8961_v53 }
 0x6a5   : > { %3841 = vrot.lane.b32.xlu0 %v3742_v14, %s5940_s26 }
 0x6a6   : > { %4763 = vst [vmem:[%s8036_s5 + $0x48] sm:$0xff] %v4731_v7  ;;  %v1628_v32 = vmul.f32 1.442695, %v1584_v41  ;;  %v1586_v7 = vsub.f32 -inf, %v8962_v21  ;;  %v8972_v21 = vld [vmem:[#allocation25_spill] sm:$0xff] }
 0x6a8   : > { %v4585_v12 = vpop.permute.xlu1 %4584 }
 0x6a9   : > { %v4669_v40 = vsel %vm1036_vm0, %v4349_v9, %v4585_v12  ;;  %v8963_v9 = vld [vmem:[#allocation163_spill] sm:$0xff] }
 0x6aa   : > { %v4733_v35 = vmul.f32 %v4669_v40, %v4154_v15  ;;  %v4491_v15 = vsub.f32 2.0, %v4459_v11  ;;  %v5766_v13 = vpop.eup %5765  ;;  %v3345_v12 = vmul.f32 0.0, %v8963_v9 }
 0x6ab   : > { %v4287_v56 = vmul.f32 %v5766_v13, %v2001_v48 }
 0x6ac   : > { %4765 = vst [vmem:[%s8036_s5 + $0x58] sm:$0xff] %v4733_v35  ;;  %4606 = vrot.lane.b32.xlu2 %v4520_v4, %s5940_s26  ;;  %v4523_v16 = vmul.f32 %v5762_v43, %v4491_v15  ;;  %v1632_v35 = vmul.f32 1.442695, %v1586_v7  ;;  %v4060_v43 = vsel %vm1036_vm0, %v5764_v1, %v8965_v62  ;;  %v3473_v2 = vadd.f32 %v8967_v57, %v3345_v12  ;;  %v8975_v12 = vld [vmem:[#allocation114_spill] sm:$0xff] }
 0x6ad   : > { %4616 = vrot.lane.b32.xlu0 %v4525_v60, %s5940_s26  ;;  %v4319_v45 = vsub.f32 2.0, %v4287_v56  ;;  %v8964_v60 = vld [vmem:[#allocation30_spill] sm:$0xff]  ;;  %v3348_v7 = vmul.f32 0.0, %v8972_v21 }
 0x6ae   : > { %v1591_v46 = vsub.f32 -inf, %v8964_v60  ;;  %v8976_v60 = vld [vmem:[#allocation152_spill] sm:$0xff] }
 0x6b0   : > { %v8358_v40 = vpop.permute.xlu1 %4007  ;;  %v1642_v44 = vmul.f32 1.442695, %v1591_v46  ;;  %v3476_v46 = vadd.f32 %v8181_v8, %v3348_v7  ;;  %v8980_v8 = vld [vmem:[#allocation69_spill] sm:$0xff] }
 0x6b4   : > { %3837 = vrot.lane.b32.xlu2 %v3737_v18, %s5940_s26  ;;  %v4351_v18 = vmul.f32 %v5766_v13, %v4319_v45  ;;  %v8973_v45 = vld [vmem:[#allocation63_spill] sm:$0xff] }
 0x6b5   : > { %3847 = vrot.lane.b32.xlu0 %v3750_v58, %s5940_s26  ;;  %v4124_v58 = vmul.f32 0.0, %v4060_v43  ;;  %v8977_v43 = vld [vmem:[#allocation39_spill] sm:$0xff] }
 0x6bb   : > { %3451 = vadd.xlane.f32.xlu1 %v8015_v31  ;;  %v3470_v31 = vadd.f32 %v8000_v5, %v3342_v20  ;;  %v3353_v20 = vmul.f32 0.0, %v8196_v27 }
 0x6bc   : > { %4612 = vrot.lane.b32.xlu2 %v4523_v16, %s5940_s26  ;;  %v8968_v16 = vld [vmem:[#allocation68_spill] sm:$0xff] }
 0x6bd   : > { %3853 = vrot.lane.b32.xlu0 %v3757_v24, %s5940_s26 }
 0x6c4   : > { %v3449_v50 = vpop.xlane.xlu0 %3448  ;;  %3843 = vrot.lane.b32.xlu2 %v3745_v6, %s5940_s26 }
 0x6c5   : > { %v3483_v22 = vadd.f32 %v3449_v50, %v3355_v49 }
 0x6c7   : > { %5767 = vrcp.f32 %v3483_v22 }
 0x6c8   : > { %5769 = vrcp.f32 %v3470_v31 }
 0x6c9   : > { %5771 = vpow2.f32 %v1636_v19  ;;  %v8970_v19 = vld [vmem:[#allocation58_spill] sm:$0xff] }
 0x6ca   : > { %5773 = vpow2.f32 %v1628_v32 }
 0x6cb   : > { %5775 = vpow2.f32 %v1632_v35 }
 0x6cc   : > { %5777 = vrcp.f32 %v3473_v2 }
 0x6cd   : > { %v5768_v63 = vpop.eup %5767  ;;  %5779 = vpow2.f32 %v1642_v44 }
 0x6ce   : > { %v4464_v14 = vmul.f32 %v5768_v63, %v3483_v22  ;;  %v5770_v59 = vpop.eup %5769 }
 0x6cf   : > { %v8354_v10 = vpop.xlane.xlu2 %3445  ;;  %v4451_v38 = vmul.f32 %v5770_v59, %v3470_v31  ;;  %v5772_v4 = vpop.eup %5771 }
 0x6d0   : > { %v4496_v5 = vsub.f32 2.0, %v4464_v14  ;;  %v1876_v11 = vmul.f32 0.0, %v5772_v4  ;;  %v8371_v6 = vpop.eup %5773  ;;  %v4063_v35 = vsel %vm1036_vm0, %v5772_v4, %v8975_v12  ;;  %v8978_v4 = vld [vmem:[#allocation97_spill] sm:$0xff] }
 0x6d1   : > { %v4483_v47 = vsub.f32 2.0, %v4451_v38  ;;  %v1872_v22 = vmul.f32 0.0, %v8371_v6  ;;  %v5776_v52 = vpop.eup %5775 }
 0x6d2   : > { %v4528_v23 = vmul.f32 %v5768_v63, %v4496_v5  ;;  %v2004_v3 = vadd.f32 %v8969_v17, %v1876_v11  ;;  %v5778_v37 = vpop.eup %5777  ;;  %v1874_v63 = vmul.f32 0.0, %v5776_v52 }
 0x6d3   : > { %v4515_v30 = vmul.f32 %v5770_v59, %v4483_v47  ;;  %v2000_v13 = vadd.f32 %v8970_v19, %v1872_v22  ;;  %v8382_v27 = vpop.eup %5779  ;;  %v4454_v56 = vmul.f32 %v5778_v37, %v3473_v2  ;;  %v8971_v59 = vld [vmem:[#allocation26_spill] sm:$0xff]  ;;  %v3662_v19 = vpop.f32.mrf.mxu0 }
 0x6d4   : > { %4622 = vrot.lane.b32.xlu0 %v4528_v23, %s5940_s26  ;;  %3821 = vrot.lane.b32.xlu1 %v8966_v0, %s5940_s26  ;;  %5781 = vrcp.f32 %v2004_v3  ;;  %v1589_v32 = vsub.f32 -inf, %v8971_v59  ;;  %v2002_v38 = vadd.f32 %v8973_v45, %v1874_v63  ;;  %v8974_v23 = vld [vmem:[#allocation167_spill] sm:$0xff]  ;;  %v1594_v0 = vsub.f32 -inf, %v8977_v43  ;;  %v3751_v63 = vpop.f32.mrf.mxu1 }
 0x6d5   : > { %v4061_v9 = vsel %vm1036_vm0, %v5776_v52, %v8974_v23  ;;  %v1879_v2 = vmul.f32 0.0, %v8382_v27  ;;  %v4486_v47 = vsub.f32 2.0, %v4454_v56  ;;  %v3752_v45 = vadd.f32 %v3751_v63, %v3662_v19  ;;  %v8989_v63 = vld [vmem:[#allocation74_spill] sm:$0xff] }
 0x6d6   : > { %v4125_v11 = vmul.f32 0.0, %v4061_v9 }
 0x6d7   : > { %v3818_v15 = vpop.permute.xlu0 %3817  ;;  %v4589_v33 = vpop.permute.xlu2 %4588 }
 0x6d8   : > { %v3900_v24 = vsel %vm1036_vm0, %v8968_v16, %v3818_v15  ;;  %v4671_v1 = vsel %vm1036_vm0, %v4351_v18, %v4589_v33  ;;  %v1638_v18 = vmul.f32 1.442695, %v1589_v32  ;;  %v2007_v16 = vadd.f32 %v8978_v4, %v1879_v2 }
 0x6d9   : > { %v4156_v48 = vadd.f32 %v4124_v58, %v3900_v24  ;;  %v4127_v58 = vmul.f32 0.0, %v4063_v35  ;;  %v8979_v24 = vld [vmem:[#allocation71_spill] sm:$0xff] }
 0x6da   : > { %v5782_v14 = vpop.eup %5781 }
 0x6db   : > { %v4735_v49 = vmul.f32 %v4671_v1, %v4156_v48  ;;  %v3443_v50 = vpop.xlane.xlu1 %3442  ;;  %v4290_v57 = vmul.f32 %v5782_v14, %v2004_v3 }
 0x6dc   : > { %v3481_v31 = vadd.f32 %v3443_v50, %v3353_v20  ;;  %4596 = vrot.lane.b32.xlu1 %v4515_v30, %s5940_s26 }
 0x6dd   : > { %4767 = vst [vmem:[%s8036_s5 + $0x68] sm:$0xff] %v4735_v49  ;;  %v1648_v49 = vmul.f32 1.442695, %v1594_v0  ;;  %v4322_v50 = vsub.f32 2.0, %v4290_v57  ;;  %v8983_v0 = vld [vmem:[#allocation108_spill] sm:$0xff] }
 0x6de   : > { %5783 = vrcp.f32 %v3481_v31  ;;  %v3351_v57 = vmul.f32 0.0, %v8983_v0 }
 0x6df   : > { %v8378_v53 = vpop.permute.xlu0 %4592  ;;  %v8380_v41 = vpop.permute.xlu2 %4011  ;;  %5785 = vrcp.f32 %v2000_v13  ;;  %v4354_v56 = vmul.f32 %v5782_v14, %v4322_v50  ;;  %v8982_v14 = vld [vmem:[#allocation33_spill] sm:$0xff] }
 0x6e0   : > { %5787 = vrcp.f32 %v2002_v38 }
 0x6e1   : > { %5789 = vrcp.f32 %v3476_v46 }
 0x6e2   : > { %5791 = vpow2.f32 %v1638_v18 }
 0x6e3   : > { %5793 = vrcp.f32 %v2007_v16 }
 0x6e4   : > { %v5784_v5 = vpop.eup %5783  ;;  %3827 = vrot.lane.b32.xlu1 %v8976_v60, %s5940_s26  ;;  %5795 = vpow2.f32 %v1648_v49 }
 0x6e5   : > { %v4462_v62 = vmul.f32 %v5784_v5, %v3481_v31  ;;  %v5786_v48 = vpop.eup %5785  ;;  %v4518_v31 = vmul.f32 %v5778_v37, %v4486_v47 }
 0x6e6   : > { %v4286_v22 = vmul.f32 %v5786_v48, %v2000_v13  ;;  %v5788_v52 = vpop.eup %5787 }
 0x6e7   : > { %v4494_v15 = vsub.f32 2.0, %v4462_v62  ;;  %v3824_v33 = vpop.permute.xlu0 %3823  ;;  %v3820_v44 = vpop.permute.xlu2 %3819  ;;  %v4288_v12 = vmul.f32 %v5788_v52, %v2002_v38  ;;  %v1592_v62 = vsub.f32 -inf, %v8982_v14 }
 0x6e8   : > { %v3903_v1 = vsel %vm1036_vm0, %v8979_v24, %v3824_v33  ;;  %v3901_v17 = vsel %vm1036_vm0, %v8980_v8, %v3820_v44  ;;  %v5790_v59 = vpop.eup %5789  ;;  %v4318_v7 = vsub.f32 2.0, %v4286_v22  ;;  %v8987_v33 = vld [vmem:[#allocation161_spill] sm:$0xff]  ;;  %v8988_v44 = vld [vmem:[#allocation48_spill] sm:$0xff]  ;;  %v3479_v24 = vadd.f32 %v8259_v51, %v3351_v57 }
 0x6e9   : > { %v4526_v3 = vmul.f32 %v5784_v5, %v4494_v15  ;;  %v4159_v30 = vadd.f32 %v4127_v58, %v3903_v1  ;;  %v8401_v20 = vadd.f32 %v4125_v11, %v3901_v17  ;;  %v8981_v5 = vld [vmem:[#allocation162_spill] sm:$0xff]  ;;  %v8411_v9 = vpop.eup %5791  ;;  %v4457_v35 = vmul.f32 %v5790_v59, %v3476_v46  ;;  %v8985_v11 = vld [vmem:[#allocation32_spill] sm:$0xff]  ;;  %v8986_v58 = vld [vmem:[#allocation67_spill] sm:$0xff] }
 0x6ea   : > { %v4059_v37 = vsel %vm1036_vm0, %v8371_v6, %v8981_v5  ;;  %v5794_v60 = vpop.eup %5793  ;;  %v8984_v6 = vld [vmem:[#allocation109_spill] sm:$0xff]  ;;  %v4066_v38 = vsel %vm1036_vm0, %v8382_v27, %v8985_v11  ;;  %v4350_v46 = vmul.f32 %v5786_v48, %v4318_v7  ;;  %v1597_v4 = vsub.f32 -inf, %v8988_v44  ;;  %v8991_v7 = vld [vmem:[#allocation100_spill] sm:$0xff] }
 0x6eb   : > { %4618 = vrot.lane.b32.xlu2 %v4526_v3, %s5940_s26  ;;  %v4123_v43 = vmul.f32 0.0, %v4059_v37  ;;  %v5796_v47 = vpop.eup %5795  ;;  %v4064_v18 = vsel %vm1036_vm0, %v8411_v9, %v8984_v6  ;;  %v4320_v8 = vsub.f32 2.0, %v4288_v12  ;;  %v4293_v17 = vmul.f32 %v5794_v60, %v2007_v16 }
 0x6ec   : > { %4602 = vrot.lane.b32.xlu1 %v4518_v31, %s5940_s26  ;;  %v4489_v3 = vsub.f32 2.0, %v4457_v35  ;;  %v1882_v27 = vmul.f32 0.0, %v5796_v47  ;;  %v4128_v48 = vmul.f32 0.0, %v4064_v18  ;;  %v4130_v49 = vmul.f32 0.0, %v4066_v38  ;;  %v8992_v38 = vld [vmem:[#allocation42_spill] sm:$0xff] }
 0x6ed   : > { %v1644_v19 = vmul.f32 1.442695, %v1592_v62  ;;  %5797 = vrcp.f32 %v3479_v24  ;;  %v1654_v37 = vmul.f32 1.442695, %v1597_v4 }
 0x6ee   : > { %v2010_v5 = vadd.f32 %v8991_v7, %v1882_v27 }
 0x6ef   : > { %v8405_v32 = vpop.permute.xlu0 %4598  ;;  %v4595_v21 = vpop.permute.xlu2 %4594  ;;  %5799 = vpow2.f32 %v1644_v19 }
 0x6f0   : > { %v4674_v13 = vsel %vm1036_vm0, %v4354_v56, %v4595_v21  ;;  %v8990_v21 = vld [vmem:[#allocation72_spill] sm:$0xff]  ;;  %5801 = vrcp.f32 %v2010_v5 }
 0x6f1   : > { %v4738_v23 = vmul.f32 %v4674_v13, %v4159_v30  ;;  %v4670_v30 = vsel %vm1036_vm0, %v4350_v46, %v8336_v34  ;;  %v4325_v13 = vsub.f32 2.0, %v4293_v17  ;;  %5803 = vpow2.f32 %v1654_v37 }
 0x6f2   : > { %v1595_v46 = vsub.f32 -inf, %v8992_v38  ;;  %v9001_v38 = vld [vmem:[#allocation80_spill] sm:$0xff] }
 0x6f3   : > { %4770 = vst [vmem:[%s8036_s5 + $0x80] sm:$0xff] %v4738_v23  ;;  %v3816_v2 = vpop.permute.xlu1 %3815  ;;  %3849 = vrot.lane.b32.xlu2 %v3752_v45, %s5940_s26  ;;  %v4521_v45 = vmul.f32 %v5790_v59, %v4489_v3  ;;  %v4352_v23 = vmul.f32 %v5788_v52, %v4320_v8  ;;  %v4357_v62 = vmul.f32 %v5794_v60, %v4325_v13 }
 0x6f4   : > { %v3899_v15 = vsel %vm1036_vm0, %v8986_v58, %v3816_v2  ;;  %3833 = vrot.lane.b32.xlu1 %v8987_v33, %s5940_s26  ;;  %v8993_v58 = vld [vmem:[#allocation27_spill] sm:$0xff]  ;;  %v4069_v60 = vsel %vm1036_vm0, %v5796_v47, %v8198_v26  ;;  %v1650_v3 = vmul.f32 1.442695, %v1595_v46 }
 0x6f5   : > { %v4155_v1 = vadd.f32 %v4123_v43, %v3899_v15  ;;  %v5798_v43 = vpop.eup %5797  ;;  %v8994_v15 = vld [vmem:[#allocation9_spill] sm:$0xff] }
 0x6f6   : > { %v8446_v2 = vpop.eup %5799  ;;  %v4460_v6 = vmul.f32 %v5798_v43, %v3479_v24  ;;  %v4133_v24 = vmul.f32 0.0, %v4069_v60  ;;  %5805 = vpow2.f32 %v1650_v3 }
 0x6f7   : > { %v4734_v50 = vmul.f32 %v4670_v30, %v4155_v1  ;;  %v3830_v31 = vpop.permute.xlu0 %3829  ;;  %v3826_v22 = vpop.permute.xlu2 %3825  ;;  %v8995_v30 = vld [vmem:[#allocation77_spill] sm:$0xff] }
 0x6f8   : > { %v3906_v56 = vsel %vm1036_vm0, %v8989_v63, %v3830_v31  ;;  %v3904_v51 = vsel %vm1036_vm0, %v8990_v21, %v3826_v22  ;;  %v5802_v18 = vpop.eup %5801  ;;  %v4492_v44 = vsub.f32 2.0, %v4460_v6  ;;  %v3354_v63 = vmul.f32 0.0, %v8166_v39 }
 0x6f9   : > { %4766 = vst [vmem:[%s8036_s5 + $0x60] sm:$0xff] %v4734_v50  ;;  %v4162_v16 = vadd.f32 %v4130_v49, %v3906_v56  ;;  %v8437_v34 = vadd.f32 %v4128_v48, %v3904_v51  ;;  %v5804_v11 = vpop.eup %5803  ;;  %v4296_v33 = vmul.f32 %v5802_v18, %v2010_v5  ;;  %v8996_v48 = vld [vmem:[#allocation75_spill] sm:$0xff] }
 0x6fa   : > { %v1885_v4 = vmul.f32 0.0, %v5804_v11  ;;  %v8997_v50 = vld [vmem:[#allocation103_spill] sm:$0xff]  ;;  %v4524_v19 = vmul.f32 %v5798_v43, %v4492_v44  ;;  %v3482_v56 = vadd.f32 %v8354_v10, %v3354_v63  ;;  %v4072_v10 = vsel %vm1036_vm0, %v5804_v11, %v8293_v28 }
 0x6fb   : > { %v4591_v12 = vpop.permute.xlu1 %4590  ;;  %v4328_v22 = vsub.f32 2.0, %v4296_v33 }
 0x6fc   : > { %v4672_v35 = vsel %vm1036_vm0, %v4352_v23, %v4591_v12  ;;  %4608 = vrot.lane.b32.xlu1 %v4521_v45, %s5940_s26  ;;  %v2013_v31 = vadd.f32 %v8997_v50, %v1885_v4  ;;  %v8470_v37 = vpop.eup %5805  ;;  %v8998_v45 = vld [vmem:[#allocation51_spill] sm:$0xff]  ;;  %v8999_v12 = vld [vmem:[#allocation110_spill] sm:$0xff] }
 0x6fd   : > { %v4736_v14 = vmul.f32 %v4672_v35, %v8401_v20  ;;  %v4067_v20 = vsel %vm1036_vm0, %v8446_v2, %v8993_v58  ;;  %v4360_v21 = vmul.f32 %v5802_v18, %v4328_v22  ;;  %v1598_v39 = vsub.f32 -inf, %v8998_v45  ;;  %v9000_v35 = vld [vmem:[#allocation57_spill] sm:$0xff]  ;;  %v9002_v58 = vld [vmem:[#allocation78_spill] sm:$0xff]  ;;  %v9003_v4 = vld [vmem:[#allocation23_spill] sm:$0xff] }
 0x6fe   : > { %v4131_v1 = vmul.f32 0.0, %v4067_v20  ;;  %5807 = vrcp.f32 %v2013_v31  ;;  %v4070_v23 = vsel %vm1036_vm0, %v8470_v37, %v8174_v55  ;;  %v3356_v45 = vmul.f32 0.0, %v8288_v36 }
 0x6ff   : > { %4768 = vst [vmem:[%s8036_s5 + $0x70] sm:$0xff] %v4736_v14  ;;  %v8443_v0 = vpop.permute.xlu0 %4604  ;;  %v4601_v57 = vpop.permute.xlu2 %4600  ;;  %5809 = vrcp.f32 %v3482_v56  ;;  %v1600_v14 = vsub.f32 -inf, %v9000_v35  ;;  %v1656_v18 = vmul.f32 1.442695, %v1598_v39 }
 0x700   : > { %v4677_v59 = vsel %vm1036_vm0, %v4357_v62, %v4601_v57  ;;  %v4134_v57 = vmul.f32 0.0, %v4070_v23  ;;  %v9006_v23 = vld [vmem:[#allocation29_spill] sm:$0xff] }
 0x701   : > { %v4741_v52 = vmul.f32 %v4677_v59, %v4162_v16  ;;  %v4136_v59 = vmul.f32 0.0, %v4072_v10  ;;  %v1660_v20 = vmul.f32 1.442695, %v1600_v14  ;;  %5811 = vpow2.f32 %v1656_v18  ;;  %v9009_v18 = vld [vmem:[#allocation91_spill] sm:$0xff] }
 0x702   : > { %v1590_v10 = vsub.f32 -inf, %v9006_v23 }
 0x703   : > { %4773 = vst [vmem:[%s8036_s5 + $0x98] sm:$0xff] %v4741_v52  ;;  %5813 = vpow2.f32 %v1660_v20 }
 0x704   : > { %3839 = vrot.lane.b32.xlu1 %v8994_v15, %s5940_s26  ;;  %v5808_v13 = vpop.eup %5807 }
 0x705   : > { %v4299_v62 = vmul.f32 %v5808_v13, %v2013_v31  ;;  %v5810_v43 = vpop.eup %5809  ;;  %v8503_v31 = vpop.permute.xlu1 %4013 }
 0x706   : > { %v4463_v15 = vmul.f32 %v5810_v43, %v3482_v56  ;;  %v9004_v56 = vld [vmem:[#allocation84_spill] sm:$0xff] }
 0x707   : > { %v3836_v8 = vpop.permute.xlu0 %3835  ;;  %v3832_v17 = vpop.permute.xlu2 %3831  ;;  %v4331_v60 = vsub.f32 2.0, %v4299_v62 }
 0x708   : > { %v3909_v27 = vsel %vm1036_vm0, %v8995_v30, %v3836_v8  ;;  %v3907_v49 = vsel %vm1036_vm0, %v8996_v48, %v3832_v17  ;;  %v4495_v33 = vsub.f32 2.0, %v4463_v15  ;;  %v8494_v30 = vpop.eup %5811  ;;  %v9010_v15 = vld [vmem:[#allocation37_spill] sm:$0xff] }
 0x709   : > { %v4165_v26 = vadd.f32 %v4133_v24, %v3909_v27  ;;  %v8462_v47 = vadd.f32 %v4131_v1, %v3907_v49  ;;  %v4363_v44 = vmul.f32 %v5808_v13, %v4331_v60  ;;  %v1587_v1 = vsub.f32 -inf, %v9003_v4  ;;  %v5814_v48 = vpop.eup %5813 }
 0x70a   : > { %v4527_v27 = vmul.f32 %v5810_v43, %v4495_v33  ;;  %v4075_v50 = vsel %vm1036_vm0, %v5814_v48, %v8358_v40  ;;  %v1888_v40 = vmul.f32 0.0, %v5814_v48  ;;  %v9008_v43 = vld [vmem:[#allocation90_spill] sm:$0xff]  ;;  %v1593_v33 = vsub.f32 -inf, %v9010_v15 }
 0x70b   : > { %v1634_v49 = vmul.f32 1.442695, %v1587_v1  ;;  %v4139_v22 = vmul.f32 0.0, %v4075_v50  ;;  %v9012_v48 = vld [vmem:[#allocation166_spill] sm:$0xff] }
 0x70c   : > { %4614 = vrot.lane.b32.xlu1 %v4524_v19, %s5940_s26 }
 0x70d   : > { %5815 = vpow2.f32 %v1634_v49 }
 0x70f   : > { %v8467_v51 = vpop.permute.xlu0 %4610  ;;  %v4607_v7 = vpop.permute.xlu2 %4606 }
 0x710   : > { %v4680_v5 = vsel %vm1036_vm0, %v4360_v21, %v4607_v7  ;;  %v9005_v7 = vld [vmem:[#allocation81_spill] sm:$0xff] }
 0x711   : > { %v4744_v16 = vmul.f32 %v4680_v5, %v4165_v26 }
 0x713   : > { %4776 = vst [vmem:[%s8036_s5 + $0xb0] sm:$0xff] %v4744_v16  ;;  %v5816_v13 = vpop.eup %5815 }
 0x714   : > { %3845 = vrot.lane.b32.xlu1 %v8999_v12, %s5940_s26  ;;  %v9007_v12 = vld [vmem:[#allocation105_spill] sm:$0xff]  ;;  %v1875_v62 = vmul.f32 0.0, %v5816_v13  ;;  %v4062_v49 = vsel %vm1036_vm0, %v5816_v13, %v9012_v48 }
 0x715   : > { %v2016_v35 = vadd.f32 %v9007_v12, %v1888_v40 }
 0x717   : > { %v3842_v52 = vpop.permute.xlu0 %3841  ;;  %v3838_v6 = vpop.permute.xlu2 %3837 }
 0x718   : > { %v3912_v46 = vsel %vm1036_vm0, %v9001_v38, %v3842_v52  ;;  %v3910_v55 = vsel %vm1036_vm0, %v9002_v58, %v3838_v6  ;;  %v1877_v52 = vmul.f32 0.0, %v8411_v9 }
 0x719   : > { %v4168_v28 = vadd.f32 %v4136_v59, %v3912_v46  ;;  %v8486_v11 = vadd.f32 %v4134_v57, %v3910_v55  ;;  %v2003_v57 = vadd.f32 %v9008_v43, %v1875_v62  ;;  %v1640_v59 = vmul.f32 1.442695, %v1590_v10 }
 0x71a   : > { %v2005_v38 = vadd.f32 %v9009_v18, %v1877_v52 }
 0x71c   : > { %3851 = vrot.lane.b32.xlu1 %v8151_v42, %s5940_s26  ;;  %v4073_v42 = vsel %vm1036_vm0, %v8494_v30, %v8251_v25 }
 0x71d   : > { %v4137_v26 = vmul.f32 0.0, %v4073_v42 }
 0x71f   : > { %v8491_v24 = vpop.permute.xlu0 %4616  ;;  %v4613_v8 = vpop.permute.xlu2 %4612 }
 0x720   : > { %v4683_v17 = vsel %vm1036_vm0, %v4363_v44, %v4613_v8  ;;  %v9011_v8 = vld [vmem:[#allocation92_spill] sm:$0xff] }
 0x721   : > { %v4747_v3 = vmul.f32 %v4683_v17, %v4168_v28 }
 0x723   : > { %4779 = vst [vmem:[%s8036_s5 + $0xc8] sm:$0xff] %v4747_v3  ;;  %v1646_v3 = vmul.f32 1.442695, %v1593_v33 }
 0x724   : > { %4620 = vrot.lane.b32.xlu1 %v4527_v27, %s5940_s26 }
 0x727   : > { %v3848_v19 = vpop.permute.xlu0 %3847  ;;  %v3844_v63 = vpop.permute.xlu2 %3843 }
 0x728   : > { %v3915_v21 = vsel %vm1036_vm0, %v9004_v56, %v3848_v19  ;;  %v3913_v5 = vsel %vm1036_vm0, %v9005_v7, %v3844_v63  ;;  %v4126_v19 = vmul.f32 0.0, %v4062_v49 }
 0x729   : > { %v4171_v16 = vadd.f32 %v4139_v22, %v3915_v21  ;;  %v8509_v25 = vadd.f32 %v4137_v26, %v3913_v5  ;;  %v1880_v22 = vmul.f32 0.0, %v8446_v2  ;;  %v9013_v5 = vld [vmem:[#allocation70_spill] sm:$0xff] }
 0x72e   : > { %v3452_v39 = vpop.xlane.xlu1 %3451 }
 0x72f   : > { %v3484_v14 = vadd.f32 %v3452_v39, %v3356_v45  ;;  %v9014_v45 = vld [vmem:[#allocation93_spill] sm:$0xff] }
 0x730   : > { %v2008_v13 = vadd.f32 %v9014_v45, %v1880_v22 }
 0x731   : > { %5817 = vrcp.f32 %v3484_v14 }
 0x732   : > { %5819 = vrcp.f32 %v2016_v35 }
 0x733   : > { %5821 = vrcp.f32 %v2003_v57 }
 0x734   : > { %5823 = vpow2.f32 %v1640_v59 }
 0x735   : > { %5825 = vrcp.f32 %v2005_v38 }
 0x737   : > { %v5818_v6 = vpop.eup %5817 }
 0x738   : > { %v4465_v36 = vmul.f32 %v5818_v6, %v3484_v14  ;;  %v5820_v46 = vpop.eup %5819 }
 0x739   : > { %v5822_v55 = vpop.eup %5821  ;;  %v4302_v20 = vmul.f32 %v5820_v46, %v2016_v35 }
 0x73a   : > { %v4497_v58 = vsub.f32 2.0, %v4465_v36  ;;  %v5824_v60 = vpop.eup %5823  ;;  %v4289_v44 = vmul.f32 %v5822_v55, %v2003_v57 }
 0x73b   : > { %v1878_v4 = vmul.f32 0.0, %v5824_v60  ;;  %v4334_v1 = vsub.f32 2.0, %v4302_v20  ;;  %v5826_v9 = vpop.eup %5825 }
 0x73c   : > { %v4529_v28 = vmul.f32 %v5818_v6, %v4497_v58  ;;  %v4321_v27 = vsub.f32 2.0, %v4289_v44  ;;  %v4291_v50 = vmul.f32 %v5826_v9, %v2005_v38  ;;  %v9016_v38 = vld [vmem:[#allocation95_spill] sm:$0xff]  ;;  %v9017_v58 = vld [vmem:[#allocation113_spill] sm:$0xff] }
 0x73d   : > { %v2006_v17 = vadd.f32 %v9011_v8, %v1878_v4  ;;  %v4366_v42 = vmul.f32 %v5820_v46, %v4334_v1  ;;  %v9018_v4 = vld [vmem:[#allocation73_spill] sm:$0xff]  ;;  %v9019_v1 = vld [vmem:[#allocation96_spill] sm:$0xff] }
 0x73e   : > { %4624 = vrot.lane.b32.xlu2 %v4529_v28, %s5940_s26  ;;  %v4353_v21 = vmul.f32 %v5822_v55, %v4321_v27  ;;  %v4323_v23 = vsub.f32 2.0, %v4291_v50  ;;  %v4065_v55 = vsel %vm1036_vm0, %v5824_v60, %v9017_v58  ;;  %v1883_v28 = vmul.f32 0.0, %v8470_v37  ;;  %v9027_v58 = vld [vmem:[#allocation66_spill] sm:$0xff] }
 0x73f   : > { %5827 = vrcp.f32 %v2006_v17  ;;  %v4129_v15 = vmul.f32 0.0, %v4065_v55  ;;  %v1603_v55 = vsub.f32 -inf, %v9027_v58 }
 0x740   : > { %5829 = vpow2.f32 %v1646_v3  ;;  %v4673_v10 = vsel %vm1036_vm0, %v4353_v21, %v8378_v53  ;;  %v4355_v14 = vmul.f32 %v5826_v9, %v4323_v23  ;;  %v2011_v9 = vadd.f32 %v9019_v1, %v1883_v28  ;;  %v9021_v21 = vld [vmem:[#allocation98_spill] sm:$0xff] }
 0x741   : > { %5831 = vrcp.f32 %v2008_v13  ;;  %v1666_v1 = vmul.f32 1.442695, %v1603_v55 }
 0x745   : > { %v4619_v26 = vpop.permute.xlu2 %4618  ;;  %v5828_v12 = vpop.eup %5827 }
 0x746   : > { %v4686_v63 = vsel %vm1036_vm0, %v4366_v42, %v4619_v26  ;;  %v3822_v56 = vpop.permute.xlu1 %3821  ;;  %v5830_v35 = vpop.eup %5829  ;;  %v4292_v57 = vmul.f32 %v5828_v12, %v2006_v17  ;;  %v9020_v42 = vld [vmem:[#allocation55_spill] sm:$0xff] }
 0x747   : > { %v4750_v7 = vmul.f32 %v4686_v63, %v4171_v16  ;;  %v3902_v40 = vsel %vm1036_vm0, %v9013_v5, %v3822_v56  ;;  %v9015_v16 = vld [vmem:[#allocation46_spill] sm:$0xff]  ;;  %v1881_v52 = vmul.f32 0.0, %v5830_v35  ;;  %v5832_v18 = vpop.eup %5831  ;;  %v1599_v50 = vsub.f32 -inf, %v9020_v42 }
 0x748   : > { %v4158_v39 = vadd.f32 %v4126_v19, %v3902_v40  ;;  %v1596_v43 = vsub.f32 -inf, %v9015_v16  ;;  %v4324_v46 = vsub.f32 2.0, %v4292_v57  ;;  %v4294_v20 = vmul.f32 %v5832_v18, %v2008_v13  ;;  %v9022_v40 = vld [vmem:[#allocation116_spill] sm:$0xff]  ;;  %v9025_v16 = vld [vmem:[#allocation99_spill] sm:$0xff] }
 0x749   : > { %4782 = vst [vmem:[%s8036_s5 + $0xe0] sm:$0xff] %v4750_v7  ;;  %v2009_v53 = vadd.f32 %v9016_v38, %v1881_v52  ;;  %v4068_v45 = vsel %vm1036_vm0, %v5830_v35, %v9022_v40  ;;  %v9026_v38 = vld [vmem:[#allocation60_spill] sm:$0xff] }
 0x74a   : > { %v4737_v2 = vmul.f32 %v4673_v10, %v4158_v39  ;;  %v1652_v36 = vmul.f32 1.442695, %v1596_v43  ;;  %v4356_v44 = vmul.f32 %v5828_v12, %v4324_v46  ;;  %v4326_v17 = vsub.f32 2.0, %v4294_v20 }
 0x74b   : > { %5833 = vrcp.f32 %v2009_v53  ;;  %v1886_v39 = vmul.f32 0.0, %v8494_v30  ;;  %v4132_v23 = vmul.f32 0.0, %v4068_v45 }
 0x74c   : > { %4769 = vst [vmem:[%s8036_s5 + $0x78] sm:$0xff] %v4737_v2  ;;  %5835 = vpow2.f32 %v1652_v36  ;;  %v4676_v60 = vsel %vm1036_vm0, %v4356_v44, %v8405_v32  ;;  %v4358_v48 = vmul.f32 %v5832_v18, %v4326_v17  ;;  %v1658_v32 = vmul.f32 1.442695, %v1599_v50  ;;  %v9023_v2 = vld [vmem:[#allocation64_spill] sm:$0xff] }
 0x74d   : > { %5837 = vrcp.f32 %v2011_v9  ;;  %v1602_v12 = vsub.f32 -inf, %v9023_v2  ;;  %v2014_v43 = vadd.f32 %v9025_v16, %v1886_v39  ;;  %v9034_v16 = vld [vmem:[#allocation83_spill] sm:$0xff] }
 0x74e   : > { %v4597_v62 = vpop.permute.xlu1 %4596 }
 0x74f   : > { %v4675_v59 = vsel %vm1036_vm0, %v4355_v14, %v4597_v62  ;;  %v9024_v14 = vld [vmem:[#allocation76_spill] sm:$0xff] }
 0x750   : > { %v4739_v6 = vmul.f32 %v4675_v59, %v8437_v34 }
 0x751   : > { %v5834_v27 = vpop.eup %5833 }
 0x752   : > { %4771 = vst [vmem:[%s8036_s5 + $0x88] sm:$0xff] %v4739_v6  ;;  %v5836_v37 = vpop.eup %5835  ;;  %v4295_v26 = vmul.f32 %v5834_v27, %v2009_v53  ;;  %v1664_v6 = vmul.f32 1.442695, %v1602_v12  ;;  %v1601_v53 = vsub.f32 -inf, %v9026_v38 }
 0x753   : > { %v1884_v19 = vmul.f32 0.0, %v5836_v37  ;;  %v5838_v56 = vpop.eup %5837 }
 0x754   : > { %v4327_v5 = vsub.f32 2.0, %v4295_v26  ;;  %v4297_v13 = vmul.f32 %v5838_v56, %v2011_v9 }
 0x755   : > { %v2012_v7 = vadd.f32 %v9021_v21, %v1884_v19  ;;  %v9030_v19 = vld [vmem:[#allocation104_spill] sm:$0xff] }
 0x756   : > { %v3828_v33 = vpop.permute.xlu1 %3827  ;;  %v4329_v59 = vsub.f32 2.0, %v4297_v13  ;;  %v9031_v13 = vld [vmem:[#allocation102_spill] sm:$0xff] }
 0x757   : > { %v3905_v34 = vsel %vm1036_vm0, %v9018_v4, %v3828_v33  ;;  %5839 = vrcp.f32 %v2012_v7  ;;  %v1662_v33 = vmul.f32 1.442695, %v1601_v53  ;;  %v9028_v4 = vld [vmem:[#allocation101_spill] sm:$0xff] }
 0x758   : > { %v4161_v8 = vadd.f32 %v4129_v15, %v3905_v34  ;;  %5841 = vpow2.f32 %v1658_v32  ;;  %v4361_v36 = vmul.f32 %v5838_v56, %v4329_v59  ;;  %v3854_v59 = vpop.permute.xlu0 %3853 }
 0x759   : > { %5843 = vrcp.f32 %v2014_v43 }
 0x75a   : > { %v4740_v3 = vmul.f32 %v4676_v60, %v4161_v8  ;;  %5845 = vpow2.f32 %v1664_v6  ;;  %v4071_v8 = vsel %vm1036_vm0, %v5836_v37, %v8200_v54 }
 0x75b   : > { %5847 = vpow2.f32 %v1662_v33  ;;  %v9035_v33 = vld [vmem:[#allocation87_spill] sm:$0xff] }
 0x75c   : > { %4772 = vst [vmem:[%s8036_s5 + $0x90] sm:$0xff] %v4740_v3  ;;  %v4135_v3 = vmul.f32 0.0, %v4071_v8 }
 0x75d   : > { %v5840_v18 = vpop.eup %5839 }
 0x75e   : > { %v4603_v49 = vpop.permute.xlu1 %4602  ;;  %v5842_v30 = vpop.eup %5841  ;;  %v4298_v20 = vmul.f32 %v5840_v18, %v2012_v7 }
 0x75f   : > { %v4678_v22 = vsel %vm1036_vm0, %v4358_v48, %v4603_v49  ;;  %v1887_v15 = vmul.f32 0.0, %v5842_v30  ;;  %v5844_v44 = vpop.eup %5843 }
 0x760   : > { %v4742_v63 = vmul.f32 %v4678_v22, %v8462_v47  ;;  %v4359_v47 = vmul.f32 %v5834_v27, %v4327_v5  ;;  %v4330_v9 = vsub.f32 2.0, %v4298_v20  ;;  %v5846_v17 = vpop.eup %5845  ;;  %v4300_v60 = vmul.f32 %v5844_v44, %v2014_v43  ;;  %v4623_v20 = vpop.permute.xlu0 %4622 }
 0x761   : > { %v2015_v34 = vadd.f32 %v9028_v4, %v1887_v15  ;;  %v1890_v42 = vmul.f32 0.0, %v5846_v17 }
 0x762   : > { %4774 = vst [vmem:[%s8036_s5 + $0xa0] sm:$0xff] %v4742_v63  ;;  %v4679_v35 = vsel %vm1036_vm0, %v4359_v47, %v8443_v0  ;;  %v4362_v48 = vmul.f32 %v5840_v18, %v4330_v9  ;;  %v4332_v26 = vsub.f32 2.0, %v4300_v60  ;;  %v5848_v63 = vpop.eup %5847  ;;  %v4074_v47 = vsel %vm1036_vm0, %v5842_v30, %v8290_v61  ;;  %v9037_v9 = vld [vmem:[#allocation86_spill] sm:$0xff] }
 0x763   : > { %5849 = vrcp.f32 %v2015_v34  ;;  %v2018_v54 = vadd.f32 %v9030_v19, %v1890_v42  ;;  %v1889_v32 = vmul.f32 0.0, %v5848_v63 }
 0x764   : > { %5851 = vpow2.f32 %v1666_v1  ;;  %v4682_v22 = vsel %vm1036_vm0, %v4362_v48, %v8467_v51  ;;  %v4364_v7 = vmul.f32 %v5844_v44, %v4332_v26  ;;  %v9036_v1 = vld [vmem:[#allocation85_spill] sm:$0xff] }
 0x765   : > { %5853 = vrcp.f32 %v2018_v54  ;;  %v2017_v39 = vadd.f32 %v9031_v13, %v1889_v32  ;;  %v2287_v8 = vadd.f32 %v9037_v9, %v9036_v1  ;;  %v9039_v48 = vld [vmem:[#allocation89_spill] sm:$0xff] }
 0x766   : > { %v3834_v10 = vpop.permute.xlu1 %3833 }
 0x767   : > { %v3908_v62 = vsel %vm1036_vm0, %v9024_v14, %v3834_v10  ;;  %v9032_v10 = vld [vmem:[#allocation106_spill] sm:$0xff]  ;;  %5855 = vrcp.f32 %v2017_v39 }
 0x768   : > { %v4164_v57 = vadd.f32 %v4132_v23, %v3908_v62  ;;  %v9033_v62 = vld [vmem:[#allocation82_spill] sm:$0xff] }
 0x769   : > { %v5850_v56 = vpop.eup %5849  ;;  %v2282_v43 = vadd.f32 %v9034_v16, %v9033_v62 }
 0x76a   : > { %v4743_v52 = vmul.f32 %v4679_v35, %v4164_v57  ;;  %v5852_v21 = vpop.eup %5851  ;;  %v4301_v40 = vmul.f32 %v5850_v56, %v2015_v34  ;;  %v4138_v57 = vmul.f32 0.0, %v4074_v47 }
 0x76b   : > { %v1891_v23 = vmul.f32 0.0, %v5852_v21  ;;  %v5854_v14 = vpop.eup %5853 }
 0x76c   : > { %4775 = vst [vmem:[%s8036_s5 + $0xa8] sm:$0xff] %v4743_v52  ;;  %v4333_v12 = vsub.f32 2.0, %v4301_v40  ;;  %v4304_v52 = vmul.f32 %v5854_v14, %v2018_v54 }
 0x76d   : > { %v2019_v2 = vadd.f32 %v9032_v10, %v1891_v23  ;;  %v5856_v61 = vpop.eup %5855 }
 0x76e   : > { %v4609_v46 = vpop.permute.xlu1 %4608  ;;  %v4365_v6 = vmul.f32 %v5850_v56, %v4333_v12  ;;  %v4336_v53 = vsub.f32 2.0, %v4304_v52  ;;  %v4303_v58 = vmul.f32 %v5856_v61, %v2017_v39 }
 0x76f   : > { %v4681_v28 = vsel %vm1036_vm0, %v4361_v36, %v4609_v46  ;;  %5857 = vrcp.f32 %v2019_v2  ;;  %v4077_v36 = vsel %vm1036_vm0, %v5846_v17, %v8380_v41  ;;  %v4076_v41 = vsel %vm1036_vm0, %v5848_v63, %v8341_v29 }
 0x770   : > { %v4745_v0 = vmul.f32 %v4681_v28, %v8486_v11  ;;  %v9029_v11 = vld [vmem:[#allocation79_spill] sm:$0xff]  ;;  %v4685_v38 = vsel %vm1036_vm0, %v4365_v6, %v8491_v24  ;;  %v4141_v55 = vmul.f32 0.0, %v4077_v36  ;;  %v3850_v24 = vpop.permute.xlu2 %3849  ;;  %v4335_v34 = vsub.f32 2.0, %v4303_v58 }
 0x771   : > { %v3916_v42 = vsel %vm1036_vm0, %v2287_v8, %v3850_v24 }
 0x772   : > { %4777 = vst [vmem:[%s8036_s5 + $0xb8] sm:$0xff] %v4745_v0  ;;  %v4368_v0 = vmul.f32 %v5854_v14, %v4336_v53  ;;  %v4367_v26 = vmul.f32 %v5856_v61, %v4335_v34 }
 0x774   : > { %v4688_v17 = vsel %vm1036_vm0, %v4368_v0, %v4623_v20 }
 0x775   : > { %v5858_v46 = vpop.eup %5857 }
 0x776   : > { %v3840_v27 = vpop.permute.xlu1 %3839  ;;  %v4305_v15 = vmul.f32 %v5858_v46, %v2019_v2 }
 0x777   : > { %v3911_v49 = vsel %vm1036_vm0, %v9029_v11, %v3840_v27  ;;  %v9038_v27 = vld [vmem:[#allocation88_spill] sm:$0xff] }
 0x778   : > { %v4167_v50 = vadd.f32 %v4135_v3, %v3911_v49  ;;  %v4337_v3 = vsub.f32 2.0, %v4305_v15  ;;  %v2292_v11 = vadd.f32 %v9039_v48, %v9038_v27  ;;  %v4078_v49 = vsel %vm1036_vm0, %v5852_v21, %v8503_v31 }
 0x77a   : > { %v4746_v37 = vmul.f32 %v4682_v22, %v4167_v50  ;;  %v4140_v50 = vmul.f32 0.0, %v4076_v41  ;;  %v3918_v29 = vsel %vm1036_vm0, %v2292_v11, %v3854_v59  ;;  %v4142_v22 = vmul.f32 0.0, %v4078_v49 }
 0x77c   : > { %4778 = vst [vmem:[%s8036_s5 + $0xc0] sm:$0xff] %v4746_v37  ;;  %v4172_v19 = vadd.f32 %v4140_v50, %v3916_v42  ;;  %v4369_v37 = vmul.f32 %v5858_v46, %v4337_v3  ;;  %v4174_v63 = vadd.f32 %v4142_v22, %v3918_v29 }
 0x77e   : > { %v4615_v5 = vpop.permute.xlu1 %4614 }
 0x77f   : > { %v4684_v45 = vsel %vm1036_vm0, %v4364_v7, %v4615_v5 }
 0x780   : > { %v4748_v51 = vmul.f32 %v4684_v45, %v8509_v25 }
 0x782   : > { %4780 = vst [vmem:[%s8036_s5 + $0xd0] sm:$0xff] %v4748_v51 }
 0x786   : > { %v3846_v35 = vpop.permute.xlu1 %3845 }
 0x787   : > { %v3914_v25 = vsel %vm1036_vm0, %v2282_v43, %v3846_v35 }
 0x788   : > { %v4170_v18 = vadd.f32 %v4138_v57, %v3914_v25 }
 0x78a   : > { %v4749_v30 = vmul.f32 %v4685_v38, %v4170_v18 }
 0x78c   : > { %4781 = vst [vmem:[%s8036_s5 + $0xd8] sm:$0xff] %v4749_v30 }
 0x78e   : > { %v3852_v28 = vpop.permute.xlu1 %3851 }
 0x78f   : > { %v3917_v44 = vsel %vm1036_vm0, %v9035_v33, %v3852_v28 }
 0x790   : > { %v4173_v4 = vadd.f32 %v4141_v55, %v3917_v44 }
 0x792   : > { %v4752_v60 = vmul.f32 %v4688_v17, %v4173_v4 }
 0x794   : > { %4784 = vst [vmem:[%s8036_s5 + $0xf0] sm:$0xff] %v4752_v60 }
 0x796   : > { %v4621_v54 = vpop.permute.xlu1 %4620 }
 0x797   : > { %v4687_v31 = vsel %vm1036_vm0, %v4367_v26, %v4621_v54 }
 0x798   : > { %v4751_v56 = vmul.f32 %v4687_v31, %v4172_v19  ;;  %v4625_v21 = vpop.permute.xlu2 %4624 }
 0x799   : > { %v4689_v7 = vsel %vm1036_vm0, %v4369_v37, %v4625_v21 }
 0x79a   : > { %4783 = vst [vmem:[%s8036_s5 + $0xe8] sm:$0xff] %v4751_v56  ;;  %v4753_v32 = vmul.f32 %v4689_v7, %v4174_v63 }
 0x79c   : > { %4785 = vst [vmem:[%s8036_s5 + $0xf8] sm:$0xff] %v4753_v32 }
 0x79d   : > { %5886 = shalt.err (!%p5883_p5)
}
 0x79e   : > { %s5941_s29 = smov 128   ;;  %s5942_s30 = smov 8  }
 0x79f   : > { %5288 = dma.vmem_to_hbm [thread:$0]  (%p6008_p4), %s4804_s9, 4096, %s4806_s10, %s4787_s11, %s5941_s29, %s5941_s29, %s5942_s30  }
 0x7a0 PF: > { %p5294_p6 = scmp.ge.s32.totalorder %s5937_s20, 2  ;;  %s4820_s5 = sand.u32 1, %s5917_s15  }
 0x7a1   : > { %s4821_s6 = scalar_lea.sflag [#allocation7], %s4820_s5 }
 0x7a2   : > { %p5291_p7 = pnand %p5294_p6, %p6015_p8 }
 0x7a4   : > { %p5292_p9 = pneg %p5291_p7 }
 0x7a6   : > { %5912 = dma.done.wait (%p5292_p9), %s4821_s6, 4096  }
 0x7a7   : > { %5914 = vsyncadd (%p5292_p9), %s4821_s6, 4294963200  ;;  %s17_s20 = sadd.s32 1, %s5937_s20   ;;  %s9040_s15 = smov %s5921_s16 }
 0x7a8   : > { %p14_p10 = scmp.ge.s32.totalorder %s17_s20, 4   ;;  %s9041_s16 = smov %s5925_s17 }
 0x7a9   : > { %s9042_s17 = smov %s6021_s28  ;;  %s9043_s18 = smov %s5933_s19 }
 0x7aa   : > { %s9044_s19 = smov %s9046_s23  ;;  %16 = sbr.rel (!%p14_p10) target bundleno = 4 (0x4), region = 93 }
 0x7af   :  { %4827 = vsyncpa [#allocation7], 1 }
 0x7b0   :  { %4829 = vsyncpa [#allocation7 + $0x1], 1 }

</bundles_post_ra>
